<compile_context>
chip_gen: v7x
topology: tpu7x:2x2x1
jax: 0.10.0
libtpu: 0.0.40
codegen_flags: <defaults>
</compile_context>

<pallas_src>
import jax
import jax.numpy as jnp
from jax.experimental import pallas as pl
from jax.experimental.pallas import tpu as pltpu


H1, H2, H3 = 2048, 1024, 512   # fc1 / fc2 / fc3 widths (from the PyTorch module)
NC = 4                         # pipeline chunks over fc2-N / fc3-K
CHUNK = H2 // NC               # 256 columns/rows per chunk (multiple of 128 lanes)


def _fused_mlp_kernel(x_ref, w1_ref, b1_ref, w2_ref, b2_ref,
                      w3_ref, b3_ref, w4_ref, b4_ref,
                      o_ref, h1_ref, acc_ref):
    """Pipelined fused MLP: per grid step, one 256-wide chunk of fc2/fc3."""
    j = pl.program_id(0)

    # Step 0: fc1 (only 256 KiB of bf16 weights) + fc3 accumulator init.
    @pl.when(j == 0)
    def _():
        h1 = jnp.dot(x_ref[...], w1_ref[...],
                     preferred_element_type=jnp.float32)
        h1 = jnp.maximum(h1 + b1_ref[...], 0.0)
        h1_ref[...] = h1.astype(h1_ref.dtype)          # keep bf16 for the MXU
        acc_ref[...] = jnp.zeros_like(acc_ref)

    # Every step: fc2 column chunk + matching fc3 row chunk, accumulated
    # into the (B, 512) f32 scratch.  W2/W3 chunk DMA for step j+1 overlaps
    # with this compute via BlockSpec double-buffering.
    h2 = jnp.dot(h1_ref[...], w2_ref[...],
                 preferred_element_type=jnp.float32)
    h2 = jnp.maximum(h2 + b2_ref[...], 0.0)
    acc_ref[...] += jnp.dot(h2.astype(w3_ref.dtype), w3_ref[...],
                            preferred_element_type=jnp.float32)

    # Last step: fc3 bias + relu, then fc4 (no relu), write the output block.
    @pl.when(j == pl.num_programs(0) - 1)
    def _():
        h3 = jnp.maximum(acc_ref[...] + b3_ref[...], 0.0)
        out = jnp.dot(h3.astype(w4_ref.dtype), w4_ref[...],
                      preferred_element_type=jnp.float32)
        o_ref[...] = (out + b4_ref[...]).astype(o_ref.dtype)


def combined_feature_mlp(x, params):
    """x: [B, input_dim] -> [B, num_classes]. Single pipelined Pallas call.

    Weights are consumed in bf16 (f32 accumulation).  Callers should store
    the weights in bf16 so the casts below are no-ops and no per-call HBM
    cast materializes.
    """
    (w1, b1), (w2, b2), (w3, b3), (w4, b4) = params
    B, input_dim = x.shape
    num_classes = w4.shape[1]
    bf = jnp.bfloat16

    args = (
        x.astype(bf),
        w1.astype(bf), b1.reshape(1, -1).astype(jnp.float32),
        w2.astype(bf), b2.reshape(1, -1).astype(jnp.float32),
        w3.astype(bf), b3.reshape(1, -1).astype(jnp.float32),
        w4.astype(bf), b4.reshape(1, -1).astype(jnp.float32),
    )

    flops = 2 * B * (input_dim * H1 + H1 * H2 + H2 * H3 + H3 * num_classes)
    bytes_accessed = (sum(int(a.size) * a.dtype.itemsize for a in args)
                      + B * num_classes * 4)

    grid_spec = pltpu.PrefetchScalarGridSpec(
        num_scalar_prefetch=0,
        grid=(NC,),
        in_specs=[
            pl.BlockSpec((B, input_dim), lambda j: (0, 0)),        # x (resident)
            pl.BlockSpec((input_dim, H1), lambda j: (0, 0)),       # W1 (resident)
            pl.BlockSpec((1, H1), lambda j: (0, 0)),               # b1
            pl.BlockSpec((H1, CHUNK), lambda j: (0, j)),           # W2 column chunk
            pl.BlockSpec((1, CHUNK), lambda j: (0, j)),            # b2 chunk
            pl.BlockSpec((CHUNK, H3), lambda j: (j, 0)),           # W3 row chunk
            pl.BlockSpec((1, H3), lambda j: (0, 0)),               # b3
            pl.BlockSpec((H3, num_classes), lambda j: (0, 0)),     # W4 (resident)
            pl.BlockSpec((1, num_classes), lambda j: (0, 0)),      # b4
        ],
        out_specs=pl.BlockSpec((B, num_classes), lambda j: (0, 0)),
        scratch_shapes=[
            pltpu.VMEM((B, H1), bf),            # h1 = relu(fc1(x))
            pltpu.VMEM((B, H3), jnp.float32),   # fc3 pre-activation accumulator
        ],
    )

    return pl.pallas_call(
        _fused_mlp_kernel,
        out_shape=jax.ShapeDtypeStruct((B, num_classes), jnp.float32),
        grid_spec=grid_spec,
        compiler_params=pltpu.CompilerParams(
            dimension_semantics=("arbitrary",),     # reduction axis, output resident
            vmem_limit_bytes=16 * 1024 * 1024,
        ),
        cost_estimate=pl.CostEstimate(
            flops=flops, bytes_accessed=bytes_accessed, transcendentals=0),
    )(*args)


combined_feature_mlp_jit = jax.jit(combined_feature_mlp)


def init_params(key, input_dim, num_classes):
    """Deterministic synthetic params. Weights stored as [in_dim, out_dim] f32."""
    dims = [input_dim, H1, H2, H3, num_classes]
    params = []
    for i in range(4):
        key, kw, kb = jax.random.split(key, 3)
        scale = 1.0 / jnp.sqrt(jnp.float32(dims[i]))
        w = jax.random.uniform(
            kw, (dims[i], dims[i + 1]), jnp.float32, minval=-scale, maxval=scale)
        b = jax.random.uniform(
            kb, (dims[i + 1],), jnp.float32, minval=-scale, maxval=scale)
        params.append((w, b))
    return params


def reference_mlp(x, params):
    """Pure-f32 reference matching the PyTorch module."""
    x = x.astype(jnp.float32)
    for i, (w, b) in enumerate(params):
        x = x @ w + b
        if i < 3:
            x = jnp.maximum(x, 0.0)
    return x


if __name__ == "__main__":
    B = 8
    INPUT_DIM = 64
    NUM_CLASSES = 10

    key = jax.random.PRNGKey(0)
    key, kx = jax.random.split(key)
    x = jax.random.normal(kx, (B, INPUT_DIM), dtype=jnp.float32)
    params = init_params(key, INPUT_DIM, NUM_CLASSES)

    out = jax.block_until_ready(combined_feature_mlp_jit(x, params))
    ref = jax.block_until_ready(reference_mlp(x, params))

    assert out.shape == (B, NUM_CLASSES)
    # bf16 weight/activation path vs. pure-f32 reference -> looser tolerance.
    assert jnp.allclose(out, ref, atol=1e-2, rtol=2e-2), "mismatch vs reference"

    print("KERNEL_OK")
</pallas_src>

<mosaic_0001>
module attributes {stable_mosaic.version = 11 : i64} {
  func.func @_fused_mlp_kernel(%arg0: i32, %arg1: memref<8x64xbf16, #tpu.memory_space<vmem>>, %arg2: memref<64x2048xbf16, #tpu.memory_space<vmem>>, %arg3: memref<1x2048xf32, #tpu.memory_space<vmem>>, %arg4: memref<2048x256xbf16, #tpu.memory_space<vmem>>, %arg5: memref<1x256xf32, #tpu.memory_space<vmem>>, %arg6: memref<256x512xbf16, #tpu.memory_space<vmem>>, %arg7: memref<1x512xf32, #tpu.memory_space<vmem>>, %arg8: memref<512x10xbf16, #tpu.memory_space<vmem>>, %arg9: memref<1x10xf32, #tpu.memory_space<vmem>>, %arg10: memref<8x10xf32, #tpu.memory_space<vmem>>, %arg11: memref<8x2048xbf16, #tpu.memory_space<vmem>>, %arg12: memref<8x512xf32, #tpu.memory_space<vmem>>) attributes {dimension_semantics = [#tpu.dimension_semantics<arbitrary>], iteration_bounds = array<i64: 4>, scalar_prefetch = 0 : i64, scratch_operands = 2 : i64, tpu.core_type = #tpu.core_type<tc>, window_params = [{pipeline_mode = #tpu.pipeline_mode<synchronous>, transform_indices = @transform_0, window_bounds = array<i64: 8, 64>}, {pipeline_mode = #tpu.pipeline_mode<synchronous>, transform_indices = @transform_1, window_bounds = array<i64: 64, 2048>}, {pipeline_mode = #tpu.pipeline_mode<synchronous>, transform_indices = @transform_2, window_bounds = array<i64: 1, 2048>}, {transform_indices = @transform_3, window_bounds = array<i64: 2048, 256>}, {transform_indices = @transform_4, window_bounds = array<i64: 1, 256>}, {transform_indices = @transform_5, window_bounds = array<i64: 256, 512>}, {pipeline_mode = #tpu.pipeline_mode<synchronous>, transform_indices = @transform_6, window_bounds = array<i64: 1, 512>}, {pipeline_mode = #tpu.pipeline_mode<synchronous>, transform_indices = @transform_7, window_bounds = array<i64: 512, 10>}, {pipeline_mode = #tpu.pipeline_mode<synchronous>, transform_indices = @transform_8, window_bounds = array<i64: 1, 10>}, {pipeline_mode = #tpu.pipeline_mode<synchronous>, transform_indices = @transform_9, window_bounds = array<i64: 8, 10>}]} {
    %c0_i32 = arith.constant 0 : i32
    %0 = arith.cmpi eq, %arg0, %c0_i32 : i32
    %1 = arith.extui %0 : i1 to i32
    %c0_i32_0 = arith.constant 0 : i32
    %2 = arith.cmpi ne, %1, %c0_i32_0 : i32
    scf.if %2 {
      %c0_15 = arith.constant 0 : index
      %c0_16 = arith.constant 0 : index
      %20 = vector.load %arg1[%c0_15, %c0_16] : memref<8x64xbf16, #tpu.memory_space<vmem>>, vector<8x64xbf16>
      %c0_17 = arith.constant 0 : index
      %c0_18 = arith.constant 0 : index
      %21 = vector.load %arg2[%c0_17, %c0_18] : memref<64x2048xbf16, #tpu.memory_space<vmem>>, vector<64x2048xbf16>
      %cst_19 = arith.constant dense<0.000000e+00> : vector<8x2048xf32>
      %22 = tpu.matmul %20, %21, %cst_19 {dimension_numbers = #tpu.dot_dimension_numbers<[1], [0], [0], [1], [0, 0, 1, 1], [], []>} : vector<8x64xbf16>, vector<64x2048xbf16>, vector<8x2048xf32> -> vector<8x2048xf32>
      %c0_20 = arith.constant 0 : index
      %c0_21 = arith.constant 0 : index
      %23 = vector.load %arg3[%c0_20, %c0_21] : memref<1x2048xf32, #tpu.memory_space<vmem>>, vector<1x2048xf32>
      %24 = vector.broadcast %23 : vector<1x2048xf32> to vector<8x2048xf32>
      %25 = arith.addf %22, %24 : vector<8x2048xf32>
      %cst_22 = arith.constant 0.000000e+00 : f32
      %26 = vector.broadcast %cst_22 : f32 to vector<8x2048xf32>
      %27 = arith.maximumf %25, %26 : vector<8x2048xf32>
      %28 = arith.truncf %27 : vector<8x2048xf32> to vector<8x2048xbf16>
      %c0_23 = arith.constant 0 : index
      %c0_24 = arith.constant 0 : index
      %29 = vector.load %arg11[%c0_23, %c0_24] : memref<8x2048xbf16, #tpu.memory_space<vmem>>, vector<8x2048xbf16>
      tpu.vector_store %arg11[%c0_23, %c0_24], %28 {strides = array<i32>} : memref<8x2048xbf16, #tpu.memory_space<vmem>>, vector<8x2048xbf16>,
      %cst_25 = arith.constant 0.000000e+00 : f32
      %30 = vector.broadcast %cst_25 : f32 to vector<8x512xf32>
      %c0_26 = arith.constant 0 : index
      %c0_27 = arith.constant 0 : index
      %31 = vector.load %arg12[%c0_26, %c0_27] : memref<8x512xf32, #tpu.memory_space<vmem>>, vector<8x512xf32>
      tpu.vector_store %arg12[%c0_26, %c0_27], %30 {strides = array<i32>} : memref<8x512xf32, #tpu.memory_space<vmem>>, vector<8x512xf32>,
    } else {
    }
    %c0 = arith.constant 0 : index
    %c0_1 = arith.constant 0 : index
    %3 = vector.load %arg11[%c0, %c0_1] : memref<8x2048xbf16, #tpu.memory_space<vmem>>, vector<8x2048xbf16>
    %c0_2 = arith.constant 0 : index
    %c0_3 = arith.constant 0 : index
    %4 = vector.load %arg4[%c0_2, %c0_3] : memref<2048x256xbf16, #tpu.memory_space<vmem>>, vector<2048x256xbf16>
    %cst = arith.constant dense<0.000000e+00> : vector<8x256xf32>
    %5 = tpu.matmul %3, %4, %cst {dimension_numbers = #tpu.dot_dimension_numbers<[1], [0], [0], [1], [0, 0, 1, 1], [], []>} : vector<8x2048xbf16>, vector<2048x256xbf16>, vector<8x256xf32> -> vector<8x256xf32>
    %c0_4 = arith.constant 0 : index
    %c0_5 = arith.constant 0 : index
    %6 = vector.load %arg5[%c0_4, %c0_5] : memref<1x256xf32, #tpu.memory_space<vmem>>, vector<1x256xf32>
    %7 = vector.broadcast %6 : vector<1x256xf32> to vector<8x256xf32>
    %8 = arith.addf %5, %7 : vector<8x256xf32>
    %cst_6 = arith.constant 0.000000e+00 : f32
    %9 = vector.broadcast %cst_6 : f32 to vector<8x256xf32>
    %10 = arith.maximumf %8, %9 : vector<8x256xf32>
    %c0_7 = arith.constant 0 : index
    %c0_8 = arith.constant 0 : index
    %11 = vector.load %arg12[%c0_7, %c0_8] : memref<8x512xf32, #tpu.memory_space<vmem>>, vector<8x512xf32>
    %12 = arith.truncf %10 : vector<8x256xf32> to vector<8x256xbf16>
    %c0_9 = arith.constant 0 : index
    %c0_10 = arith.constant 0 : index
    %13 = vector.load %arg6[%c0_9, %c0_10] : memref<256x512xbf16, #tpu.memory_space<vmem>>, vector<256x512xbf16>
    %cst_11 = arith.constant dense<0.000000e+00> : vector<8x512xf32>
    %14 = tpu.matmul %12, %13, %cst_11 {dimension_numbers = #tpu.dot_dimension_numbers<[1], [0], [0], [1], [0, 0, 1, 1], [], []>} : vector<8x256xbf16>, vector<256x512xbf16>, vector<8x512xf32> -> vector<8x512xf32>
    %15 = arith.addf %11, %14 : vector<8x512xf32>
    %c0_12 = arith.constant 0 : index
    %c0_13 = arith.constant 0 : index
    %16 = vector.load %arg12[%c0_12, %c0_13] : memref<8x512xf32, #tpu.memory_space<vmem>>, vector<8x512xf32>
    tpu.vector_store %arg12[%c0_12, %c0_13], %15 {strides = array<i32>} : memref<8x512xf32, #tpu.memory_space<vmem>>, vector<8x512xf32>,
    %c3_i32 = arith.constant 3 : i32
    %17 = arith.cmpi eq, %arg0, %c3_i32 : i32
    %18 = arith.extui %17 : i1 to i32
    %c0_i32_14 = arith.constant 0 : i32
    %19 = arith.cmpi ne, %18, %c0_i32_14 : i32
    scf.if %19 {
      %c0_15 = arith.constant 0 : index
      %c0_16 = arith.constant 0 : index
      %20 = vector.load %arg12[%c0_15, %c0_16] : memref<8x512xf32, #tpu.memory_space<vmem>>, vector<8x512xf32>
      %c0_17 = arith.constant 0 : index
      %c0_18 = arith.constant 0 : index
      %21 = vector.load %arg7[%c0_17, %c0_18] : memref<1x512xf32, #tpu.memory_space<vmem>>, vector<1x512xf32>
      %22 = vector.broadcast %21 : vector<1x512xf32> to vector<8x512xf32>
      %23 = arith.addf %20, %22 : vector<8x512xf32>
      %cst_19 = arith.constant 0.000000e+00 : f32
      %24 = vector.broadcast %cst_19 : f32 to vector<8x512xf32>
      %25 = arith.maximumf %23, %24 : vector<8x512xf32>
      %26 = arith.truncf %25 : vector<8x512xf32> to vector<8x512xbf16>
      %c0_20 = arith.constant 0 : index
      %c0_21 = arith.constant 0 : index
      %27 = vector.load %arg8[%c0_20, %c0_21] : memref<512x10xbf16, #tpu.memory_space<vmem>>, vector<512x10xbf16>
      %cst_22 = arith.constant dense<0.000000e+00> : vector<8x10xf32>
      %28 = tpu.matmul %26, %27, %cst_22 {dimension_numbers = #tpu.dot_dimension_numbers<[1], [0], [0], [1], [0, 0, 1, 1], [], []>} : vector<8x512xbf16>, vector<512x10xbf16>, vector<8x10xf32> -> vector<8x10xf32>
      %c0_23 = arith.constant 0 : index
      %c0_24 = arith.constant 0 : index
      %29 = vector.load %arg9[%c0_23, %c0_24] : memref<1x10xf32, #tpu.memory_space<vmem>>, vector<1x10xf32>
      %30 = vector.broadcast %29 : vector<1x10xf32> to vector<8x10xf32>
      %31 = arith.addf %28, %30 : vector<8x10xf32>
      %c0_25 = arith.constant 0 : index
      %c0_26 = arith.constant 0 : index
      %32 = vector.load %arg10[%c0_25, %c0_26] : memref<8x10xf32, #tpu.memory_space<vmem>>, vector<8x10xf32>
      tpu.vector_store %arg10[%c0_25, %c0_26], %31 {strides = array<i32>} : memref<8x10xf32, #tpu.memory_space<vmem>>, vector<8x10xf32>,
    } else {
    }
    return
  }
  func.func @transform_0(%arg0: i32) -> (i32, i32) {
    %c0_i32 = arith.constant 0 : i32
    %c0_i32_0 = arith.constant 0 : i32
    %c0_i32_1 = arith.constant 0 : i32
    return %c0_i32, %c0_i32_0 : i32, i32
  }
  func.func @transform_1(%arg0: i32) -> (i32, i32) {
    %c0_i32 = arith.constant 0 : i32
    %c0_i32_0 = arith.constant 0 : i32
    %c0_i32_1 = arith.constant 0 : i32
    return %c0_i32, %c0_i32_0 : i32, i32
  }
  func.func @transform_2(%arg0: i32) -> (i32, i32) {
    %c0_i32 = arith.constant 0 : i32
    %c0_i32_0 = arith.constant 0 : i32
    %c0_i32_1 = arith.constant 0 : i32
    return %c0_i32, %c0_i32_0 : i32, i32
  }
  func.func @transform_3(%arg0: i32) -> (i32, i32) {
    %c0_i32 = arith.constant 0 : i32
    %c0_i32_0 = arith.constant 0 : i32
    return %c0_i32, %arg0 : i32, i32
  }
  func.func @transform_4(%arg0: i32) -> (i32, i32) {
    %c0_i32 = arith.constant 0 : i32
    %c0_i32_0 = arith.constant 0 : i32
    return %c0_i32, %arg0 : i32, i32
  }
  func.func @transform_5(%arg0: i32) -> (i32, i32) {
    %c0_i32 = arith.constant 0 : i32
    %c0_i32_0 = arith.constant 0 : i32
    return %arg0, %c0_i32 : i32, i32
  }
  func.func @transform_6(%arg0: i32) -> (i32, i32) {
    %c0_i32 = arith.constant 0 : i32
    %c0_i32_0 = arith.constant 0 : i32
    %c0_i32_1 = arith.constant 0 : i32
    return %c0_i32, %c0_i32_0 : i32, i32
  }
  func.func @transform_7(%arg0: i32) -> (i32, i32) {
    %c0_i32 = arith.constant 0 : i32
    %c0_i32_0 = arith.constant 0 : i32
    %c0_i32_1 = arith.constant 0 : i32
    return %c0_i32, %c0_i32_0 : i32, i32
  }
  func.func @transform_8(%arg0: i32) -> (i32, i32) {
    %c0_i32 = arith.constant 0 : i32
    %c0_i32_0 = arith.constant 0 : i32
    %c0_i32_1 = arith.constant 0 : i32
    return %c0_i32, %c0_i32_0 : i32, i32
  }
  func.func @transform_9(%arg0: i32) -> (i32, i32) {
    %c0_i32 = arith.constant 0 : i32
    %c0_i32_0 = arith.constant 0 : i32
    %c0_i32_1 = arith.constant 0 : i32
    return %c0_i32, %c0_i32_0 : i32, i32
  }
}

</mosaic_0001>

<bundles_post_ra>
// kernel: combined_feature_mlp.1
= control target key start
LH: loop header
LB: loop body
LE: loop exit
PB: predicated region body
PF: predicated region fallthrough
CT: control target
= control target key end

     0   :  { %14 = vsyncpa [#allocation6], 0  ;;  %s6416_s30 = smov 0   ;;  %s6418_s10 = smov 0   ;;  %s7739_s0 = inlined_call_operand.vmem [shape: bf16[8,64], index: 0, kind: input, shape index: {}]   ;;  %s7740_s1 = inlined_call_operand.vmem [shape: bf16[64,2048], index: 1, kind: input, shape index: {}]   ;;  %s7741_s2 = inlined_call_operand.vmem [shape: f32[1,2048], index: 2, kind: input, shape index: {}]   ;;  %s7742_s3 = inlined_call_operand.vmem [shape: bf16[2048,1024], index: 3, kind: input, shape index: {}]   ;;  %s7743_s4 = inlined_call_operand.vmem [shape: f32[1,1024], index: 4, kind: input, shape index: {}]   ;;  %s7744_s5 = inlined_call_operand.vmem [shape: bf16[1024,512], index: 5, kind: input, shape index: {}]   ;;  %s7745_s6 = inlined_call_operand.vmem [shape: f32[1,512], index: 6, kind: input, shape index: {}]   ;;  %s7746_s7 = inlined_call_operand.vmem [shape: bf16[512,10], index: 7, kind: input, shape index: {}]   ;;  %s7747_s8 = inlined_call_operand.vmem [shape: f32[1,10], index: 8, kind: input, shape index: {}]   ;;  %s7748_s9 = inlined_call_operand.hbm [shape: f32[8,10], index: 9, kind: output, shape index: {}]  }
   0x1   :  { %s6420_s11 = smov 0  }
   0x2 LB: > { %s6432_s12 = sadd.s32 4294967295, %s6361_s11   ;;  %s6435_s13 = sadd.s32 1, %s6361_s11   ;;  %s6361_s11 = sphi %s6420_s11, %s7751_s11   ;;  %s6357_s10 = sphi %s6418_s10, %s7750_s10   ;;  %s6353_s30 = sphi %s6416_s30, %s7749_s30  }
   0x3   : > { %s87_s14 = ssub.s32 %s6361_s11, %s6435_s13  ;;  %s90_s15 = sadd.s32 1, %s6357_s10 }
   0x4   : > { %p88_p0 = scmp.eq.s32.totalorder %s87_s14, 0  ;;  %p97_p1 = scmp.ne.s32.totalorder %s6357_s10, %s6353_s30 }
   0x5   : > { %p98_p2 = scmp.eq.s32.totalorder %s6361_s11, 0  ;;  %p5201_p4 = scmp.ge.s32.totalorder %s6361_s11, 4 }
   0x6   : > { %s6444_s16 = scalar_select %p88_p0, %s6357_s10, %s90_s15  }
   0x7   : > { %p99_p3 = por %p98_p2, %p97_p1  ;;  %277 = sbr.rel (%p5201_p4) target bundleno = 274 (0x112), region = 40 }
   0xe   : > { %280 = sbr.rel (!%p99_p3) target bundleno = 274 (0x112), region = 44  ;;  %s282_s17 = sand.u32 (%p99_p3), 1, %s6357_s10  }
   0xf   : > { %s5666_s18 = sshll.u32 (%p99_p3), %s6361_s11, 3  ;;  %s5202_s19 = sshll.u32 (%p99_p3), %s282_s17, 11 }
  0x10   : > { %s6452_s22 = scalar_lea.vmem (%p99_p3), %s7742_s3, %s5666_s18  ;;  %s6457_s23 = scalar_lea.vmem (%p99_p3), [#allocation4], %s5202_s19 }
  0x11   : > { %v825_v0 = vld [vmem:[%s6452_s22] sm:$0xff] (%p99_p3) }
  0x12   : > { %v827_v1 = vld [vmem:[%s6452_s22 + $0x20] sm:$0xff] (%p99_p3)  ;;  %826 = vst [vmem:[%s6457_s23] sm:$0xff] (%p99_p3), %v825_v0 }
  0x13   : > { %v829_v2 = vld [vmem:[%s6452_s22 + $0x40] sm:$0xff] (%p99_p3)  ;;  %828 = vst [vmem:[%s6457_s23 + $0x8] sm:$0xff] (%p99_p3), %v827_v1 }
  0x14   : > { %830 = vst [vmem:[%s6457_s23 + $0x10] sm:$0xff] (%p99_p3), %v829_v2  ;;  %v831_v3 = vld [vmem:[%s6452_s22 + $0x60] sm:$0xff] (%p99_p3) }
  0x15   : > { %v833_v4 = vld [vmem:[%s6452_s22 + $0x80] sm:$0xff]  ;;  %832 = vst [vmem:[%s6457_s23 + $0x18] sm:$0xff] %v831_v3 }
  0x16   : > { %v835_v5 = vld [vmem:[%s6452_s22 + $0xa0] sm:$0xff]  ;;  %834 = vst [vmem:[%s6457_s23 + $0x20] sm:$0xff] %v833_v4 }
  0x17   : > { %836 = vst [vmem:[%s6457_s23 + $0x28] sm:$0xff] %v835_v5  ;;  %v837_v6 = vld [vmem:[%s6452_s22 + $0xc0] sm:$0xff] }
  0x18   : > { %v839_v7 = vld [vmem:[%s6452_s22 + $0xe0] sm:$0xff]  ;;  %838 = vst [vmem:[%s6457_s23 + $0x30] sm:$0xff] %v837_v6 }
  0x19   : > { %v841_v8 = vld [vmem:[%s6452_s22 + $0x100] sm:$0xff]  ;;  %840 = vst [vmem:[%s6457_s23 + $0x38] sm:$0xff] %v839_v7 }
  0x1a   : > { %842 = vst [vmem:[%s6457_s23 + $0x40] sm:$0xff] %v841_v8  ;;  %v843_v9 = vld [vmem:[%s6452_s22 + $0x120] sm:$0xff] }
  0x1b   : > { %v845_v10 = vld [vmem:[%s6452_s22 + $0x140] sm:$0xff]  ;;  %844 = vst [vmem:[%s6457_s23 + $0x48] sm:$0xff] %v843_v9 }
  0x1c   : > { %v847_v11 = vld [vmem:[%s6452_s22 + $0x160] sm:$0xff]  ;;  %846 = vst [vmem:[%s6457_s23 + $0x50] sm:$0xff] %v845_v10 }
  0x1d   : > { %848 = vst [vmem:[%s6457_s23 + $0x58] sm:$0xff] %v847_v11  ;;  %v849_v12 = vld [vmem:[%s6452_s22 + $0x180] sm:$0xff] }
  0x1e   : > { %v851_v13 = vld [vmem:[%s6452_s22 + $0x1a0] sm:$0xff]  ;;  %850 = vst [vmem:[%s6457_s23 + $0x60] sm:$0xff] %v849_v12 }
  0x1f   : > { %v853_v14 = vld [vmem:[%s6452_s22 + $0x1c0] sm:$0xff]  ;;  %852 = vst [vmem:[%s6457_s23 + $0x68] sm:$0xff] %v851_v13 }
  0x20   : > { %854 = vst [vmem:[%s6457_s23 + $0x70] sm:$0xff] %v853_v14  ;;  %v855_v15 = vld [vmem:[%s6452_s22 + $0x1e0] sm:$0xff] }
  0x21   : > { %v857_v16 = vld [vmem:[%s6452_s22 + $0x200] sm:$0xff]  ;;  %856 = vst [vmem:[%s6457_s23 + $0x78] sm:$0xff] %v855_v15 }
  0x22   : > { %v859_v17 = vld [vmem:[%s6452_s22 + $0x220] sm:$0xff]  ;;  %858 = vst [vmem:[%s6457_s23 + $0x80] sm:$0xff] %v857_v16 }
  0x23   : > { %860 = vst [vmem:[%s6457_s23 + $0x88] sm:$0xff] %v859_v17  ;;  %v861_v18 = vld [vmem:[%s6452_s22 + $0x240] sm:$0xff] }
  0x24   : > { %v863_v19 = vld [vmem:[%s6452_s22 + $0x260] sm:$0xff]  ;;  %862 = vst [vmem:[%s6457_s23 + $0x90] sm:$0xff] %v861_v18 }
  0x25   : > { %v865_v20 = vld [vmem:[%s6452_s22 + $0x280] sm:$0xff]  ;;  %864 = vst [vmem:[%s6457_s23 + $0x98] sm:$0xff] %v863_v19 }
  0x26   : > { %866 = vst [vmem:[%s6457_s23 + $0xa0] sm:$0xff] %v865_v20  ;;  %v867_v21 = vld [vmem:[%s6452_s22 + $0x2a0] sm:$0xff] }
  0x27   : > { %v869_v22 = vld [vmem:[%s6452_s22 + $0x2c0] sm:$0xff]  ;;  %868 = vst [vmem:[%s6457_s23 + $0xa8] sm:$0xff] %v867_v21 }
  0x28   : > { %v871_v23 = vld [vmem:[%s6452_s22 + $0x2e0] sm:$0xff]  ;;  %870 = vst [vmem:[%s6457_s23 + $0xb0] sm:$0xff] %v869_v22 }
  0x29   : > { %872 = vst [vmem:[%s6457_s23 + $0xb8] sm:$0xff] %v871_v23  ;;  %v873_v24 = vld [vmem:[%s6452_s22 + $0x300] sm:$0xff] }
  0x2a   : > { %v875_v25 = vld [vmem:[%s6452_s22 + $0x320] sm:$0xff]  ;;  %874 = vst [vmem:[%s6457_s23 + $0xc0] sm:$0xff] %v873_v24 }
  0x2b   : > { %v877_v26 = vld [vmem:[%s6452_s22 + $0x340] sm:$0xff]  ;;  %876 = vst [vmem:[%s6457_s23 + $0xc8] sm:$0xff] %v875_v25 }
  0x2c   : > { %878 = vst [vmem:[%s6457_s23 + $0xd0] sm:$0xff] %v877_v26  ;;  %v879_v27 = vld [vmem:[%s6452_s22 + $0x360] sm:$0xff] }
  0x2d   : > { %v881_v28 = vld [vmem:[%s6452_s22 + $0x380] sm:$0xff]  ;;  %880 = vst [vmem:[%s6457_s23 + $0xd8] sm:$0xff] %v879_v27 }
  0x2e   : > { %v883_v29 = vld [vmem:[%s6452_s22 + $0x3a0] sm:$0xff]  ;;  %882 = vst [vmem:[%s6457_s23 + $0xe0] sm:$0xff] %v881_v28 }
  0x2f   : > { %884 = vst [vmem:[%s6457_s23 + $0xe8] sm:$0xff] %v883_v29  ;;  %v885_v30 = vld [vmem:[%s6452_s22 + $0x3c0] sm:$0xff] }
  0x30   : > { %v887_v31 = vld [vmem:[%s6452_s22 + $0x3e0] sm:$0xff]  ;;  %886 = vst [vmem:[%s6457_s23 + $0xf0] sm:$0xff] %v885_v30 }
  0x31   : > { %v889_v32 = vld [vmem:[%s6452_s22 + $0x400] sm:$0xff]  ;;  %888 = vst [vmem:[%s6457_s23 + $0xf8] sm:$0xff] %v887_v31 }
  0x32   : > { %890 = vst [vmem:[%s6457_s23 + $0x100] sm:$0xff] %v889_v32  ;;  %v891_v33 = vld [vmem:[%s6452_s22 + $0x420] sm:$0xff] }
  0x33   : > { %v893_v34 = vld [vmem:[%s6452_s22 + $0x440] sm:$0xff]  ;;  %892 = vst [vmem:[%s6457_s23 + $0x108] sm:$0xff] %v891_v33 }
  0x34   : > { %v895_v35 = vld [vmem:[%s6452_s22 + $0x460] sm:$0xff]  ;;  %894 = vst [vmem:[%s6457_s23 + $0x110] sm:$0xff] %v893_v34 }
  0x35   : > { %896 = vst [vmem:[%s6457_s23 + $0x118] sm:$0xff] %v895_v35  ;;  %v897_v36 = vld [vmem:[%s6452_s22 + $0x480] sm:$0xff] }
  0x36   : > { %v899_v37 = vld [vmem:[%s6452_s22 + $0x4a0] sm:$0xff]  ;;  %898 = vst [vmem:[%s6457_s23 + $0x120] sm:$0xff] %v897_v36 }
  0x37   : > { %v901_v38 = vld [vmem:[%s6452_s22 + $0x4c0] sm:$0xff]  ;;  %900 = vst [vmem:[%s6457_s23 + $0x128] sm:$0xff] %v899_v37 }
  0x38   : > { %902 = vst [vmem:[%s6457_s23 + $0x130] sm:$0xff] %v901_v38  ;;  %v903_v39 = vld [vmem:[%s6452_s22 + $0x4e0] sm:$0xff] }
  0x39   : > { %v905_v40 = vld [vmem:[%s6452_s22 + $0x500] sm:$0xff]  ;;  %904 = vst [vmem:[%s6457_s23 + $0x138] sm:$0xff] %v903_v39 }
  0x3a   : > { %v907_v41 = vld [vmem:[%s6452_s22 + $0x520] sm:$0xff]  ;;  %906 = vst [vmem:[%s6457_s23 + $0x140] sm:$0xff] %v905_v40 }
  0x3b   : > { %908 = vst [vmem:[%s6457_s23 + $0x148] sm:$0xff] %v907_v41  ;;  %v909_v42 = vld [vmem:[%s6452_s22 + $0x540] sm:$0xff] }
  0x3c   : > { %v911_v43 = vld [vmem:[%s6452_s22 + $0x560] sm:$0xff]  ;;  %910 = vst [vmem:[%s6457_s23 + $0x150] sm:$0xff] %v909_v42 }
  0x3d   : > { %v913_v44 = vld [vmem:[%s6452_s22 + $0x580] sm:$0xff]  ;;  %912 = vst [vmem:[%s6457_s23 + $0x158] sm:$0xff] %v911_v43 }
  0x3e   : > { %914 = vst [vmem:[%s6457_s23 + $0x160] sm:$0xff] %v913_v44  ;;  %v915_v45 = vld [vmem:[%s6452_s22 + $0x5a0] sm:$0xff] }
  0x3f   : > { %v917_v46 = vld [vmem:[%s6452_s22 + $0x5c0] sm:$0xff]  ;;  %916 = vst [vmem:[%s6457_s23 + $0x168] sm:$0xff] %v915_v45 }
  0x40   : > { %v919_v47 = vld [vmem:[%s6452_s22 + $0x5e0] sm:$0xff]  ;;  %918 = vst [vmem:[%s6457_s23 + $0x170] sm:$0xff] %v917_v46 }
  0x41   : > { %920 = vst [vmem:[%s6457_s23 + $0x178] sm:$0xff] %v919_v47  ;;  %v921_v48 = vld [vmem:[%s6452_s22 + $0x600] sm:$0xff] }
  0x42   : > { %v923_v49 = vld [vmem:[%s6452_s22 + $0x620] sm:$0xff]  ;;  %922 = vst [vmem:[%s6457_s23 + $0x180] sm:$0xff] %v921_v48 }
  0x43   : > { %v925_v50 = vld [vmem:[%s6452_s22 + $0x640] sm:$0xff]  ;;  %924 = vst [vmem:[%s6457_s23 + $0x188] sm:$0xff] %v923_v49 }
  0x44   : > { %926 = vst [vmem:[%s6457_s23 + $0x190] sm:$0xff] %v925_v50  ;;  %v927_v51 = vld [vmem:[%s6452_s22 + $0x660] sm:$0xff] }
  0x45   : > { %v929_v52 = vld [vmem:[%s6452_s22 + $0x680] sm:$0xff]  ;;  %928 = vst [vmem:[%s6457_s23 + $0x198] sm:$0xff] %v927_v51 }
  0x46   : > { %v931_v53 = vld [vmem:[%s6452_s22 + $0x6a0] sm:$0xff]  ;;  %930 = vst [vmem:[%s6457_s23 + $0x1a0] sm:$0xff] %v929_v52 }
  0x47   : > { %932 = vst [vmem:[%s6457_s23 + $0x1a8] sm:$0xff] %v931_v53  ;;  %v933_v54 = vld [vmem:[%s6452_s22 + $0x6c0] sm:$0xff] }
  0x48   : > { %v935_v55 = vld [vmem:[%s6452_s22 + $0x6e0] sm:$0xff]  ;;  %934 = vst [vmem:[%s6457_s23 + $0x1b0] sm:$0xff] %v933_v54 }
  0x49   : > { %v937_v56 = vld [vmem:[%s6452_s22 + $0x700] sm:$0xff]  ;;  %936 = vst [vmem:[%s6457_s23 + $0x1b8] sm:$0xff] %v935_v55 }
  0x4a   : > { %938 = vst [vmem:[%s6457_s23 + $0x1c0] sm:$0xff] %v937_v56  ;;  %v939_v57 = vld [vmem:[%s6452_s22 + $0x720] sm:$0xff] }
  0x4b   : > { %v941_v58 = vld [vmem:[%s6452_s22 + $0x740] sm:$0xff]  ;;  %940 = vst [vmem:[%s6457_s23 + $0x1c8] sm:$0xff] %v939_v57 }
  0x4c   : > { %v943_v59 = vld [vmem:[%s6452_s22 + $0x760] sm:$0xff]  ;;  %942 = vst [vmem:[%s6457_s23 + $0x1d0] sm:$0xff] %v941_v58 }
  0x4d   : > { %944 = vst [vmem:[%s6457_s23 + $0x1d8] sm:$0xff] %v943_v59  ;;  %v945_v60 = vld [vmem:[%s6452_s22 + $0x780] sm:$0xff] }
  0x4e   : > { %v947_v61 = vld [vmem:[%s6452_s22 + $0x7a0] sm:$0xff]  ;;  %946 = vst [vmem:[%s6457_s23 + $0x1e0] sm:$0xff] %v945_v60 }
  0x4f   : > { %v949_v62 = vld [vmem:[%s6452_s22 + $0x7c0] sm:$0xff]  ;;  %948 = vst [vmem:[%s6457_s23 + $0x1e8] sm:$0xff] %v947_v61 }
  0x50   : > { %950 = vst [vmem:[%s6457_s23 + $0x1f0] sm:$0xff] %v949_v62  ;;  %v951_v63 = vld [vmem:[%s6452_s22 + $0x7e0] sm:$0xff] }
  0x51   : > { %v953_v0 = vld [vmem:[%s6452_s22 + $0x800] sm:$0xff]  ;;  %952 = vst [vmem:[%s6457_s23 + $0x1f8] sm:$0xff] %v951_v63 }
  0x52   : > { %v955_v1 = vld [vmem:[%s6452_s22 + $0x820] sm:$0xff]  ;;  %954 = vst [vmem:[%s6457_s23 + $0x200] sm:$0xff] %v953_v0 }
  0x53   : > { %956 = vst [vmem:[%s6457_s23 + $0x208] sm:$0xff] %v955_v1  ;;  %v957_v2 = vld [vmem:[%s6452_s22 + $0x840] sm:$0xff] }
  0x54   : > { %v959_v3 = vld [vmem:[%s6452_s22 + $0x860] sm:$0xff]  ;;  %958 = vst [vmem:[%s6457_s23 + $0x210] sm:$0xff] %v957_v2 }
  0x55   : > { %v961_v4 = vld [vmem:[%s6452_s22 + $0x880] sm:$0xff]  ;;  %960 = vst [vmem:[%s6457_s23 + $0x218] sm:$0xff] %v959_v3 }
  0x56   : > { %962 = vst [vmem:[%s6457_s23 + $0x220] sm:$0xff] %v961_v4  ;;  %v963_v5 = vld [vmem:[%s6452_s22 + $0x8a0] sm:$0xff] }
  0x57   : > { %v965_v6 = vld [vmem:[%s6452_s22 + $0x8c0] sm:$0xff]  ;;  %964 = vst [vmem:[%s6457_s23 + $0x228] sm:$0xff] %v963_v5 }
  0x58   : > { %v967_v7 = vld [vmem:[%s6452_s22 + $0x8e0] sm:$0xff]  ;;  %966 = vst [vmem:[%s6457_s23 + $0x230] sm:$0xff] %v965_v6 }
  0x59   : > { %968 = vst [vmem:[%s6457_s23 + $0x238] sm:$0xff] %v967_v7  ;;  %v969_v8 = vld [vmem:[%s6452_s22 + $0x900] sm:$0xff] }
  0x5a   : > { %v971_v9 = vld [vmem:[%s6452_s22 + $0x920] sm:$0xff]  ;;  %970 = vst [vmem:[%s6457_s23 + $0x240] sm:$0xff] %v969_v8 }
  0x5b   : > { %v973_v10 = vld [vmem:[%s6452_s22 + $0x940] sm:$0xff]  ;;  %972 = vst [vmem:[%s6457_s23 + $0x248] sm:$0xff] %v971_v9 }
  0x5c   : > { %974 = vst [vmem:[%s6457_s23 + $0x250] sm:$0xff] %v973_v10  ;;  %v975_v11 = vld [vmem:[%s6452_s22 + $0x960] sm:$0xff] }
  0x5d   : > { %v977_v12 = vld [vmem:[%s6452_s22 + $0x980] sm:$0xff]  ;;  %976 = vst [vmem:[%s6457_s23 + $0x258] sm:$0xff] %v975_v11 }
  0x5e   : > { %v979_v13 = vld [vmem:[%s6452_s22 + $0x9a0] sm:$0xff]  ;;  %978 = vst [vmem:[%s6457_s23 + $0x260] sm:$0xff] %v977_v12 }
  0x5f   : > { %980 = vst [vmem:[%s6457_s23 + $0x268] sm:$0xff] %v979_v13  ;;  %v981_v14 = vld [vmem:[%s6452_s22 + $0x9c0] sm:$0xff] }
  0x60   : > { %v983_v15 = vld [vmem:[%s6452_s22 + $0x9e0] sm:$0xff]  ;;  %982 = vst [vmem:[%s6457_s23 + $0x270] sm:$0xff] %v981_v14 }
  0x61   : > { %v985_v16 = vld [vmem:[%s6452_s22 + $0xa00] sm:$0xff]  ;;  %984 = vst [vmem:[%s6457_s23 + $0x278] sm:$0xff] %v983_v15 }
  0x62   : > { %986 = vst [vmem:[%s6457_s23 + $0x280] sm:$0xff] %v985_v16  ;;  %v987_v17 = vld [vmem:[%s6452_s22 + $0xa20] sm:$0xff] }
  0x63   : > { %v989_v18 = vld [vmem:[%s6452_s22 + $0xa40] sm:$0xff]  ;;  %988 = vst [vmem:[%s6457_s23 + $0x288] sm:$0xff] %v987_v17 }
  0x64   : > { %v991_v19 = vld [vmem:[%s6452_s22 + $0xa60] sm:$0xff]  ;;  %990 = vst [vmem:[%s6457_s23 + $0x290] sm:$0xff] %v989_v18 }
  0x65   : > { %992 = vst [vmem:[%s6457_s23 + $0x298] sm:$0xff] %v991_v19  ;;  %v993_v20 = vld [vmem:[%s6452_s22 + $0xa80] sm:$0xff] }
  0x66   : > { %v995_v21 = vld [vmem:[%s6452_s22 + $0xaa0] sm:$0xff]  ;;  %994 = vst [vmem:[%s6457_s23 + $0x2a0] sm:$0xff] %v993_v20 }
  0x67   : > { %v997_v22 = vld [vmem:[%s6452_s22 + $0xac0] sm:$0xff]  ;;  %996 = vst [vmem:[%s6457_s23 + $0x2a8] sm:$0xff] %v995_v21 }
  0x68   : > { %998 = vst [vmem:[%s6457_s23 + $0x2b0] sm:$0xff] %v997_v22  ;;  %v999_v23 = vld [vmem:[%s6452_s22 + $0xae0] sm:$0xff] }
  0x69   : > { %v1001_v24 = vld [vmem:[%s6452_s22 + $0xb00] sm:$0xff]  ;;  %1000 = vst [vmem:[%s6457_s23 + $0x2b8] sm:$0xff] %v999_v23 }
  0x6a   : > { %v1003_v25 = vld [vmem:[%s6452_s22 + $0xb20] sm:$0xff]  ;;  %1002 = vst [vmem:[%s6457_s23 + $0x2c0] sm:$0xff] %v1001_v24 }
  0x6b   : > { %1004 = vst [vmem:[%s6457_s23 + $0x2c8] sm:$0xff] %v1003_v25  ;;  %v1005_v26 = vld [vmem:[%s6452_s22 + $0xb40] sm:$0xff] }
  0x6c   : > { %v1007_v27 = vld [vmem:[%s6452_s22 + $0xb60] sm:$0xff]  ;;  %1006 = vst [vmem:[%s6457_s23 + $0x2d0] sm:$0xff] %v1005_v26 }
  0x6d   : > { %v1009_v28 = vld [vmem:[%s6452_s22 + $0xb80] sm:$0xff]  ;;  %1008 = vst [vmem:[%s6457_s23 + $0x2d8] sm:$0xff] %v1007_v27 }
  0x6e   : > { %1010 = vst [vmem:[%s6457_s23 + $0x2e0] sm:$0xff] %v1009_v28  ;;  %v1011_v29 = vld [vmem:[%s6452_s22 + $0xba0] sm:$0xff] }
  0x6f   : > { %v1013_v30 = vld [vmem:[%s6452_s22 + $0xbc0] sm:$0xff]  ;;  %1012 = vst [vmem:[%s6457_s23 + $0x2e8] sm:$0xff] %v1011_v29 }
  0x70   : > { %v1015_v31 = vld [vmem:[%s6452_s22 + $0xbe0] sm:$0xff]  ;;  %1014 = vst [vmem:[%s6457_s23 + $0x2f0] sm:$0xff] %v1013_v30 }
  0x71   : > { %1016 = vst [vmem:[%s6457_s23 + $0x2f8] sm:$0xff] %v1015_v31  ;;  %v1017_v32 = vld [vmem:[%s6452_s22 + $0xc00] sm:$0xff] }
  0x72   : > { %v1019_v33 = vld [vmem:[%s6452_s22 + $0xc20] sm:$0xff]  ;;  %1018 = vst [vmem:[%s6457_s23 + $0x300] sm:$0xff] %v1017_v32 }
  0x73   : > { %v1021_v34 = vld [vmem:[%s6452_s22 + $0xc40] sm:$0xff]  ;;  %1020 = vst [vmem:[%s6457_s23 + $0x308] sm:$0xff] %v1019_v33 }
  0x74   : > { %1022 = vst [vmem:[%s6457_s23 + $0x310] sm:$0xff] %v1021_v34  ;;  %v1023_v35 = vld [vmem:[%s6452_s22 + $0xc60] sm:$0xff] }
  0x75   : > { %v1025_v36 = vld [vmem:[%s6452_s22 + $0xc80] sm:$0xff]  ;;  %1024 = vst [vmem:[%s6457_s23 + $0x318] sm:$0xff] %v1023_v35 }
  0x76   : > { %v1027_v37 = vld [vmem:[%s6452_s22 + $0xca0] sm:$0xff]  ;;  %1026 = vst [vmem:[%s6457_s23 + $0x320] sm:$0xff] %v1025_v36 }
  0x77   : > { %1028 = vst [vmem:[%s6457_s23 + $0x328] sm:$0xff] %v1027_v37  ;;  %v1029_v38 = vld [vmem:[%s6452_s22 + $0xcc0] sm:$0xff] }
  0x78   : > { %v1031_v39 = vld [vmem:[%s6452_s22 + $0xce0] sm:$0xff]  ;;  %1030 = vst [vmem:[%s6457_s23 + $0x330] sm:$0xff] %v1029_v38 }
  0x79   : > { %v1033_v40 = vld [vmem:[%s6452_s22 + $0xd00] sm:$0xff]  ;;  %1032 = vst [vmem:[%s6457_s23 + $0x338] sm:$0xff] %v1031_v39 }
  0x7a   : > { %1034 = vst [vmem:[%s6457_s23 + $0x340] sm:$0xff] %v1033_v40  ;;  %v1035_v41 = vld [vmem:[%s6452_s22 + $0xd20] sm:$0xff] }
  0x7b   : > { %v1037_v42 = vld [vmem:[%s6452_s22 + $0xd40] sm:$0xff]  ;;  %1036 = vst [vmem:[%s6457_s23 + $0x348] sm:$0xff] %v1035_v41 }
  0x7c   : > { %v1039_v43 = vld [vmem:[%s6452_s22 + $0xd60] sm:$0xff]  ;;  %1038 = vst [vmem:[%s6457_s23 + $0x350] sm:$0xff] %v1037_v42 }
  0x7d   : > { %1040 = vst [vmem:[%s6457_s23 + $0x358] sm:$0xff] %v1039_v43  ;;  %v1041_v44 = vld [vmem:[%s6452_s22 + $0xd80] sm:$0xff] }
  0x7e   : > { %v1043_v45 = vld [vmem:[%s6452_s22 + $0xda0] sm:$0xff]  ;;  %1042 = vst [vmem:[%s6457_s23 + $0x360] sm:$0xff] %v1041_v44 }
  0x7f   : > { %v1045_v46 = vld [vmem:[%s6452_s22 + $0xdc0] sm:$0xff]  ;;  %1044 = vst [vmem:[%s6457_s23 + $0x368] sm:$0xff] %v1043_v45 }
  0x80   : > { %1046 = vst [vmem:[%s6457_s23 + $0x370] sm:$0xff] %v1045_v46  ;;  %v1047_v47 = vld [vmem:[%s6452_s22 + $0xde0] sm:$0xff] }
  0x81   : > { %v1049_v48 = vld [vmem:[%s6452_s22 + $0xe00] sm:$0xff]  ;;  %1048 = vst [vmem:[%s6457_s23 + $0x378] sm:$0xff] %v1047_v47 }
  0x82   : > { %v1051_v49 = vld [vmem:[%s6452_s22 + $0xe20] sm:$0xff]  ;;  %1050 = vst [vmem:[%s6457_s23 + $0x380] sm:$0xff] %v1049_v48 }
  0x83   : > { %1052 = vst [vmem:[%s6457_s23 + $0x388] sm:$0xff] %v1051_v49  ;;  %v1053_v50 = vld [vmem:[%s6452_s22 + $0xe40] sm:$0xff] }
  0x84   : > { %v1055_v51 = vld [vmem:[%s6452_s22 + $0xe60] sm:$0xff]  ;;  %1054 = vst [vmem:[%s6457_s23 + $0x390] sm:$0xff] %v1053_v50 }
  0x85   : > { %v1057_v52 = vld [vmem:[%s6452_s22 + $0xe80] sm:$0xff]  ;;  %1056 = vst [vmem:[%s6457_s23 + $0x398] sm:$0xff] %v1055_v51 }
  0x86   : > { %1058 = vst [vmem:[%s6457_s23 + $0x3a0] sm:$0xff] %v1057_v52  ;;  %v1059_v53 = vld [vmem:[%s6452_s22 + $0xea0] sm:$0xff] }
  0x87   : > { %v1061_v54 = vld [vmem:[%s6452_s22 + $0xec0] sm:$0xff]  ;;  %1060 = vst [vmem:[%s6457_s23 + $0x3a8] sm:$0xff] %v1059_v53 }
  0x88   : > { %v1063_v55 = vld [vmem:[%s6452_s22 + $0xee0] sm:$0xff]  ;;  %1062 = vst [vmem:[%s6457_s23 + $0x3b0] sm:$0xff] %v1061_v54 }
  0x89   : > { %1064 = vst [vmem:[%s6457_s23 + $0x3b8] sm:$0xff] %v1063_v55  ;;  %v1065_v56 = vld [vmem:[%s6452_s22 + $0xf00] sm:$0xff] }
  0x8a   : > { %v1067_v57 = vld [vmem:[%s6452_s22 + $0xf20] sm:$0xff]  ;;  %1066 = vst [vmem:[%s6457_s23 + $0x3c0] sm:$0xff] %v1065_v56 }
  0x8b   : > { %v1069_v58 = vld [vmem:[%s6452_s22 + $0xf40] sm:$0xff]  ;;  %1068 = vst [vmem:[%s6457_s23 + $0x3c8] sm:$0xff] %v1067_v57 }
  0x8c   : > { %1070 = vst [vmem:[%s6457_s23 + $0x3d0] sm:$0xff] %v1069_v58  ;;  %v1071_v59 = vld [vmem:[%s6452_s22 + $0xf60] sm:$0xff] }
  0x8d   : > { %v1073_v60 = vld [vmem:[%s6452_s22 + $0xf80] sm:$0xff]  ;;  %1072 = vst [vmem:[%s6457_s23 + $0x3d8] sm:$0xff] %v1071_v59 }
  0x8e   : > { %v1075_v61 = vld [vmem:[%s6452_s22 + $0xfa0] sm:$0xff]  ;;  %1074 = vst [vmem:[%s6457_s23 + $0x3e0] sm:$0xff] %v1073_v60 }
  0x8f   : > { %1076 = vst [vmem:[%s6457_s23 + $0x3e8] sm:$0xff] %v1075_v61  ;;  %v1077_v62 = vld [vmem:[%s6452_s22 + $0xfc0] sm:$0xff] }
  0x90   : > { %v1079_v63 = vld [vmem:[%s6452_s22 + $0xfe0] sm:$0xff]  ;;  %1078 = vst [vmem:[%s6457_s23 + $0x3f0] sm:$0xff] %v1077_v62 }
  0x91   : > { %v1081_v0 = vld [vmem:[%s6452_s22 + $0x1000] sm:$0xff]  ;;  %1080 = vst [vmem:[%s6457_s23 + $0x3f8] sm:$0xff] %v1079_v63 }
  0x92   : > { %1082 = vst [vmem:[%s6457_s23 + $0x400] sm:$0xff] %v1081_v0  ;;  %v1083_v1 = vld [vmem:[%s6452_s22 + $0x1020] sm:$0xff] }
  0x93   : > { %v1085_v2 = vld [vmem:[%s6452_s22 + $0x1040] sm:$0xff]  ;;  %1084 = vst [vmem:[%s6457_s23 + $0x408] sm:$0xff] %v1083_v1 }
  0x94   : > { %v1087_v3 = vld [vmem:[%s6452_s22 + $0x1060] sm:$0xff]  ;;  %1086 = vst [vmem:[%s6457_s23 + $0x410] sm:$0xff] %v1085_v2 }
  0x95   : > { %1088 = vst [vmem:[%s6457_s23 + $0x418] sm:$0xff] %v1087_v3  ;;  %v1089_v4 = vld [vmem:[%s6452_s22 + $0x1080] sm:$0xff] }
  0x96   : > { %v1091_v5 = vld [vmem:[%s6452_s22 + $0x10a0] sm:$0xff]  ;;  %1090 = vst [vmem:[%s6457_s23 + $0x420] sm:$0xff] %v1089_v4 }
  0x97   : > { %v1093_v6 = vld [vmem:[%s6452_s22 + $0x10c0] sm:$0xff]  ;;  %1092 = vst [vmem:[%s6457_s23 + $0x428] sm:$0xff] %v1091_v5 }
  0x98   : > { %1094 = vst [vmem:[%s6457_s23 + $0x430] sm:$0xff] %v1093_v6  ;;  %v1095_v7 = vld [vmem:[%s6452_s22 + $0x10e0] sm:$0xff] }
  0x99   : > { %v1097_v8 = vld [vmem:[%s6452_s22 + $0x1100] sm:$0xff]  ;;  %1096 = vst [vmem:[%s6457_s23 + $0x438] sm:$0xff] %v1095_v7 }
  0x9a   : > { %v1099_v9 = vld [vmem:[%s6452_s22 + $0x1120] sm:$0xff]  ;;  %1098 = vst [vmem:[%s6457_s23 + $0x440] sm:$0xff] %v1097_v8 }
  0x9b   : > { %1100 = vst [vmem:[%s6457_s23 + $0x448] sm:$0xff] %v1099_v9  ;;  %v1101_v10 = vld [vmem:[%s6452_s22 + $0x1140] sm:$0xff] }
  0x9c   : > { %v1103_v11 = vld [vmem:[%s6452_s22 + $0x1160] sm:$0xff]  ;;  %1102 = vst [vmem:[%s6457_s23 + $0x450] sm:$0xff] %v1101_v10 }
  0x9d   : > { %v1105_v12 = vld [vmem:[%s6452_s22 + $0x1180] sm:$0xff]  ;;  %1104 = vst [vmem:[%s6457_s23 + $0x458] sm:$0xff] %v1103_v11 }
  0x9e   : > { %1106 = vst [vmem:[%s6457_s23 + $0x460] sm:$0xff] %v1105_v12  ;;  %v1107_v13 = vld [vmem:[%s6452_s22 + $0x11a0] sm:$0xff] }
  0x9f   : > { %v1109_v14 = vld [vmem:[%s6452_s22 + $0x11c0] sm:$0xff]  ;;  %1108 = vst [vmem:[%s6457_s23 + $0x468] sm:$0xff] %v1107_v13 }
  0xa0   : > { %v1111_v15 = vld [vmem:[%s6452_s22 + $0x11e0] sm:$0xff]  ;;  %1110 = vst [vmem:[%s6457_s23 + $0x470] sm:$0xff] %v1109_v14 }
  0xa1   : > { %1112 = vst [vmem:[%s6457_s23 + $0x478] sm:$0xff] %v1111_v15  ;;  %v1113_v16 = vld [vmem:[%s6452_s22 + $0x1200] sm:$0xff] }
  0xa2   : > { %v1115_v17 = vld [vmem:[%s6452_s22 + $0x1220] sm:$0xff]  ;;  %1114 = vst [vmem:[%s6457_s23 + $0x480] sm:$0xff] %v1113_v16 }
  0xa3   : > { %v1117_v18 = vld [vmem:[%s6452_s22 + $0x1240] sm:$0xff]  ;;  %1116 = vst [vmem:[%s6457_s23 + $0x488] sm:$0xff] %v1115_v17 }
  0xa4   : > { %1118 = vst [vmem:[%s6457_s23 + $0x490] sm:$0xff] %v1117_v18  ;;  %v1119_v19 = vld [vmem:[%s6452_s22 + $0x1260] sm:$0xff] }
  0xa5   : > { %v1121_v20 = vld [vmem:[%s6452_s22 + $0x1280] sm:$0xff]  ;;  %1120 = vst [vmem:[%s6457_s23 + $0x498] sm:$0xff] %v1119_v19 }
  0xa6   : > { %v1123_v21 = vld [vmem:[%s6452_s22 + $0x12a0] sm:$0xff]  ;;  %1122 = vst [vmem:[%s6457_s23 + $0x4a0] sm:$0xff] %v1121_v20 }
  0xa7   : > { %1124 = vst [vmem:[%s6457_s23 + $0x4a8] sm:$0xff] %v1123_v21  ;;  %v1125_v22 = vld [vmem:[%s6452_s22 + $0x12c0] sm:$0xff] }
  0xa8   : > { %v1127_v23 = vld [vmem:[%s6452_s22 + $0x12e0] sm:$0xff]  ;;  %1126 = vst [vmem:[%s6457_s23 + $0x4b0] sm:$0xff] %v1125_v22 }
  0xa9   : > { %v1129_v24 = vld [vmem:[%s6452_s22 + $0x1300] sm:$0xff]  ;;  %1128 = vst [vmem:[%s6457_s23 + $0x4b8] sm:$0xff] %v1127_v23 }
  0xaa   : > { %1130 = vst [vmem:[%s6457_s23 + $0x4c0] sm:$0xff] %v1129_v24  ;;  %v1131_v25 = vld [vmem:[%s6452_s22 + $0x1320] sm:$0xff] }
  0xab   : > { %v1133_v26 = vld [vmem:[%s6452_s22 + $0x1340] sm:$0xff]  ;;  %1132 = vst [vmem:[%s6457_s23 + $0x4c8] sm:$0xff] %v1131_v25 }
  0xac   : > { %v1135_v27 = vld [vmem:[%s6452_s22 + $0x1360] sm:$0xff]  ;;  %1134 = vst [vmem:[%s6457_s23 + $0x4d0] sm:$0xff] %v1133_v26 }
  0xad   : > { %1136 = vst [vmem:[%s6457_s23 + $0x4d8] sm:$0xff] %v1135_v27  ;;  %v1137_v28 = vld [vmem:[%s6452_s22 + $0x1380] sm:$0xff] }
  0xae   : > { %v1139_v29 = vld [vmem:[%s6452_s22 + $0x13a0] sm:$0xff]  ;;  %1138 = vst [vmem:[%s6457_s23 + $0x4e0] sm:$0xff] %v1137_v28 }
  0xaf   : > { %v1141_v30 = vld [vmem:[%s6452_s22 + $0x13c0] sm:$0xff]  ;;  %1140 = vst [vmem:[%s6457_s23 + $0x4e8] sm:$0xff] %v1139_v29 }
  0xb0   : > { %1142 = vst [vmem:[%s6457_s23 + $0x4f0] sm:$0xff] %v1141_v30  ;;  %v1143_v31 = vld [vmem:[%s6452_s22 + $0x13e0] sm:$0xff] }
  0xb1   : > { %v1145_v32 = vld [vmem:[%s6452_s22 + $0x1400] sm:$0xff]  ;;  %1144 = vst [vmem:[%s6457_s23 + $0x4f8] sm:$0xff] %v1143_v31 }
  0xb2   : > { %v1147_v33 = vld [vmem:[%s6452_s22 + $0x1420] sm:$0xff]  ;;  %1146 = vst [vmem:[%s6457_s23 + $0x500] sm:$0xff] %v1145_v32 }
  0xb3   : > { %1148 = vst [vmem:[%s6457_s23 + $0x508] sm:$0xff] %v1147_v33  ;;  %v1149_v34 = vld [vmem:[%s6452_s22 + $0x1440] sm:$0xff] }
  0xb4   : > { %v1151_v35 = vld [vmem:[%s6452_s22 + $0x1460] sm:$0xff]  ;;  %1150 = vst [vmem:[%s6457_s23 + $0x510] sm:$0xff] %v1149_v34 }
  0xb5   : > { %v1153_v36 = vld [vmem:[%s6452_s22 + $0x1480] sm:$0xff]  ;;  %1152 = vst [vmem:[%s6457_s23 + $0x518] sm:$0xff] %v1151_v35 }
  0xb6   : > { %1154 = vst [vmem:[%s6457_s23 + $0x520] sm:$0xff] %v1153_v36  ;;  %v1155_v37 = vld [vmem:[%s6452_s22 + $0x14a0] sm:$0xff] }
  0xb7   : > { %v1157_v38 = vld [vmem:[%s6452_s22 + $0x14c0] sm:$0xff]  ;;  %1156 = vst [vmem:[%s6457_s23 + $0x528] sm:$0xff] %v1155_v37 }
  0xb8   : > { %v1159_v39 = vld [vmem:[%s6452_s22 + $0x14e0] sm:$0xff]  ;;  %1158 = vst [vmem:[%s6457_s23 + $0x530] sm:$0xff] %v1157_v38 }
  0xb9   : > { %1160 = vst [vmem:[%s6457_s23 + $0x538] sm:$0xff] %v1159_v39  ;;  %v1161_v40 = vld [vmem:[%s6452_s22 + $0x1500] sm:$0xff] }
  0xba   : > { %v1163_v41 = vld [vmem:[%s6452_s22 + $0x1520] sm:$0xff]  ;;  %1162 = vst [vmem:[%s6457_s23 + $0x540] sm:$0xff] %v1161_v40 }
  0xbb   : > { %v1165_v42 = vld [vmem:[%s6452_s22 + $0x1540] sm:$0xff]  ;;  %1164 = vst [vmem:[%s6457_s23 + $0x548] sm:$0xff] %v1163_v41 }
  0xbc   : > { %1166 = vst [vmem:[%s6457_s23 + $0x550] sm:$0xff] %v1165_v42  ;;  %v1167_v43 = vld [vmem:[%s6452_s22 + $0x1560] sm:$0xff] }
  0xbd   : > { %v1169_v44 = vld [vmem:[%s6452_s22 + $0x1580] sm:$0xff]  ;;  %1168 = vst [vmem:[%s6457_s23 + $0x558] sm:$0xff] %v1167_v43 }
  0xbe   : > { %v1171_v45 = vld [vmem:[%s6452_s22 + $0x15a0] sm:$0xff]  ;;  %1170 = vst [vmem:[%s6457_s23 + $0x560] sm:$0xff] %v1169_v44 }
  0xbf   : > { %1172 = vst [vmem:[%s6457_s23 + $0x568] sm:$0xff] %v1171_v45  ;;  %v1173_v46 = vld [vmem:[%s6452_s22 + $0x15c0] sm:$0xff] }
  0xc0   : > { %v1175_v47 = vld [vmem:[%s6452_s22 + $0x15e0] sm:$0xff]  ;;  %1174 = vst [vmem:[%s6457_s23 + $0x570] sm:$0xff] %v1173_v46 }
  0xc1   : > { %v1177_v48 = vld [vmem:[%s6452_s22 + $0x1600] sm:$0xff]  ;;  %1176 = vst [vmem:[%s6457_s23 + $0x578] sm:$0xff] %v1175_v47 }
  0xc2   : > { %1178 = vst [vmem:[%s6457_s23 + $0x580] sm:$0xff] %v1177_v48  ;;  %v1179_v49 = vld [vmem:[%s6452_s22 + $0x1620] sm:$0xff] }
  0xc3   : > { %v1181_v50 = vld [vmem:[%s6452_s22 + $0x1640] sm:$0xff]  ;;  %1180 = vst [vmem:[%s6457_s23 + $0x588] sm:$0xff] %v1179_v49 }
  0xc4   : > { %v1183_v51 = vld [vmem:[%s6452_s22 + $0x1660] sm:$0xff]  ;;  %1182 = vst [vmem:[%s6457_s23 + $0x590] sm:$0xff] %v1181_v50 }
  0xc5   : > { %1184 = vst [vmem:[%s6457_s23 + $0x598] sm:$0xff] %v1183_v51  ;;  %v1185_v52 = vld [vmem:[%s6452_s22 + $0x1680] sm:$0xff] }
  0xc6   : > { %v1187_v53 = vld [vmem:[%s6452_s22 + $0x16a0] sm:$0xff]  ;;  %1186 = vst [vmem:[%s6457_s23 + $0x5a0] sm:$0xff] %v1185_v52 }
  0xc7   : > { %v1189_v54 = vld [vmem:[%s6452_s22 + $0x16c0] sm:$0xff]  ;;  %1188 = vst [vmem:[%s6457_s23 + $0x5a8] sm:$0xff] %v1187_v53 }
  0xc8   : > { %1190 = vst [vmem:[%s6457_s23 + $0x5b0] sm:$0xff] %v1189_v54  ;;  %v1191_v55 = vld [vmem:[%s6452_s22 + $0x16e0] sm:$0xff] }
  0xc9   : > { %v1193_v56 = vld [vmem:[%s6452_s22 + $0x1700] sm:$0xff]  ;;  %1192 = vst [vmem:[%s6457_s23 + $0x5b8] sm:$0xff] %v1191_v55 }
  0xca   : > { %v1195_v57 = vld [vmem:[%s6452_s22 + $0x1720] sm:$0xff]  ;;  %1194 = vst [vmem:[%s6457_s23 + $0x5c0] sm:$0xff] %v1193_v56 }
  0xcb   : > { %1196 = vst [vmem:[%s6457_s23 + $0x5c8] sm:$0xff] %v1195_v57  ;;  %v1197_v58 = vld [vmem:[%s6452_s22 + $0x1740] sm:$0xff] }
  0xcc   : > { %v1199_v59 = vld [vmem:[%s6452_s22 + $0x1760] sm:$0xff]  ;;  %1198 = vst [vmem:[%s6457_s23 + $0x5d0] sm:$0xff] %v1197_v58 }
  0xcd   : > { %v1201_v60 = vld [vmem:[%s6452_s22 + $0x1780] sm:$0xff]  ;;  %1200 = vst [vmem:[%s6457_s23 + $0x5d8] sm:$0xff] %v1199_v59 }
  0xce   : > { %1202 = vst [vmem:[%s6457_s23 + $0x5e0] sm:$0xff] %v1201_v60  ;;  %v1203_v61 = vld [vmem:[%s6452_s22 + $0x17a0] sm:$0xff] }
  0xcf   : > { %v1205_v62 = vld [vmem:[%s6452_s22 + $0x17c0] sm:$0xff]  ;;  %1204 = vst [vmem:[%s6457_s23 + $0x5e8] sm:$0xff] %v1203_v61 }
  0xd0   : > { %v1207_v63 = vld [vmem:[%s6452_s22 + $0x17e0] sm:$0xff]  ;;  %1206 = vst [vmem:[%s6457_s23 + $0x5f0] sm:$0xff] %v1205_v62 }
  0xd1   : > { %1208 = vst [vmem:[%s6457_s23 + $0x5f8] sm:$0xff] %v1207_v63  ;;  %v1209_v0 = vld [vmem:[%s6452_s22 + $0x1800] sm:$0xff] }
  0xd2   : > { %v1211_v1 = vld [vmem:[%s6452_s22 + $0x1820] sm:$0xff]  ;;  %1210 = vst [vmem:[%s6457_s23 + $0x600] sm:$0xff] %v1209_v0 }
  0xd3   : > { %v1213_v2 = vld [vmem:[%s6452_s22 + $0x1840] sm:$0xff]  ;;  %1212 = vst [vmem:[%s6457_s23 + $0x608] sm:$0xff] %v1211_v1 }
  0xd4   : > { %1214 = vst [vmem:[%s6457_s23 + $0x610] sm:$0xff] %v1213_v2  ;;  %v1215_v3 = vld [vmem:[%s6452_s22 + $0x1860] sm:$0xff] }
  0xd5   : > { %v1217_v4 = vld [vmem:[%s6452_s22 + $0x1880] sm:$0xff]  ;;  %1216 = vst [vmem:[%s6457_s23 + $0x618] sm:$0xff] %v1215_v3 }
  0xd6   : > { %v1219_v5 = vld [vmem:[%s6452_s22 + $0x18a0] sm:$0xff]  ;;  %1218 = vst [vmem:[%s6457_s23 + $0x620] sm:$0xff] %v1217_v4 }
  0xd7   : > { %1220 = vst [vmem:[%s6457_s23 + $0x628] sm:$0xff] %v1219_v5  ;;  %v1221_v6 = vld [vmem:[%s6452_s22 + $0x18c0] sm:$0xff] }
  0xd8   : > { %v1223_v7 = vld [vmem:[%s6452_s22 + $0x18e0] sm:$0xff]  ;;  %1222 = vst [vmem:[%s6457_s23 + $0x630] sm:$0xff] %v1221_v6 }
  0xd9   : > { %v1225_v8 = vld [vmem:[%s6452_s22 + $0x1900] sm:$0xff]  ;;  %1224 = vst [vmem:[%s6457_s23 + $0x638] sm:$0xff] %v1223_v7 }
  0xda   : > { %1226 = vst [vmem:[%s6457_s23 + $0x640] sm:$0xff] %v1225_v8  ;;  %v1227_v9 = vld [vmem:[%s6452_s22 + $0x1920] sm:$0xff] }
  0xdb   : > { %v1229_v10 = vld [vmem:[%s6452_s22 + $0x1940] sm:$0xff]  ;;  %1228 = vst [vmem:[%s6457_s23 + $0x648] sm:$0xff] %v1227_v9 }
  0xdc   : > { %v1231_v11 = vld [vmem:[%s6452_s22 + $0x1960] sm:$0xff]  ;;  %1230 = vst [vmem:[%s6457_s23 + $0x650] sm:$0xff] %v1229_v10 }
  0xdd   : > { %1232 = vst [vmem:[%s6457_s23 + $0x658] sm:$0xff] %v1231_v11  ;;  %v1233_v12 = vld [vmem:[%s6452_s22 + $0x1980] sm:$0xff] }
  0xde   : > { %v1235_v13 = vld [vmem:[%s6452_s22 + $0x19a0] sm:$0xff]  ;;  %1234 = vst [vmem:[%s6457_s23 + $0x660] sm:$0xff] %v1233_v12 }
  0xdf   : > { %v1237_v14 = vld [vmem:[%s6452_s22 + $0x19c0] sm:$0xff]  ;;  %1236 = vst [vmem:[%s6457_s23 + $0x668] sm:$0xff] %v1235_v13 }
  0xe0   : > { %1238 = vst [vmem:[%s6457_s23 + $0x670] sm:$0xff] %v1237_v14  ;;  %v1239_v15 = vld [vmem:[%s6452_s22 + $0x19e0] sm:$0xff] }
  0xe1   : > { %v1241_v16 = vld [vmem:[%s6452_s22 + $0x1a00] sm:$0xff]  ;;  %1240 = vst [vmem:[%s6457_s23 + $0x678] sm:$0xff] %v1239_v15 }
  0xe2   : > { %v1243_v17 = vld [vmem:[%s6452_s22 + $0x1a20] sm:$0xff]  ;;  %1242 = vst [vmem:[%s6457_s23 + $0x680] sm:$0xff] %v1241_v16 }
  0xe3   : > { %1244 = vst [vmem:[%s6457_s23 + $0x688] sm:$0xff] %v1243_v17  ;;  %v1245_v18 = vld [vmem:[%s6452_s22 + $0x1a40] sm:$0xff] }
  0xe4   : > { %v1247_v19 = vld [vmem:[%s6452_s22 + $0x1a60] sm:$0xff]  ;;  %1246 = vst [vmem:[%s6457_s23 + $0x690] sm:$0xff] %v1245_v18 }
  0xe5   : > { %v1249_v20 = vld [vmem:[%s6452_s22 + $0x1a80] sm:$0xff]  ;;  %1248 = vst [vmem:[%s6457_s23 + $0x698] sm:$0xff] %v1247_v19 }
  0xe6   : > { %1250 = vst [vmem:[%s6457_s23 + $0x6a0] sm:$0xff] %v1249_v20  ;;  %v1251_v21 = vld [vmem:[%s6452_s22 + $0x1aa0] sm:$0xff] }
  0xe7   : > { %v1253_v22 = vld [vmem:[%s6452_s22 + $0x1ac0] sm:$0xff]  ;;  %1252 = vst [vmem:[%s6457_s23 + $0x6a8] sm:$0xff] %v1251_v21 }
  0xe8   : > { %v1255_v23 = vld [vmem:[%s6452_s22 + $0x1ae0] sm:$0xff]  ;;  %1254 = vst [vmem:[%s6457_s23 + $0x6b0] sm:$0xff] %v1253_v22 }
  0xe9   : > { %1256 = vst [vmem:[%s6457_s23 + $0x6b8] sm:$0xff] %v1255_v23  ;;  %v1257_v24 = vld [vmem:[%s6452_s22 + $0x1b00] sm:$0xff] }
  0xea   : > { %v1259_v25 = vld [vmem:[%s6452_s22 + $0x1b20] sm:$0xff]  ;;  %1258 = vst [vmem:[%s6457_s23 + $0x6c0] sm:$0xff] %v1257_v24 }
  0xeb   : > { %v1261_v26 = vld [vmem:[%s6452_s22 + $0x1b40] sm:$0xff]  ;;  %1260 = vst [vmem:[%s6457_s23 + $0x6c8] sm:$0xff] %v1259_v25 }
  0xec   : > { %1262 = vst [vmem:[%s6457_s23 + $0x6d0] sm:$0xff] %v1261_v26  ;;  %v1263_v27 = vld [vmem:[%s6452_s22 + $0x1b60] sm:$0xff] }
  0xed   : > { %v1265_v28 = vld [vmem:[%s6452_s22 + $0x1b80] sm:$0xff]  ;;  %1264 = vst [vmem:[%s6457_s23 + $0x6d8] sm:$0xff] %v1263_v27 }
  0xee   : > { %v1267_v29 = vld [vmem:[%s6452_s22 + $0x1ba0] sm:$0xff]  ;;  %1266 = vst [vmem:[%s6457_s23 + $0x6e0] sm:$0xff] %v1265_v28 }
  0xef   : > { %1268 = vst [vmem:[%s6457_s23 + $0x6e8] sm:$0xff] %v1267_v29  ;;  %v1269_v30 = vld [vmem:[%s6452_s22 + $0x1bc0] sm:$0xff] }
  0xf0   : > { %v1271_v31 = vld [vmem:[%s6452_s22 + $0x1be0] sm:$0xff]  ;;  %1270 = vst [vmem:[%s6457_s23 + $0x6f0] sm:$0xff] %v1269_v30 }
  0xf1   : > { %v1273_v32 = vld [vmem:[%s6452_s22 + $0x1c00] sm:$0xff]  ;;  %1272 = vst [vmem:[%s6457_s23 + $0x6f8] sm:$0xff] %v1271_v31 }
  0xf2   : > { %1274 = vst [vmem:[%s6457_s23 + $0x700] sm:$0xff] %v1273_v32  ;;  %v1275_v33 = vld [vmem:[%s6452_s22 + $0x1c20] sm:$0xff] }
  0xf3   : > { %v1277_v34 = vld [vmem:[%s6452_s22 + $0x1c40] sm:$0xff]  ;;  %1276 = vst [vmem:[%s6457_s23 + $0x708] sm:$0xff] %v1275_v33 }
  0xf4   : > { %v1279_v35 = vld [vmem:[%s6452_s22 + $0x1c60] sm:$0xff]  ;;  %1278 = vst [vmem:[%s6457_s23 + $0x710] sm:$0xff] %v1277_v34 }
  0xf5   : > { %1280 = vst [vmem:[%s6457_s23 + $0x718] sm:$0xff] %v1279_v35  ;;  %v1281_v36 = vld [vmem:[%s6452_s22 + $0x1c80] sm:$0xff] }
  0xf6   : > { %v1283_v37 = vld [vmem:[%s6452_s22 + $0x1ca0] sm:$0xff]  ;;  %1282 = vst [vmem:[%s6457_s23 + $0x720] sm:$0xff] %v1281_v36 }
  0xf7   : > { %v1285_v38 = vld [vmem:[%s6452_s22 + $0x1cc0] sm:$0xff]  ;;  %1284 = vst [vmem:[%s6457_s23 + $0x728] sm:$0xff] %v1283_v37 }
  0xf8   : > { %1286 = vst [vmem:[%s6457_s23 + $0x730] sm:$0xff] %v1285_v38  ;;  %v1287_v39 = vld [vmem:[%s6452_s22 + $0x1ce0] sm:$0xff] }
  0xf9   : > { %v1289_v40 = vld [vmem:[%s6452_s22 + $0x1d00] sm:$0xff]  ;;  %1288 = vst [vmem:[%s6457_s23 + $0x738] sm:$0xff] %v1287_v39 }
  0xfa   : > { %v1291_v41 = vld [vmem:[%s6452_s22 + $0x1d20] sm:$0xff]  ;;  %1290 = vst [vmem:[%s6457_s23 + $0x740] sm:$0xff] %v1289_v40 }
  0xfb   : > { %1292 = vst [vmem:[%s6457_s23 + $0x748] sm:$0xff] %v1291_v41  ;;  %v1293_v42 = vld [vmem:[%s6452_s22 + $0x1d40] sm:$0xff] }
  0xfc   : > { %v1295_v43 = vld [vmem:[%s6452_s22 + $0x1d60] sm:$0xff]  ;;  %1294 = vst [vmem:[%s6457_s23 + $0x750] sm:$0xff] %v1293_v42 }
  0xfd   : > { %v1297_v44 = vld [vmem:[%s6452_s22 + $0x1d80] sm:$0xff]  ;;  %1296 = vst [vmem:[%s6457_s23 + $0x758] sm:$0xff] %v1295_v43 }
  0xfe   : > { %1298 = vst [vmem:[%s6457_s23 + $0x760] sm:$0xff] %v1297_v44  ;;  %v1299_v45 = vld [vmem:[%s6452_s22 + $0x1da0] sm:$0xff] }
  0xff   : > { %v1301_v46 = vld [vmem:[%s6452_s22 + $0x1dc0] sm:$0xff]  ;;  %1300 = vst [vmem:[%s6457_s23 + $0x768] sm:$0xff] %v1299_v45 }
 0x100   : > { %v1303_v47 = vld [vmem:[%s6452_s22 + $0x1de0] sm:$0xff]  ;;  %1302 = vst [vmem:[%s6457_s23 + $0x770] sm:$0xff] %v1301_v46 }
 0x101   : > { %1304 = vst [vmem:[%s6457_s23 + $0x778] sm:$0xff] %v1303_v47  ;;  %v1305_v48 = vld [vmem:[%s6452_s22 + $0x1e00] sm:$0xff] }
 0x102   : > { %v1307_v49 = vld [vmem:[%s6452_s22 + $0x1e20] sm:$0xff]  ;;  %1306 = vst [vmem:[%s6457_s23 + $0x780] sm:$0xff] %v1305_v48 }
 0x103   : > { %v1309_v50 = vld [vmem:[%s6452_s22 + $0x1e40] sm:$0xff]  ;;  %1308 = vst [vmem:[%s6457_s23 + $0x788] sm:$0xff] %v1307_v49 }
 0x104   : > { %1310 = vst [vmem:[%s6457_s23 + $0x790] sm:$0xff] %v1309_v50  ;;  %v1311_v51 = vld [vmem:[%s6452_s22 + $0x1e60] sm:$0xff] }
 0x105   : > { %v1313_v52 = vld [vmem:[%s6452_s22 + $0x1e80] sm:$0xff]  ;;  %1312 = vst [vmem:[%s6457_s23 + $0x798] sm:$0xff] %v1311_v51 }
 0x106   : > { %v1315_v53 = vld [vmem:[%s6452_s22 + $0x1ea0] sm:$0xff]  ;;  %1314 = vst [vmem:[%s6457_s23 + $0x7a0] sm:$0xff] %v1313_v52 }
 0x107   : > { %1316 = vst [vmem:[%s6457_s23 + $0x7a8] sm:$0xff] %v1315_v53  ;;  %v1317_v54 = vld [vmem:[%s6452_s22 + $0x1ec0] sm:$0xff] }
 0x108   : > { %v1319_v55 = vld [vmem:[%s6452_s22 + $0x1ee0] sm:$0xff]  ;;  %1318 = vst [vmem:[%s6457_s23 + $0x7b0] sm:$0xff] %v1317_v54 }
 0x109   : > { %v1321_v56 = vld [vmem:[%s6452_s22 + $0x1f00] sm:$0xff]  ;;  %1320 = vst [vmem:[%s6457_s23 + $0x7b8] sm:$0xff] %v1319_v55 }
 0x10a   : > { %1322 = vst [vmem:[%s6457_s23 + $0x7c0] sm:$0xff] %v1321_v56  ;;  %v1323_v57 = vld [vmem:[%s6452_s22 + $0x1f20] sm:$0xff] }
 0x10b   : > { %v1325_v58 = vld [vmem:[%s6452_s22 + $0x1f40] sm:$0xff]  ;;  %1324 = vst [vmem:[%s6457_s23 + $0x7c8] sm:$0xff] %v1323_v57 }
 0x10c   : > { %v1327_v59 = vld [vmem:[%s6452_s22 + $0x1f60] sm:$0xff]  ;;  %1326 = vst [vmem:[%s6457_s23 + $0x7d0] sm:$0xff] %v1325_v58 }
 0x10d   : > { %1328 = vst [vmem:[%s6457_s23 + $0x7d8] sm:$0xff] %v1327_v59  ;;  %v1329_v60 = vld [vmem:[%s6452_s22 + $0x1f80] sm:$0xff] }
 0x10e   : > { %v1331_v61 = vld [vmem:[%s6452_s22 + $0x1fa0] sm:$0xff]  ;;  %1330 = vst [vmem:[%s6457_s23 + $0x7e0] sm:$0xff] %v1329_v60 }
 0x10f   : > { %v1333_v62 = vld [vmem:[%s6452_s22 + $0x1fc0] sm:$0xff]  ;;  %1332 = vst [vmem:[%s6457_s23 + $0x7e8] sm:$0xff] %v1331_v61 }
 0x110   : > { %1334 = vst [vmem:[%s6457_s23 + $0x7f0] sm:$0xff] %v1333_v62  ;;  %v1335_v63 = vld [vmem:[%s6452_s22 + $0x1fe0] sm:$0xff] }
 0x111   : > { %1336 = vst [vmem:[%s6457_s23 + $0x7f8] sm:$0xff] %v1335_v63 }
 0x112 PF: > { %p5205_p5 = scmp.ge.s32.totalorder %s6361_s11, 1  ;;  %p1359_p6 = scmp.lt.s32.totalorder %s6361_s11, 5 }
 0x114   : > { %p1360_p7 = pnand %p5205_p5, %p1359_p6 }
 0x115   : > { %s1366_s24 = sand.u32 (!%p1360_p7), 1, %s6353_s30   ;;  %s5207_s25 = sshll.u32 (!%p1360_p7), %s6432_s12, 1 }
 0x116   : > { %1363 = sbr.rel (%p1360_p7) target bundleno = 1653 (0x675), region = 90  ;;  %s5206_s26 = sshll.u32 (!%p1360_p7), %s1366_s24, 11 }
 0x117   : > { %p1408_p8 = scmp.lt.s32.totalorder (!%p1360_p7), %s5207_s25, 7  ;;  %s5208_s27 = sshll.u32 (!%p1360_p7), %s6432_s12, 5 }
 0x118   : > { %p1413_p9 = scmp.lt.s32.totalorder (!%p1360_p7), %s5208_s27, 127  ;;  %s6984_s30 = scalar_lea.vmem (!%p1360_p7), [#allocation4], %s5206_s26 }
 0x119   : > { %p5211_p10 = scmp.ne.s32.totalorder (!%p1360_p7), %s6432_s12, 0 }
 0x11d   : > { %s7753_s25 = smov (!%p1408_p8, %s5207_s25), 7  ;;  %s7755_s27 = smov (!%p1413_p9, %s5208_s27), 127 }
 0x11e   : > { %s1410_s14 = scalar_lea.vmem %s7743_s4, %s7753_s25  ;;  %s5667_s11 = sshll.u32 %s7755_s27, 4  ;;  %v1425_v0 = vld [vmem:[%s7740_s1] sm:$0xff] (!%p5211_p10)  ;;  %v1426_v2 = vld [vmem:[%s7740_s1 + $0x8] sm:$0xff] (!%p5211_p10)  ;;  %v6363_v8 = vmov (!%p5211_p10), 0   ;;  %v1427_v31 = vld [vmem:[%s7740_s1 + $0x10] sm:$0xff] (!%p5211_p10)  ;;  %vm1893_vm0 = vcmask (!%p5211_p10), 523264  }
 0x11f   : > { %s6982_s18 = scalar_lea.vmem %s7744_s5, %s5667_s11  ;;  %1423 = sbr.rel (%p5211_p10) target bundleno = 574 (0x23e), region = 98  ;;  %v1433_v1 = vld [vmem:[%s7740_s1 + $0x40] sm:$0xff] (!%p5211_p10)  ;;  %v1434_v4 = vld [vmem:[%s7740_s1 + $0x48] sm:$0xff] (!%p5211_p10)  ;;  %1929 = vmatprep.mubr.bf16.mxu0 (!%p5211_p10), %v6363_v8  ;;  %1970 = vmatprep.mubr.bf16.mxu1 (!%p5211_p10), %v6363_v8  ;;  %v1435_v32 = vld [vmem:[%s7740_s1 + $0x50] sm:$0xff] (!%p5211_p10) }
 0x120   : > { %v5213_v3 = vcombine.high (!%p5211_p10), %v1425_v0, %v1433_v1  ;;  %v5212_v5 = vcombine.low (!%p5211_p10), %v1425_v0, %v1433_v1  ;;  %v1441_v6 = vld [vmem:[%s7740_s1 + $0x80] sm:$0xff] (!%p5211_p10)  ;;  %v5215_v9 = vcombine.high (!%p5211_p10), %v1426_v2, %v1434_v4  ;;  %v5214_v10 = vcombine.low (!%p5211_p10), %v1426_v2, %v1434_v4  ;;  %v1442_v12 = vld [vmem:[%s7740_s1 + $0x88] sm:$0xff] (!%p5211_p10)  ;;  %v1428_v33 = vld [vmem:[%s7740_s1 + $0x18] sm:$0xff] (!%p5211_p10) }
 0x121   : > { %v1449_v7 = vld [vmem:[%s7740_s1 + $0xc0] sm:$0xff] (!%p5211_p10)  ;;  %v1450_v13 = vld [vmem:[%s7740_s1 + $0xc8] sm:$0xff] (!%p5211_p10)  ;;  %v1436_v34 = vld [vmem:[%s7740_s1 + $0x58] sm:$0xff] (!%p5211_p10)  ;;  %v5217_v37 = vcombine.high (!%p5211_p10), %v1427_v31, %v1435_v32  ;;  %v5216_v44 = vcombine.low (!%p5211_p10), %v1427_v31, %v1435_v32 }
 0x122   : > { %v5229_v11 = vcombine.high (!%p5211_p10), %v1441_v6, %v1449_v7  ;;  %v1457_v14 = vld [vmem:[%s7740_s1 + $0x100] sm:$0xff] (!%p5211_p10)  ;;  %1897 = vmatprep.subr.bf16.mxu0 (!%p5211_p10), %v5213_v3  ;;  %v5231_v15 = vcombine.high (!%p5211_p10), %v1442_v12, %v1450_v13  ;;  %v1458_v17 = vld [vmem:[%s7740_s1 + $0x108] sm:$0xff] (!%p5211_p10)  ;;  %1938 = vmatprep.subr.bf16.mxu1 (!%p5211_p10), %v5215_v9  ;;  %v5228_v19 = vcombine.low (!%p5211_p10), %v1441_v6, %v1449_v7  ;;  %v1443_v39 = vld [vmem:[%s7740_s1 + $0x90] sm:$0xff] (!%p5211_p10) }
 0x123   : > { %v1465_v16 = vld [vmem:[%s7740_s1 + $0x140] sm:$0xff] (!%p5211_p10)  ;;  %v1466_v18 = vld [vmem:[%s7740_s1 + $0x148] sm:$0xff] (!%p5211_p10)  ;;  %1898 = vmatpush1.bf16.msra.mxu0 (!%p5211_p10), %v5212_v5  ;;  %1939 = vmatpush1.bf16.msra.mxu1 (!%p5211_p10), %v5214_v10  ;;  %v5230_v20 = vcombine.low (!%p5211_p10), %v1442_v12, %v1450_v13  ;;  %v5219_v38 = vcombine.high (!%p5211_p10), %v1428_v33, %v1436_v34  ;;  %v1451_v40 = vld [vmem:[%s7740_s1 + $0xd0] sm:$0xff] (!%p5211_p10)  ;;  %v5218_v45 = vcombine.low (!%p5211_p10), %v1428_v33, %v1436_v34 }
 0x124   : > { %1899 = vmatprep.subr.bf16.mxu0 (!%p5211_p10), %v5229_v11  ;;  %v5245_v21 = vcombine.high (!%p5211_p10), %v1457_v14, %v1465_v16  ;;  %1940 = vmatprep.subr.bf16.mxu1 (!%p5211_p10), %v5231_v15  ;;  %v5247_v22 = vcombine.high (!%p5211_p10), %v1458_v17, %v1466_v18  ;;  %v1473_v23 = vld [vmem:[%s7740_s1 + $0x180] sm:$0xff] (!%p5211_p10)  ;;  %v1474_v25 = vld [vmem:[%s7740_s1 + $0x188] sm:$0xff] (!%p5211_p10)  ;;  %v5244_v27 = vcombine.low (!%p5211_p10), %v1457_v14, %v1465_v16  ;;  %v1444_v41 = vld [vmem:[%s7740_s1 + $0x98] sm:$0xff] (!%p5211_p10) }
 0x125   : > { %v1481_v24 = vld [vmem:[%s7740_s1 + $0x1c0] sm:$0xff] (!%p5211_p10)  ;;  %v1482_v26 = vld [vmem:[%s7740_s1 + $0x1c8] sm:$0xff] (!%p5211_p10)  ;;  %v5246_v28 = vcombine.low (!%p5211_p10), %v1458_v17, %v1466_v18  ;;  %v1452_v42 = vld [vmem:[%s7740_s1 + $0xd8] sm:$0xff] (!%p5211_p10)  ;;  %v5233_v46 = vcombine.high (!%p5211_p10), %v1443_v39, %v1451_v40  ;;  %v5232_v52 = vcombine.low (!%p5211_p10), %v1443_v39, %v1451_v40 }
 0x126   : > { %v5261_v29 = vcombine.high %v1473_v23, %v1481_v24  ;;  %v5263_v30 = vcombine.high %v1474_v25, %v1482_v26  ;;  %v5260_v35 = vcombine.low %v1473_v23, %v1481_v24  ;;  %v5262_v36 = vcombine.low %v1474_v25, %v1482_v26  ;;  %v7064_v43 = vld [vmem:[%s7739_s0] sm:$0xf]  ;;  %v1459_v48 = vld [vmem:[%s7740_s1 + $0x110] sm:$0xff]  ;;  %v1460_v50 = vld [vmem:[%s7740_s1 + $0x118] sm:$0xff] }
 0x127   : > { %1900 = vmatpush1.bf16.msra.mxu0 %v5228_v19  ;;  %1941 = vmatpush1.bf16.msra.mxu1 %v5230_v20  ;;  %v5235_v47 = vcombine.high %v1444_v41, %v1452_v42  ;;  %v1467_v49 = vld [vmem:[%s7740_s1 + $0x150] sm:$0xff]  ;;  %v1468_v51 = vld [vmem:[%s7740_s1 + $0x158] sm:$0xff]  ;;  %v5234_v53 = vcombine.low %v1444_v41, %v1452_v42  ;;  %v1429_v0 = vld [vmem:[%s7740_s1 + $0x20] sm:$0xff] }
 0x128   : > { %1901 = vmatprep.subr.bf16.mxu0 %v5245_v21  ;;  %1942 = vmatprep.subr.bf16.mxu1 %v5247_v22  ;;  %v5249_v54 = vcombine.high %v1459_v48, %v1467_v49  ;;  %v5251_v55 = vcombine.high %v1460_v50, %v1468_v51  ;;  %v1475_v56 = vld [vmem:[%s7740_s1 + $0x190] sm:$0xff]  ;;  %v1476_v58 = vld [vmem:[%s7740_s1 + $0x198] sm:$0xff]  ;;  %v5248_v60 = vcombine.low %v1459_v48, %v1467_v49  ;;  %v1437_v1 = vld [vmem:[%s7740_s1 + $0x60] sm:$0xff] }
 0x129   : > { %v1483_v57 = vld [vmem:[%s7740_s1 + $0x1d0] sm:$0xff]  ;;  %v1484_v59 = vld [vmem:[%s7740_s1 + $0x1d8] sm:$0xff]  ;;  %v5250_v61 = vcombine.low %v1460_v50, %v1468_v51  ;;  %v1430_v2 = vld [vmem:[%s7740_s1 + $0x28] sm:$0xff]  ;;  %v5221_v6 = vcombine.high %v1429_v0, %v1437_v1  ;;  %v5220_v13 = vcombine.low %v1429_v0, %v1437_v1 }
 0x12a   : > { %v5265_v62 = vcombine.high %v1475_v56, %v1483_v57  ;;  %v5267_v63 = vcombine.high %v1476_v58, %v1484_v59  ;;  %v1438_v3 = vld [vmem:[%s7740_s1 + $0x68] sm:$0xff]  ;;  %v5264_v4 = vcombine.low %v1475_v56, %v1483_v57  ;;  %v5266_v5 = vcombine.low %v1476_v58, %v1484_v59  ;;  %v1445_v9 = vld [vmem:[%s7740_s1 + $0xa0] sm:$0xff]  ;;  %v1431_v33 = vld [vmem:[%s7740_s1 + $0x30] sm:$0xff] }
 0x12b   : > { %1902 = vmatpush1.bf16.msra.mxu0 %v5244_v27  ;;  %1943 = vmatpush1.bf16.msra.mxu1 %v5246_v28  ;;  %v5223_v7 = vcombine.high %v1430_v2, %v1438_v3  ;;  %v1453_v10 = vld [vmem:[%s7740_s1 + $0xe0] sm:$0xff]  ;;  %v1446_v11 = vld [vmem:[%s7740_s1 + $0xa8] sm:$0xff]  ;;  %v5222_v14 = vcombine.low %v1430_v2, %v1438_v3  ;;  %v1439_v34 = vld [vmem:[%s7740_s1 + $0x70] sm:$0xff] }
 0x12c   : > { %1903 = vmatprep.subr.bf16.mxu0 %v5261_v29  ;;  %1944 = vmatprep.subr.bf16.mxu1 %v5263_v30  ;;  %v1454_v12 = vld [vmem:[%s7740_s1 + $0xe8] sm:$0xff]  ;;  %v5237_v15 = vcombine.high %v1445_v9, %v1453_v10  ;;  %v1461_v17 = vld [vmem:[%s7740_s1 + $0x120] sm:$0xff]  ;;  %v5236_v21 = vcombine.low %v1445_v9, %v1453_v10  ;;  %v5225_v39 = vcombine.high %v1431_v33, %v1439_v34  ;;  %v1447_v41 = vld [vmem:[%s7740_s1 + $0xb0] sm:$0xff] }
 0x12d   : > { %v5239_v16 = vcombine.high %v1446_v11, %v1454_v12  ;;  %v1469_v18 = vld [vmem:[%s7740_s1 + $0x160] sm:$0xff]  ;;  %v1462_v19 = vld [vmem:[%s7740_s1 + $0x128] sm:$0xff]  ;;  %v5238_v22 = vcombine.low %v1446_v11, %v1454_v12  ;;  %v1455_v42 = vld [vmem:[%s7740_s1 + $0xf0] sm:$0xff] }
 0x12e   : > { %v1470_v20 = vld [vmem:[%s7740_s1 + $0x168] sm:$0xff]  ;;  %v5253_v23 = vcombine.high %v1461_v17, %v1469_v18  ;;  %v1477_v25 = vld [vmem:[%s7740_s1 + $0x1a0] sm:$0xff]  ;;  %v5252_v29 = vcombine.low %v1461_v17, %v1469_v18  ;;  %v5241_v48 = vcombine.high %v1447_v41, %v1455_v42  ;;  %v1463_v50 = vld [vmem:[%s7740_s1 + $0x130] sm:$0xff] }
 0x12f   : > { %1904 = vmatpush1.bf16.msra.mxu0 %v5260_v35  ;;  %1945 = vmatpush1.bf16.msra.mxu1 %v5262_v36  ;;  %v5255_v24 = vcombine.high %v1462_v19, %v1470_v20  ;;  %v1485_v26 = vld [vmem:[%s7740_s1 + $0x1e0] sm:$0xff]  ;;  %v1478_v27 = vld [vmem:[%s7740_s1 + $0x1a8] sm:$0xff]  ;;  %v5254_v30 = vcombine.low %v1462_v19, %v1470_v20  ;;  %v1432_v35 = vld [vmem:[%s7740_s1 + $0x38] sm:$0xff] }
 0x130   : > { %1979 = vmatprep.subr.bf16.mxu0 %v5217_v37  ;;  %2020 = vmatprep.subr.bf16.mxu1 %v5219_v38  ;;  %v1486_v28 = vld [vmem:[%s7740_s1 + $0x1e8] sm:$0xff]  ;;  %v5269_v31 = vcombine.high %v1477_v25, %v1485_v26  ;;  %v1440_v36 = vld [vmem:[%s7740_s1 + $0x78] sm:$0xff]  ;;  %v5268_v37 = vcombine.low %v1477_v25, %v1485_v26  ;;  %v1471_v51 = vld [vmem:[%s7740_s1 + $0x170] sm:$0xff] }
 0x131   : > { %v5271_v32 = vcombine.high %v1478_v27, %v1486_v28  ;;  %v5270_v38 = vcombine.low %v1478_v27, %v1486_v28  ;;  %v5227_v40 = vcombine.high %v1432_v35, %v1440_v36  ;;  %v5257_v56 = vcombine.high %v1463_v50, %v1471_v51  ;;  %v1479_v58 = vld [vmem:[%s7740_s1 + $0x1b0] sm:$0xff] }
 0x132   : > { %5276 = vmatmul.mubr.msk.bf16.vlgmr.msra.gmra.mrb[0].mxu0 %vm1893_vm0, %v7064_v43  ;;  %5277 = vmatmul.mubr.msk.bf16.vlgmr.msra.gmra.mrb[0].mxu1 %vm1893_vm0, %v7064_v43  ;;  %v1487_v59 = vld [vmem:[%s7740_s1 + $0x1f0] sm:$0xff] }
 0x133   : > { %1980 = vmatpush1.bf16.msra.mxu0 %v5216_v44  ;;  %2021 = vmatpush1.bf16.msra.mxu1 %v5218_v45  ;;  %v1448_v44 = vld [vmem:[%s7740_s1 + $0xb8] sm:$0xff]  ;;  %v5273_v0 = vcombine.high %v1479_v58, %v1487_v59  ;;  %v5272_v2 = vcombine.low %v1479_v58, %v1487_v59 }
 0x134   : > { %1981 = vmatprep.subr.bf16.mxu0 %v5233_v46  ;;  %2022 = vmatprep.subr.bf16.mxu1 %v5235_v47  ;;  %v1456_v45 = vld [vmem:[%s7740_s1 + $0xf8] sm:$0xff]  ;;  %v5224_v46 = vcombine.low %v1431_v33, %v1439_v34  ;;  %v5226_v47 = vcombine.low %v1432_v35, %v1440_v36 }
 0x135   : > { %2011 = vmatprep.mubr.bf16.mxu0 %v6363_v8  ;;  %2052 = vmatprep.mubr.bf16.mxu1 %v6363_v8  ;;  %v5243_v49 = vcombine.high %v1448_v44, %v1456_v45 }
 0x137   : > { %1982 = vmatpush1.bf16.msra.mxu0 %v5232_v52  ;;  %2023 = vmatpush1.bf16.msra.mxu1 %v5234_v53  ;;  %v1464_v52 = vld [vmem:[%s7740_s1 + $0x138] sm:$0xff] }
 0x138   : > { %1983 = vmatprep.subr.bf16.mxu0 %v5249_v54  ;;  %2024 = vmatprep.subr.bf16.mxu1 %v5251_v55  ;;  %v1472_v53 = vld [vmem:[%s7740_s1 + $0x178] sm:$0xff]  ;;  %v5240_v54 = vcombine.low %v1447_v41, %v1455_v42  ;;  %v5242_v55 = vcombine.low %v1448_v44, %v1456_v45 }
 0x139   : > { %v5259_v57 = vcombine.high %v1464_v52, %v1472_v53 }
 0x13b   : > { %1984 = vmatpush1.bf16.msra.mxu0 %v5248_v60  ;;  %2025 = vmatpush1.bf16.msra.mxu1 %v5250_v61  ;;  %v1480_v60 = vld [vmem:[%s7740_s1 + $0x1b8] sm:$0xff] }
 0x13c   : > { %1985 = vmatprep.subr.bf16.mxu0 %v5265_v62  ;;  %2026 = vmatprep.subr.bf16.mxu1 %v5267_v63  ;;  %v1488_v61 = vld [vmem:[%s7740_s1 + $0x1f8] sm:$0xff]  ;;  %v5256_v62 = vcombine.low %v1463_v50, %v1471_v51  ;;  %v5258_v63 = vcombine.low %v1464_v52, %v1472_v53 }
 0x13d   : > { %v5275_v1 = vcombine.high %v1480_v60, %v1488_v61  ;;  %v5274_v3 = vcombine.low %v1480_v60, %v1488_v61  ;;  %v1490_v60 = vld [vmem:[%s7741_s2 + $0x8] sm:$0xff] }
 0x13f   : > { %1986 = vmatpush1.bf16.msra.mxu0 %v5264_v4  ;;  %2027 = vmatpush1.bf16.msra.mxu1 %v5266_v5  ;;  %v1493_v4 = vlaneseq }
 0x140   : > { %2061 = vmatprep.subr.bf16.mxu0 %v5221_v6  ;;  %2102 = vmatprep.subr.bf16.mxu1 %v5223_v7  ;;  %v1489_v7 = vld [vmem:[%s7741_s2] sm:$0xff] }
 0x141   : > { %v7208_v5 = vshrl.u32 %v1493_v4, 7 }
 0x142   : > { %5278 = vmatmul.mubr.msk.bf16.vlgmr.msra.gmra.mrb[4].mxu0 %vm1893_vm0, %v7064_v43  ;;  %5279 = vmatmul.mubr.msk.bf16.vlgmr.msra.gmra.mrb[4].mxu1 %vm1893_vm0, %v7064_v43 }
 0x143   : > { %2062 = vmatpush1.bf16.msra.mxu0 %v5220_v13  ;;  %2103 = vmatpush1.bf16.msra.mxu1 %v5222_v14  ;;  %v1495_v6 = vsub.s32 0, %v7208_v5  ;;  %v1503_v9 = vsub.s32 2, %v7208_v5  ;;  %v1499_v10 = vsub.s32 1, %v7208_v5  ;;  %v1511_v33 = vsub.s32 4, %v7208_v5 }
 0x144   : > { %2063 = vmatprep.subr.bf16.mxu0 %v5237_v15  ;;  %2104 = vmatprep.subr.bf16.mxu1 %v5239_v16  ;;  %v1519_v34 = vsub.s32 6, %v7208_v5  ;;  %v1515_v35 = vsub.s32 5, %v7208_v5  ;;  %v1523_v36 = vsub.s32 7, %v7208_v5 }
 0x145   : > { %2093 = vmatprep.mubr.bf16.mxu0 %v6363_v8  ;;  %2134 = vmatprep.mubr.bf16.mxu1 %v6363_v8  ;;  %v1496_v11 = vrot.slane %v1489_v7, %v1495_v6  ;;  %v1504_v12 = vrot.slane %v1489_v7, %v1503_v9  ;;  %v1500_v13 = vrot.slane %v1489_v7, %v1499_v10 }
 0x146   : > { %v1528_v61 = vrot.slane %v1490_v60, %v1495_v6 }
 0x147   : > { %2064 = vmatpush1.bf16.msra.mxu0 %v5236_v21  ;;  %2105 = vmatpush1.bf16.msra.mxu1 %v5238_v22 }
 0x148   : > { %2065 = vmatprep.subr.bf16.mxu0 %v5253_v23  ;;  %2106 = vmatprep.subr.bf16.mxu1 %v5255_v24 }
 0x14b   : > { %2066 = vmatpush1.bf16.msra.mxu0 %v5252_v29  ;;  %2107 = vmatpush1.bf16.msra.mxu1 %v5254_v30 }
 0x14c   : > { %2067 = vmatprep.subr.bf16.mxu0 %v5269_v31  ;;  %2108 = vmatprep.subr.bf16.mxu1 %v5271_v32 }
 0x14f   : > { %2068 = vmatpush1.bf16.msra.mxu0 %v5268_v37  ;;  %2109 = vmatpush1.bf16.msra.mxu1 %v5270_v38  ;;  %v1512_v37 = vrot.slane %v1489_v7, %v1511_v33  ;;  %v1520_v38 = vrot.slane %v1489_v7, %v1519_v34 }
 0x150   : > { %2143 = vmatprep.subr.bf16.mxu0 %v5225_v39  ;;  %2184 = vmatprep.subr.bf16.mxu1 %v5227_v40  ;;  %v1516_v39 = vrot.slane %v1489_v7, %v1515_v35  ;;  %v1524_v40 = vrot.slane %v1489_v7, %v1523_v36 }
 0x152   : > { %5280 = vmatmul.mubr.msk.bf16.vlgmr.msra.gmra.mrb[8].mxu0 %vm1893_vm0, %v7064_v43  ;;  %5281 = vmatmul.mubr.msk.bf16.vlgmr.msra.gmra.mrb[8].mxu1 %vm1893_vm0, %v7064_v43 }
 0x153   : > { %2144 = vmatpush1.bf16.msra.mxu0 %v5224_v46  ;;  %2185 = vmatpush1.bf16.msra.mxu1 %v5226_v47 }
 0x154   : > { %2145 = vmatprep.subr.bf16.mxu0 %v5241_v48  ;;  %2186 = vmatprep.subr.bf16.mxu1 %v5243_v49 }
 0x155   : > { %2175 = vmatprep.mubr.bf16.mxu0 %v6363_v8  ;;  %2216 = vmatprep.mubr.bf16.mxu1 %v6363_v8  ;;  %v6364_v8 = vmov 0.0  }
 0x156   : > { %2313 = vst [vmem:[#allocation3] sm:$0xff] %v6364_v8  ;;  %2314 = vst [vmem:[#allocation3 + $0x8] sm:$0xff] %v6364_v8 }
 0x157   : > { %2146 = vmatpush1.bf16.msra.mxu0 %v5240_v54  ;;  %2187 = vmatpush1.bf16.msra.mxu1 %v5242_v55  ;;  %2315 = vst [vmem:[#allocation3 + $0x10] sm:$0xff] %v6364_v8  ;;  %2316 = vst [vmem:[#allocation3 + $0x18] sm:$0xff] %v6364_v8 }
 0x158   : > { %2147 = vmatprep.subr.bf16.mxu0 %v5257_v56  ;;  %2188 = vmatprep.subr.bf16.mxu1 %v5259_v57 }
 0x15b   : > { %2148 = vmatpush1.bf16.msra.mxu0 %v5256_v62  ;;  %2189 = vmatpush1.bf16.msra.mxu1 %v5258_v63  ;;  %v1536_v62 = vrot.slane %v1490_v60, %v1503_v9  ;;  %v1532_v63 = vrot.slane %v1490_v60, %v1499_v10  ;;  %v1544_v10 = vrot.slane %v1490_v60, %v1511_v33 }
 0x15c   : > { %2149 = vmatprep.subr.bf16.mxu0 %v5273_v0  ;;  %2190 = vmatprep.subr.bf16.mxu1 %v5275_v1 }
 0x15f   : > { %2150 = vmatpush1.bf16.msra.mxu0 %v5272_v2  ;;  %2191 = vmatpush1.bf16.msra.mxu1 %v5274_v3 }
 0x162   : > { %5282 = vmatmul.mubr.msk.bf16.vlgmr.msra.gmra.mrb[12].mxu0 %vm1893_vm0, %v7064_v43  ;;  %5283 = vmatmul.mubr.msk.bf16.vlgmr.msra.gmra.mrb[12].mxu1 %vm1893_vm0, %v7064_v43  ;;  %v1507_v43 = vsub.s32 3, %v7208_v5 }
 0x164   : > { %v1508_v14 = vrot.slane %v1489_v7, %v1507_v43  ;;  %v1540_v0 = vrot.slane %v1490_v60, %v1507_v43  ;;  %v1552_v43 = vrot.slane %v1490_v60, %v1519_v34 }
 0x205   : > { %v1931_v15 = vpop.f32.mrb[0].mxu0  ;;  %v1972_v17 = vpop.f32.mrb[0].mxu1 }
 0x206   : > { %v1932_v16 = vadd.f32 %v1931_v15, %v1496_v11  ;;  %v1933_v18 = vpop.f32.mrb[1].mxu0  ;;  %v1973_v19 = vadd.f32 %v1972_v17, %v1504_v12  ;;  %v1974_v21 = vpop.f32.mrb[1].mxu1 }
 0x207   : > { %v1934_v20 = vadd.f32 %v1933_v18, %v1500_v13  ;;  %v1935_v22 = vpop.f32.mrb[2].mxu0  ;;  %v1975_v24 = vadd.f32 %v1974_v21, %v1508_v14  ;;  %v1976_v25 = vpop.f32.mrb[2].mxu1  ;;  %v1556_v21 = vrot.slane %v1490_v60, %v1523_v36 }
 0x208   : > { %v2225_v23 = vmax.f32 %v1932_v16, 0.0  ;;  %v1936_v26 = vpop.f32.mrb[3].mxu0  ;;  %v2227_v27 = vmax.f32 %v1973_v19, 0.0  ;;  %v1977_v29 = vpop.f32.mrb[3].mxu1 }
 0x209   : > { %v2226_v28 = vmax.f32 %v1934_v20, 0.0  ;;  %v2228_v30 = vmax.f32 %v1975_v24, 0.0  ;;  %v1548_v20 = vrot.slane %v1490_v60, %v1515_v35 }
 0x20b   : > { %v5668_v31 = vpack.c.bf16 %v2226_v28, %v2225_v23  ;;  %v5669_v32 = vpack.c.bf16 %v2228_v30, %v2227_v27 }
 0x20d   : > { %2305 = vst [vmem:[#allocation2] sm:$0xff] %v5668_v31  ;;  %2306 = vst [vmem:[#allocation2 + $0x8] sm:$0xff] %v5669_v32 }
 0x215   : > { %v2013_v41 = vpop.f32.mrb[4].mxu0  ;;  %v2054_v44 = vpop.f32.mrb[4].mxu1 }
 0x216   : > { %v2014_v42 = vadd.f32 %v2013_v41, %v1512_v37  ;;  %v2015_v45 = vpop.f32.mrb[5].mxu0  ;;  %v2055_v46 = vadd.f32 %v2054_v44, %v1520_v38  ;;  %v2056_v48 = vpop.f32.mrb[5].mxu1 }
 0x217   : > { %v2016_v47 = vadd.f32 %v2015_v45, %v1516_v39  ;;  %v2017_v49 = vpop.f32.mrb[6].mxu0  ;;  %v2057_v51 = vadd.f32 %v2056_v48, %v1524_v40  ;;  %v2058_v52 = vpop.f32.mrb[6].mxu1 }
 0x218   : > { %v2229_v50 = vmax.f32 %v2014_v42, 0.0  ;;  %v2018_v53 = vpop.f32.mrb[7].mxu0  ;;  %v2231_v54 = vmax.f32 %v2055_v46, 0.0  ;;  %v2059_v56 = vpop.f32.mrb[7].mxu1 }
 0x219   : > { %v2230_v55 = vmax.f32 %v2016_v47, 0.0  ;;  %v2232_v57 = vmax.f32 %v2057_v51, 0.0 }
 0x21b   : > { %v5670_v58 = vpack.c.bf16 %v2230_v55, %v2229_v50  ;;  %v5671_v59 = vpack.c.bf16 %v2232_v57, %v2231_v54 }
 0x21d   : > { %2307 = vst [vmem:[#allocation2 + $0x10] sm:$0xff] %v5670_v58  ;;  %2308 = vst [vmem:[#allocation2 + $0x18] sm:$0xff] %v5671_v59 }
 0x225   : > { %v2095_v1 = vpop.f32.mrb[8].mxu0  ;;  %v2136_v3 = vpop.f32.mrb[8].mxu1 }
 0x226   : > { %v2096_v2 = vadd.f32 %v2095_v1, %v1528_v61  ;;  %v2097_v8 = vpop.f32.mrb[9].mxu0  ;;  %v2137_v4 = vadd.f32 %v2136_v3, %v1536_v62  ;;  %v2138_v7 = vpop.f32.mrb[9].mxu1 }
 0x227   : > { %v2098_v5 = vadd.f32 %v2097_v8, %v1532_v63  ;;  %v2099_v11 = vpop.f32.mrb[10].mxu0  ;;  %v2139_v13 = vadd.f32 %v2138_v7, %v1540_v0  ;;  %v2140_v14 = vpop.f32.mrb[10].mxu1 }
 0x228   : > { %v2233_v12 = vmax.f32 %v2096_v2, 0.0  ;;  %v2100_v15 = vpop.f32.mrb[11].mxu0  ;;  %v2235_v16 = vmax.f32 %v2137_v4, 0.0  ;;  %v2141_v18 = vpop.f32.mrb[11].mxu1 }
 0x229   : > { %v2234_v17 = vmax.f32 %v2098_v5, 0.0  ;;  %v2236_v19 = vmax.f32 %v2139_v13, 0.0 }
 0x22b   : > { %v5672_v6 = vpack.c.bf16 %v2234_v17, %v2233_v12  ;;  %v5673_v9 = vpack.c.bf16 %v2236_v19, %v2235_v16 }
 0x22d   : > { %2309 = vst [vmem:[#allocation2 + $0x20] sm:$0xff] %v5672_v6  ;;  %2310 = vst [vmem:[#allocation2 + $0x28] sm:$0xff] %v5673_v9 }
 0x235   : > { %v2177_v22 = vpop.f32.mrb[12].mxu0  ;;  %v2218_v24 = vpop.f32.mrb[12].mxu1 }
 0x236   : > { %v2178_v23 = vadd.f32 %v2177_v22, %v1544_v10  ;;  %v2179_v25 = vpop.f32.mrb[13].mxu0  ;;  %v2219_v26 = vadd.f32 %v2218_v24, %v1552_v43  ;;  %v2220_v28 = vpop.f32.mrb[13].mxu1 }
 0x237   : > { %v2180_v27 = vadd.f32 %v2179_v25, %v1548_v20  ;;  %v2181_v29 = vpop.f32.mrb[14].mxu0  ;;  %v2221_v31 = vadd.f32 %v2220_v28, %v1556_v21  ;;  %v2222_v32 = vpop.f32.mrb[14].mxu1 }
 0x238   : > { %v2237_v30 = vmax.f32 %v2178_v23, 0.0  ;;  %v2182_v37 = vpop.f32.mrb[15].mxu0  ;;  %v2239_v38 = vmax.f32 %v2219_v26, 0.0  ;;  %v2223_v40 = vpop.f32.mrb[15].mxu1 }
 0x239   : > { %v2238_v39 = vmax.f32 %v2180_v27, 0.0  ;;  %v2240_v41 = vmax.f32 %v2221_v31, 0.0 }
 0x23b   : > { %v5674_v33 = vpack.c.bf16 %v2238_v39, %v2237_v30  ;;  %v5675_v34 = vpack.c.bf16 %v2240_v41, %v2239_v38 }
 0x23d   : > { %2311 = vst [vmem:[#allocation2 + $0x30] sm:$0xff] %v5674_v33  ;;  %2312 = vst [vmem:[#allocation2 + $0x38] sm:$0xff] %v5675_v34 }
 0x23e PF: > { %v5781_v35 = vld [vmem:[%s6984_s30 + $0x4] ss:$8 sps:$4 sm:$0xff]   ;;  %v5785_v42 = vld [vmem:[%s6984_s30] ss:$8 sps:$4 sm:$0xff]   ;;  %v5787_v45 = vld [vmem:[%s6984_s30 + $0x14] ss:$8 sps:$4 sm:$0xff]  }
 0x23f   : > { %v5783_v36 = vld [vmem:[%s6984_s30 + $0x304] ss:$8 sps:$4 sm:$0xff]   ;;  %3929 = vmatprep.subr.bf16.mxu1 %v5781_v35  ;;  %v5786_v44 = vld [vmem:[%s6984_s30 + $0x300] ss:$8 sps:$4 sm:$0xff]   ;;  %v5789_v46 = vld [vmem:[%s6984_s30 + $0x314] ss:$8 sps:$4 sm:$0xff]  }
 0x240   : > { %4052 = vmatprep.subr.bf16.mxu0 %v5783_v36  ;;  %3930 = vmatpush1.bf16.msra.mxu1 %v5785_v42  ;;  %v5791_v47 = vld [vmem:[%s6984_s30 + $0x10] ss:$8 sps:$4 sm:$0xff]   ;;  %v5793_v49 = vld [vmem:[%s6984_s30 + $0x24] ss:$8 sps:$4 sm:$0xff]   ;;  %v5797_v51 = vld [vmem:[%s6984_s30 + $0x20] ss:$8 sps:$4 sm:$0xff]  }
 0x241   : > { %4053 = vmatpush1.bf16.msra.mxu0 %v5786_v44  ;;  %3931 = vmatprep.subr.bf16.mxu1 %v5787_v45  ;;  %v5792_v48 = vld [vmem:[%s6984_s30 + $0x310] ss:$8 sps:$4 sm:$0xff]   ;;  %v5795_v50 = vld [vmem:[%s6984_s30 + $0x324] ss:$8 sps:$4 sm:$0xff]   ;;  %v5798_v52 = vld [vmem:[%s6984_s30 + $0x320] ss:$8 sps:$4 sm:$0xff]  }
 0x242   : > { %4054 = vmatprep.subr.bf16.mxu0 %v5789_v46  ;;  %v5799_v53 = vld [vmem:[%s6984_s30 + $0x34] ss:$8 sps:$4 sm:$0xff]   ;;  %v5803_v55 = vld [vmem:[%s6984_s30 + $0x30] ss:$8 sps:$4 sm:$0xff]   ;;  %v5805_v57 = vld [vmem:[%s6984_s30 + $0x44] ss:$8 sps:$4 sm:$0xff]  }
 0x243   : > { %v5801_v54 = vld [vmem:[%s6984_s30 + $0x334] ss:$8 sps:$4 sm:$0xff]   ;;  %v5804_v56 = vld [vmem:[%s6984_s30 + $0x330] ss:$8 sps:$4 sm:$0xff]   ;;  %v5807_v58 = vld [vmem:[%s6984_s30 + $0x344] ss:$8 sps:$4 sm:$0xff]  }
 0x244   : > { %3932 = vmatpush1.bf16.msra.mxu1 %v5791_v47  ;;  %v5809_v59 = vld [vmem:[%s6984_s30 + $0x40] ss:$8 sps:$4 sm:$0xff]   ;;  %v5811_v61 = vld [vmem:[%s6984_s30 + $0x54] ss:$8 sps:$4 sm:$0xff]   ;;  %v5815_v63 = vld [vmem:[%s6984_s30 + $0x50] ss:$8 sps:$4 sm:$0xff]  }
 0x245   : > { %4055 = vmatpush1.bf16.msra.mxu0 %v5792_v48  ;;  %3933 = vmatprep.subr.bf16.mxu1 %v5793_v49  ;;  %v5810_v60 = vld [vmem:[%s6984_s30 + $0x340] ss:$8 sps:$4 sm:$0xff]   ;;  %v5813_v62 = vld [vmem:[%s6984_s30 + $0x354] ss:$8 sps:$4 sm:$0xff]   ;;  %v5816_v0 = vld [vmem:[%s6984_s30 + $0x350] ss:$8 sps:$4 sm:$0xff]  }
 0x246   : > { %4056 = vmatprep.subr.bf16.mxu0 %v5795_v50  ;;  %v5817_v1 = vld [vmem:[%s6984_s30 + $0x64] ss:$8 sps:$4 sm:$0xff]   ;;  %v5821_v3 = vld [vmem:[%s6984_s30 + $0x60] ss:$8 sps:$4 sm:$0xff]   ;;  %v5823_v4 = vld [vmem:[%s6984_s30 + $0x74] ss:$8 sps:$4 sm:$0xff]  }
 0x247   : > { %v5819_v2 = vld [vmem:[%s6984_s30 + $0x364] ss:$8 sps:$4 sm:$0xff]   ;;  %v5822_v8 = vld [vmem:[%s6984_s30 + $0x360] ss:$8 sps:$4 sm:$0xff]   ;;  %v5825_v5 = vld [vmem:[%s6984_s30 + $0x374] ss:$8 sps:$4 sm:$0xff]  }
 0x248   : > { %3934 = vmatpush1.bf16.msra.mxu1 %v5797_v51  ;;  %v5827_v7 = vld [vmem:[%s6984_s30 + $0x70] ss:$8 sps:$4 sm:$0xff]   ;;  %v5829_v12 = vld [vmem:[%s6984_s30 + $0x84] ss:$8 sps:$4 sm:$0xff]   ;;  %v5833_v14 = vld [vmem:[%s6984_s30 + $0x80] ss:$8 sps:$4 sm:$0xff]  }
 0x249   : > { %4057 = vmatpush1.bf16.msra.mxu0 %v5798_v52  ;;  %3935 = vmatprep.subr.bf16.mxu1 %v5799_v53  ;;  %v5828_v11 = vld [vmem:[%s6984_s30 + $0x370] ss:$8 sps:$4 sm:$0xff]   ;;  %v5831_v13 = vld [vmem:[%s6984_s30 + $0x384] ss:$8 sps:$4 sm:$0xff]   ;;  %v5834_v15 = vld [vmem:[%s6984_s30 + $0x380] ss:$8 sps:$4 sm:$0xff]  }
 0x24a   : > { %4058 = vmatprep.subr.bf16.mxu0 %v5801_v54  ;;  %v5835_v16 = vld [vmem:[%s6984_s30 + $0x94] ss:$8 sps:$4 sm:$0xff]   ;;  %v5839_v18 = vld [vmem:[%s6984_s30 + $0x90] ss:$8 sps:$4 sm:$0xff]   ;;  %v5841_v6 = vld [vmem:[%s6984_s30 + $0xa4] ss:$8 sps:$4 sm:$0xff]  }
 0x24b   : > { %v5837_v17 = vld [vmem:[%s6984_s30 + $0x394] ss:$8 sps:$4 sm:$0xff]   ;;  %v5840_v19 = vld [vmem:[%s6984_s30 + $0x390] ss:$8 sps:$4 sm:$0xff]   ;;  %v5843_v9 = vld [vmem:[%s6984_s30 + $0x3a4] ss:$8 sps:$4 sm:$0xff]  }
 0x24c   : > { %3936 = vmatpush1.bf16.msra.mxu1 %v5803_v55  ;;  %v5845_v10 = vld [vmem:[%s6984_s30 + $0xa0] ss:$8 sps:$4 sm:$0xff]   ;;  %v5847_v20 = vld [vmem:[%s6984_s30 + $0xb4] ss:$8 sps:$4 sm:$0xff]   ;;  %v5851_v23 = vld [vmem:[%s6984_s30 + $0xb0] ss:$8 sps:$4 sm:$0xff]  }
 0x24d   : > { %4059 = vmatpush1.bf16.msra.mxu0 %v5804_v56  ;;  %3937 = vmatprep.subr.bf16.mxu1 %v5805_v57  ;;  %v5846_v43 = vld [vmem:[%s6984_s30 + $0x3a0] ss:$8 sps:$4 sm:$0xff]   ;;  %v5849_v21 = vld [vmem:[%s6984_s30 + $0x3b4] ss:$8 sps:$4 sm:$0xff]   ;;  %v5852_v25 = vld [vmem:[%s6984_s30 + $0x3b0] ss:$8 sps:$4 sm:$0xff]  }
 0x24e   : > { %4060 = vmatprep.subr.bf16.mxu0 %v5807_v58  ;;  %v2317_v22 = vld [vmem:[#allocation2] sm:$0xff]  ;;  %v2320_v26 = vld [vmem:[#allocation2 + $0x18] sm:$0xff]  ;;  %p5628_p11 = scmp.ne.s32.totalorder %s6432_s12, 3 }
 0x24f   : > { %v5293_v24 = vcombine.high %v2317_v22, %v2317_v22  ;;  %v5853_v27 = vld [vmem:[%s6984_s30 + $0xc4] ss:$8 sps:$4 sm:$0xff]   ;;  %v5299_v29 = vcombine.high %v2320_v26, %v2320_v26  ;;  %v5857_v30 = vld [vmem:[%s6984_s30 + $0xc0] ss:$8 sps:$4 sm:$0xff]   ;;  %v5859_v32 = vld [vmem:[%s6984_s30 + $0xd4] ss:$8 sps:$4 sm:$0xff]   ;;  %v5292_v47 = vcombine.low %v2317_v22, %v2317_v22  ;;  %v5298_v48 = vcombine.low %v2320_v26, %v2320_v26 }
 0x250   : > { %3938 = vmatpush1.bf16.msra.mxu1 %v5809_v59  ;;  %v5855_v28 = vld [vmem:[%s6984_s30 + $0x3c4] ss:$8 sps:$4 sm:$0xff]   ;;  %v5858_v31 = vld [vmem:[%s6984_s30 + $0x3c0] ss:$8 sps:$4 sm:$0xff]   ;;  %v5861_v37 = vld [vmem:[%s6984_s30 + $0x3d4] ss:$8 sps:$4 sm:$0xff]  }
 0x251   : > { %4061 = vmatpush1.bf16.msra.mxu0 %v5810_v60  ;;  %3939 = vmatprep.subr.bf16.mxu1 %v5811_v61  ;;  %v5863_v38 = vld [vmem:[%s6984_s30 + $0xd0] ss:$8 sps:$4 sm:$0xff]   ;;  %v5865_v40 = vld [vmem:[%s6984_s30 + $0xe4] ss:$8 sps:$4 sm:$0xff]   ;;  %v5869_v33 = vld [vmem:[%s6984_s30 + $0xe0] ss:$8 sps:$4 sm:$0xff]  }
 0x252   : > { %4062 = vmatprep.subr.bf16.mxu0 %v5813_v62  ;;  %3961 = vmatprep.mubr.bf16.mxu1 %v5293_v24  ;;  %v5864_v39 = vld [vmem:[%s6984_s30 + $0x3d0] ss:$8 sps:$4 sm:$0xff]   ;;  %v5867_v41 = vld [vmem:[%s6984_s30 + $0x3e4] ss:$8 sps:$4 sm:$0xff]   ;;  %v5870_v34 = vld [vmem:[%s6984_s30 + $0x3e0] ss:$8 sps:$4 sm:$0xff]  }
 0x253   : > { %4084 = vmatprep.mubr.bf16.mxu0 %v5299_v29  ;;  %v5871_v35 = vld [vmem:[%s6984_s30 + $0xf4] ss:$8 sps:$4 sm:$0xff]   ;;  %v5875_v42 = vld [vmem:[%s6984_s30 + $0xf0] ss:$8 sps:$4 sm:$0xff]   ;;  %v5881_v45 = vld [vmem:[%s6984_s30 + $0x104] ss:$8 sps:$4 sm:$0xff]  }
 0x254   : > { %3940 = vmatpush1.bf16.msra.mxu1 %v5815_v63  ;;  %v5873_v36 = vld [vmem:[%s6984_s30 + $0x3f4] ss:$8 sps:$4 sm:$0xff]   ;;  %v5876_v44 = vld [vmem:[%s6984_s30 + $0x3f0] ss:$8 sps:$4 sm:$0xff]   ;;  %v5886_v46 = vld [vmem:[%s6984_s30 + $0x404] ss:$8 sps:$4 sm:$0xff]  }
 0x255   : > { %4063 = vmatpush1.bf16.msra.mxu0 %v5816_v0  ;;  %3941 = vmatprep.subr.bf16.mxu1 %v5817_v1  ;;  %v5879_v49 = vld [vmem:[%s6984_s30 + $0x100] ss:$8 sps:$4 sm:$0xff]   ;;  %v5889_v51 = vld [vmem:[%s6984_s30 + $0x114] ss:$8 sps:$4 sm:$0xff]   ;;  %v5887_v53 = vld [vmem:[%s6984_s30 + $0x110] ss:$8 sps:$4 sm:$0xff]  }
 0x256   : > { %4064 = vmatprep.subr.bf16.mxu0 %v5819_v2  ;;  %v5884_v50 = vld [vmem:[%s6984_s30 + $0x400] ss:$8 sps:$4 sm:$0xff]   ;;  %v5892_v52 = vld [vmem:[%s6984_s30 + $0x414] ss:$8 sps:$4 sm:$0xff]   ;;  %v5890_v54 = vld [vmem:[%s6984_s30 + $0x410] ss:$8 sps:$4 sm:$0xff]  }
 0x257   : > { %v5895_v55 = vld [vmem:[%s6984_s30 + $0x124] ss:$8 sps:$4 sm:$0xff]   ;;  %v5893_v57 = vld [vmem:[%s6984_s30 + $0x120] ss:$8 sps:$4 sm:$0xff]   ;;  %v5901_v59 = vld [vmem:[%s6984_s30 + $0x134] ss:$8 sps:$4 sm:$0xff]  }
 0x258   : > { %3942 = vmatpush1.bf16.msra.mxu1 %v5821_v3  ;;  %v5898_v56 = vld [vmem:[%s6984_s30 + $0x424] ss:$8 sps:$4 sm:$0xff]   ;;  %v5896_v58 = vld [vmem:[%s6984_s30 + $0x420] ss:$8 sps:$4 sm:$0xff]   ;;  %v5904_v60 = vld [vmem:[%s6984_s30 + $0x434] ss:$8 sps:$4 sm:$0xff]  }
 0x259   : > { %4065 = vmatpush1.bf16.msra.mxu0 %v5822_v8  ;;  %3943 = vmatprep.subr.bf16.mxu1 %v5823_v4  ;;  %v5899_v61 = vld [vmem:[%s6984_s30 + $0x130] ss:$8 sps:$4 sm:$0xff]   ;;  %v5907_v63 = vld [vmem:[%s6984_s30 + $0x144] ss:$8 sps:$4 sm:$0xff]   ;;  %v5905_v1 = vld [vmem:[%s6984_s30 + $0x140] ss:$8 sps:$4 sm:$0xff]  }
 0x25a   : > { %4066 = vmatprep.subr.bf16.mxu0 %v5825_v5  ;;  %v5902_v62 = vld [vmem:[%s6984_s30 + $0x430] ss:$8 sps:$4 sm:$0xff]   ;;  %v5910_v0 = vld [vmem:[%s6984_s30 + $0x444] ss:$8 sps:$4 sm:$0xff]   ;;  %v5908_v2 = vld [vmem:[%s6984_s30 + $0x440] ss:$8 sps:$4 sm:$0xff]  }
 0x25b   : > { %v5913_v3 = vld [vmem:[%s6984_s30 + $0x154] ss:$8 sps:$4 sm:$0xff]   ;;  %v5911_v4 = vld [vmem:[%s6984_s30 + $0x150] ss:$8 sps:$4 sm:$0xff]   ;;  %v5943_v26 = vld [vmem:[%s6984_s30 + $0x1a4] ss:$8 sps:$4 sm:$0xff]  }
 0x25c   : > { %3944 = vmatpush1.bf16.msra.mxu1 %v5827_v7  ;;  %v5916_v8 = vld [vmem:[%s6984_s30 + $0x454] ss:$8 sps:$4 sm:$0xff]   ;;  %v5914_v5 = vld [vmem:[%s6984_s30 + $0x450] ss:$8 sps:$4 sm:$0xff]   ;;  %v5919_v7 = vld [vmem:[%s6984_s30 + $0x164] ss:$8 sps:$4 sm:$0xff]  }
 0x25d   : > { %4067 = vmatpush1.bf16.msra.mxu0 %v5828_v11  ;;  %3945 = vmatprep.subr.bf16.mxu1 %v5829_v12  ;;  %v5922_v11 = vld [vmem:[%s6984_s30 + $0x464] ss:$8 sps:$4 sm:$0xff]   ;;  %v5937_v22 = vld [vmem:[%s6984_s30 + $0x194] ss:$8 sps:$4 sm:$0xff]   ;;  %v5935_v24 = vld [vmem:[%s6984_s30 + $0x190] ss:$8 sps:$4 sm:$0xff]  }
 0x25e   : > { %4068 = vmatprep.subr.bf16.mxu0 %v5831_v13  ;;  %v7314_v12 = vld [vmem:[#allocation2 + $0x8] sm:$0xff]  ;;  %vm5124_vm1 = vcmask (!%p5628_p11), 80896  }
 0x25f   : > { %v5917_v13 = vld [vmem:[%s6984_s30 + $0x160] ss:$8 sps:$4 sm:$0xff]  }
 0x260   : > { %3946 = vmatpush1.bf16.msra.mxu1 %v5833_v14  ;;  %v5920_v14 = vld [vmem:[%s6984_s30 + $0x460] ss:$8 sps:$4 sm:$0xff]  }
 0x261   : > { %4069 = vmatpush1.bf16.msra.mxu0 %v5834_v15  ;;  %3947 = vmatprep.subr.bf16.mxu1 %v5835_v16  ;;  %v5295_v15 = vcombine.high %v7314_v12, %v7314_v12  ;;  %v7320_v16 = vld [vmem:[#allocation2 + $0x20] sm:$0xff] }
 0x262   : > { %4070 = vmatprep.subr.bf16.mxu0 %v5837_v17  ;;  %v5925_v17 = vld [vmem:[%s6984_s30 + $0x174] ss:$8 sps:$4 sm:$0xff]   ;;  %v5944_v29 = vld [vmem:[%s6984_s30 + $0x4a0] ss:$8 sps:$4 sm:$0xff]  }
 0x264   : > { %3948 = vmatpush1.bf16.msra.mxu1 %v5839_v18  ;;  %v5301_v18 = vcombine.high %v7320_v16, %v7320_v16 }
 0x265   : > { %4071 = vmatpush1.bf16.msra.mxu0 %v5840_v19  ;;  %3949 = vmatprep.subr.bf16.mxu1 %v5841_v6  ;;  %v5928_v19 = vld [vmem:[%s6984_s30 + $0x474] ss:$8 sps:$4 sm:$0xff]   ;;  %v5923_v6 = vld [vmem:[%s6984_s30 + $0x170] ss:$8 sps:$4 sm:$0xff]  }
 0x266   : > { %4072 = vmatprep.subr.bf16.mxu0 %v5843_v9  ;;  %v5926_v9 = vld [vmem:[%s6984_s30 + $0x470] ss:$8 sps:$4 sm:$0xff]  }
 0x268   : > { %3950 = vmatpush1.bf16.msra.mxu1 %v5845_v10  ;;  %v5931_v10 = vld [vmem:[%s6984_s30 + $0x184] ss:$8 sps:$4 sm:$0xff]  }
 0x269   : > { %4073 = vmatpush1.bf16.msra.mxu0 %v5846_v43  ;;  %3951 = vmatprep.subr.bf16.mxu1 %v5847_v20  ;;  %v5934_v43 = vld [vmem:[%s6984_s30 + $0x484] ss:$8 sps:$4 sm:$0xff]   ;;  %v5929_v20 = vld [vmem:[%s6984_s30 + $0x180] ss:$8 sps:$4 sm:$0xff]  }
 0x26a   : > { %4074 = vmatprep.subr.bf16.mxu0 %v5849_v21  ;;  %v5932_v21 = vld [vmem:[%s6984_s30 + $0x480] ss:$8 sps:$4 sm:$0xff]  }
 0x26c   : > { %3952 = vmatpush1.bf16.msra.mxu1 %v5851_v23  ;;  %v5940_v23 = vld [vmem:[%s6984_s30 + $0x494] ss:$8 sps:$4 sm:$0xff]  }
 0x26d   : > { %4075 = vmatpush1.bf16.msra.mxu0 %v5852_v25  ;;  %3953 = vmatprep.subr.bf16.mxu1 %v5853_v27  ;;  %v5938_v25 = vld [vmem:[%s6984_s30 + $0x490] ss:$8 sps:$4 sm:$0xff]   ;;  %v5946_v27 = vld [vmem:[%s6984_s30 + $0x4a4] ss:$8 sps:$4 sm:$0xff]  }
 0x26e   : > { %4076 = vmatprep.subr.bf16.mxu0 %v5855_v28  ;;  %v5941_v28 = vld [vmem:[%s6984_s30 + $0x1a0] ss:$8 sps:$4 sm:$0xff]  }
 0x270   : > { %3954 = vmatpush1.bf16.msra.mxu1 %v5857_v30  ;;  %v5949_v30 = vld [vmem:[%s6984_s30 + $0x1b4] ss:$8 sps:$4 sm:$0xff]  }
 0x271   : > { %4077 = vmatpush1.bf16.msra.mxu0 %v5858_v31  ;;  %3955 = vmatprep.subr.bf16.mxu1 %v5859_v32  ;;  %v5952_v31 = vld [vmem:[%s6984_s30 + $0x4b4] ss:$8 sps:$4 sm:$0xff]   ;;  %v5947_v32 = vld [vmem:[%s6984_s30 + $0x1b0] ss:$8 sps:$4 sm:$0xff]  }
 0x272   : > { %4078 = vmatprep.subr.bf16.mxu0 %v5861_v37  ;;  %v5950_v37 = vld [vmem:[%s6984_s30 + $0x4b0] ss:$8 sps:$4 sm:$0xff]  }
 0x274   : > { %3956 = vmatpush1.bf16.msra.mxu1 %v5863_v38  ;;  %v5955_v38 = vld [vmem:[%s6984_s30 + $0x1c4] ss:$8 sps:$4 sm:$0xff]  }
 0x275   : > { %4079 = vmatpush1.bf16.msra.mxu0 %v5864_v39  ;;  %3957 = vmatprep.subr.bf16.mxu1 %v5865_v40  ;;  %v5958_v39 = vld [vmem:[%s6984_s30 + $0x4c4] ss:$8 sps:$4 sm:$0xff]   ;;  %v5953_v40 = vld [vmem:[%s6984_s30 + $0x1c0] ss:$8 sps:$4 sm:$0xff]  }
 0x276   : > { %4080 = vmatprep.subr.bf16.mxu0 %v5867_v41  ;;  %v5956_v41 = vld [vmem:[%s6984_s30 + $0x4c0] ss:$8 sps:$4 sm:$0xff]  }
 0x278   : > { %3958 = vmatpush1.bf16.msra.mxu1 %v5869_v33  ;;  %v5961_v33 = vld [vmem:[%s6984_s30 + $0x1d4] ss:$8 sps:$4 sm:$0xff]  }
 0x279   : > { %4081 = vmatpush1.bf16.msra.mxu0 %v5870_v34  ;;  %3959 = vmatprep.subr.bf16.mxu1 %v5871_v35  ;;  %v5964_v34 = vld [vmem:[%s6984_s30 + $0x4d4] ss:$8 sps:$4 sm:$0xff]   ;;  %v5959_v35 = vld [vmem:[%s6984_s30 + $0x1d0] ss:$8 sps:$4 sm:$0xff]  }
 0x27a   : > { %4082 = vmatprep.subr.bf16.mxu0 %v5873_v36  ;;  %v5962_v36 = vld [vmem:[%s6984_s30 + $0x4d0] ss:$8 sps:$4 sm:$0xff]  }
 0x27c   : > { %3960 = vmatpush1.bf16.msra.mxu1 %v5875_v42  ;;  %v5967_v42 = vld [vmem:[%s6984_s30 + $0x1e4] ss:$8 sps:$4 sm:$0xff]  }
 0x27d   : > { %4083 = vmatpush1.bf16.msra.mxu0 %v5876_v44  ;;  %3970 = vmatprep.subr.bf16.mxu1 %v5881_v45  ;;  %v5970_v44 = vld [vmem:[%s6984_s30 + $0x4e4] ss:$8 sps:$4 sm:$0xff]   ;;  %v5965_v45 = vld [vmem:[%s6984_s30 + $0x1e0] ss:$8 sps:$4 sm:$0xff]  }
 0x27e   : > { %4093 = vmatprep.subr.bf16.mxu0 %v5886_v46  ;;  %v5968_v46 = vld [vmem:[%s6984_s30 + $0x4e0] ss:$8 sps:$4 sm:$0xff]  }
 0x27f   : > { %3962 = vmatmul.mubr.bf16.vlgmr.msra.gmra.mrb[0].mxu1 %v5292_v47  ;;  %v5973_v47 = vld [vmem:[%s6984_s30 + $0x1f4] ss:$8 sps:$4 sm:$0xff]  }
 0x280   : > { %4085 = vmatmul.mubr.bf16.vlgmr.msra.gmra.mrb[0].mxu0 %v5298_v48  ;;  %3971 = vmatpush1.bf16.msra.mxu1 %v5879_v49  ;;  %v5976_v48 = vld [vmem:[%s6984_s30 + $0x4f4] ss:$8 sps:$4 sm:$0xff]   ;;  %v5971_v49 = vld [vmem:[%s6984_s30 + $0x1f0] ss:$8 sps:$4 sm:$0xff]  }
 0x281   : > { %4094 = vmatpush1.bf16.msra.mxu0 %v5884_v50  ;;  %3972 = vmatprep.subr.bf16.mxu1 %v5889_v51  ;;  %v5974_v50 = vld [vmem:[%s6984_s30 + $0x4f0] ss:$8 sps:$4 sm:$0xff]   ;;  %v5981_v51 = vld [vmem:[%s6984_s30 + $0x204] ss:$8 sps:$4 sm:$0xff]  }
 0x282   : > { %4095 = vmatprep.subr.bf16.mxu0 %v5892_v52  ;;  %4002 = vmatprep.mubr.bf16.mxu1 %v5295_v15  ;;  %v5986_v52 = vld [vmem:[%s6984_s30 + $0x504] ss:$8 sps:$4 sm:$0xff]   ;;  %v6008_v15 = vld [vmem:[%s6984_s30 + $0x540] ss:$8 sps:$4 sm:$0xff]  }
 0x283   : > { %4125 = vmatprep.mubr.bf16.mxu0 %v5301_v18  ;;  %v6011_v18 = vld [vmem:[%s6984_s30 + $0x250] ss:$8 sps:$4 sm:$0xff]  }
 0x284   : > { %3973 = vmatpush1.bf16.msra.mxu1 %v5887_v53  ;;  %v5294_v53 = vcombine.low %v7314_v12, %v7314_v12  ;;  %v6007_v12 = vld [vmem:[%s6984_s30 + $0x244] ss:$8 sps:$4 sm:$0xff]  }
 0x285   : > { %4096 = vmatpush1.bf16.msra.mxu0 %v5890_v54  ;;  %3974 = vmatprep.subr.bf16.mxu1 %v5895_v55  ;;  %v5979_v54 = vld [vmem:[%s6984_s30 + $0x200] ss:$8 sps:$4 sm:$0xff]   ;;  %v5300_v55 = vcombine.low %v7320_v16, %v7320_v16  ;;  %v6013_v16 = vld [vmem:[%s6984_s30 + $0x254] ss:$8 sps:$4 sm:$0xff]  }
 0x286   : > { %4097 = vmatprep.subr.bf16.mxu0 %v5898_v56  ;;  %v5984_v56 = vld [vmem:[%s6984_s30 + $0x500] ss:$8 sps:$4 sm:$0xff]  }
 0x288   : > { %3975 = vmatpush1.bf16.msra.mxu1 %v5893_v57  ;;  %v5989_v57 = vld [vmem:[%s6984_s30 + $0x214] ss:$8 sps:$4 sm:$0xff]  }
 0x289   : > { %4098 = vmatpush1.bf16.msra.mxu0 %v5896_v58  ;;  %3976 = vmatprep.subr.bf16.mxu1 %v5901_v59  ;;  %v5992_v58 = vld [vmem:[%s6984_s30 + $0x514] ss:$8 sps:$4 sm:$0xff]  }
 0x28a   : > { %4099 = vmatprep.subr.bf16.mxu0 %v5904_v60  ;;  %v7370_v59 = vld [vmem:[#allocation2 + $0x10] sm:$0xff]  ;;  %v7372_v60 = vld [vmem:[#allocation2 + $0x28] sm:$0xff] }
 0x28c   : > { %3977 = vmatpush1.bf16.msra.mxu1 %v5899_v61  ;;  %v5297_v61 = vcombine.high %v7370_v59, %v7370_v59 }
 0x28d   : > { %4100 = vmatpush1.bf16.msra.mxu0 %v5902_v62  ;;  %3978 = vmatprep.subr.bf16.mxu1 %v5907_v63  ;;  %v5303_v62 = vcombine.high %v7372_v60, %v7372_v60  ;;  %v5987_v63 = vld [vmem:[%s6984_s30 + $0x210] ss:$8 sps:$4 sm:$0xff]  }
 0x28e   : > { %4101 = vmatprep.subr.bf16.mxu0 %v5910_v0  ;;  %v5990_v0 = vld [vmem:[%s6984_s30 + $0x510] ss:$8 sps:$4 sm:$0xff]  }
 0x290   : > { %3979 = vmatpush1.bf16.msra.mxu1 %v5905_v1  ;;  %v5995_v1 = vld [vmem:[%s6984_s30 + $0x224] ss:$8 sps:$4 sm:$0xff]  }
 0x291   : > { %4102 = vmatpush1.bf16.msra.mxu0 %v5908_v2  ;;  %3980 = vmatprep.subr.bf16.mxu1 %v5913_v3  ;;  %v5998_v2 = vld [vmem:[%s6984_s30 + $0x524] ss:$8 sps:$4 sm:$0xff]   ;;  %v5993_v3 = vld [vmem:[%s6984_s30 + $0x220] ss:$8 sps:$4 sm:$0xff]  }
 0x292   : > { %4103 = vmatprep.subr.bf16.mxu0 %v5916_v8  ;;  %v5996_v8 = vld [vmem:[%s6984_s30 + $0x520] ss:$8 sps:$4 sm:$0xff]  }
 0x294   : > { %3981 = vmatpush1.bf16.msra.mxu1 %v5911_v4  ;;  %v6001_v4 = vld [vmem:[%s6984_s30 + $0x234] ss:$8 sps:$4 sm:$0xff]  }
 0x295   : > { %4104 = vmatpush1.bf16.msra.mxu0 %v5914_v5  ;;  %3982 = vmatprep.subr.bf16.mxu1 %v5919_v7  ;;  %v6004_v5 = vld [vmem:[%s6984_s30 + $0x534] ss:$8 sps:$4 sm:$0xff]   ;;  %v5999_v7 = vld [vmem:[%s6984_s30 + $0x230] ss:$8 sps:$4 sm:$0xff]  }
 0x296   : > { %4105 = vmatprep.subr.bf16.mxu0 %v5922_v11  ;;  %v6002_v11 = vld [vmem:[%s6984_s30 + $0x530] ss:$8 sps:$4 sm:$0xff]  }
 0x298   : > { %3983 = vmatpush1.bf16.msra.mxu1 %v5917_v13  ;;  %v6010_v13 = vld [vmem:[%s6984_s30 + $0x544] ss:$8 sps:$4 sm:$0xff]  }
 0x299   : > { %4106 = vmatpush1.bf16.msra.mxu0 %v5920_v14  ;;  %3984 = vmatprep.subr.bf16.mxu1 %v5925_v17  ;;  %v6005_v14 = vld [vmem:[%s6984_s30 + $0x240] ss:$8 sps:$4 sm:$0xff]   ;;  %v6016_v17 = vld [vmem:[%s6984_s30 + $0x554] ss:$8 sps:$4 sm:$0xff]  }
 0x29a   : > { %4107 = vmatprep.subr.bf16.mxu0 %v5928_v19  ;;  %v6014_v19 = vld [vmem:[%s6984_s30 + $0x550] ss:$8 sps:$4 sm:$0xff]  }
 0x29c   : > { %3985 = vmatpush1.bf16.msra.mxu1 %v5923_v6  ;;  %v6019_v6 = vld [vmem:[%s6984_s30 + $0x264] ss:$8 sps:$4 sm:$0xff]  }
 0x29d   : > { %4108 = vmatpush1.bf16.msra.mxu0 %v5926_v9  ;;  %3986 = vmatprep.subr.bf16.mxu1 %v5931_v10  ;;  %v6022_v9 = vld [vmem:[%s6984_s30 + $0x564] ss:$8 sps:$4 sm:$0xff]   ;;  %v6017_v10 = vld [vmem:[%s6984_s30 + $0x260] ss:$8 sps:$4 sm:$0xff]  }
 0x29e   : > { %4109 = vmatprep.subr.bf16.mxu0 %v5934_v43  ;;  %v6020_v43 = vld [vmem:[%s6984_s30 + $0x560] ss:$8 sps:$4 sm:$0xff]  }
 0x2a0   : > { %3987 = vmatpush1.bf16.msra.mxu1 %v5929_v20  ;;  %v6025_v20 = vld [vmem:[%s6984_s30 + $0x274] ss:$8 sps:$4 sm:$0xff]  }
 0x2a1   : > { %4110 = vmatpush1.bf16.msra.mxu0 %v5932_v21  ;;  %3988 = vmatprep.subr.bf16.mxu1 %v5937_v22  ;;  %v6028_v21 = vld [vmem:[%s6984_s30 + $0x574] ss:$8 sps:$4 sm:$0xff]   ;;  %v6023_v22 = vld [vmem:[%s6984_s30 + $0x270] ss:$8 sps:$4 sm:$0xff]  }
 0x2a2   : > { %4111 = vmatprep.subr.bf16.mxu0 %v5940_v23  ;;  %v6026_v23 = vld [vmem:[%s6984_s30 + $0x570] ss:$8 sps:$4 sm:$0xff]  }
 0x2a4   : > { %3989 = vmatpush1.bf16.msra.mxu1 %v5935_v24  ;;  %v6031_v24 = vld [vmem:[%s6984_s30 + $0x284] ss:$8 sps:$4 sm:$0xff]  }
 0x2a5   : > { %4112 = vmatpush1.bf16.msra.mxu0 %v5938_v25  ;;  %3990 = vmatprep.subr.bf16.mxu1 %v5943_v26  ;;  %v6034_v25 = vld [vmem:[%s6984_s30 + $0x584] ss:$8 sps:$4 sm:$0xff]   ;;  %v6029_v26 = vld [vmem:[%s6984_s30 + $0x280] ss:$8 sps:$4 sm:$0xff]  }
 0x2a6   : > { %4113 = vmatprep.subr.bf16.mxu0 %v5946_v27  ;;  %v6032_v27 = vld [vmem:[%s6984_s30 + $0x580] ss:$8 sps:$4 sm:$0xff]  }
 0x2a8   : > { %3991 = vmatpush1.bf16.msra.mxu1 %v5941_v28  ;;  %v6037_v28 = vld [vmem:[%s6984_s30 + $0x294] ss:$8 sps:$4 sm:$0xff]  }
 0x2a9   : > { %4114 = vmatpush1.bf16.msra.mxu0 %v5944_v29  ;;  %3992 = vmatprep.subr.bf16.mxu1 %v5949_v30  ;;  %v6040_v29 = vld [vmem:[%s6984_s30 + $0x594] ss:$8 sps:$4 sm:$0xff]   ;;  %v6035_v30 = vld [vmem:[%s6984_s30 + $0x290] ss:$8 sps:$4 sm:$0xff]  }
 0x2aa   : > { %4115 = vmatprep.subr.bf16.mxu0 %v5952_v31  ;;  %v6038_v31 = vld [vmem:[%s6984_s30 + $0x590] ss:$8 sps:$4 sm:$0xff]  }
 0x2ac   : > { %3993 = vmatpush1.bf16.msra.mxu1 %v5947_v32  ;;  %v6043_v32 = vld [vmem:[%s6984_s30 + $0x2a4] ss:$8 sps:$4 sm:$0xff]  }
 0x2ad   : > { %4116 = vmatpush1.bf16.msra.mxu0 %v5950_v37  ;;  %3994 = vmatprep.subr.bf16.mxu1 %v5955_v38  ;;  %v6046_v37 = vld [vmem:[%s6984_s30 + $0x5a4] ss:$8 sps:$4 sm:$0xff]   ;;  %v6041_v38 = vld [vmem:[%s6984_s30 + $0x2a0] ss:$8 sps:$4 sm:$0xff]  }
 0x2ae   : > { %4117 = vmatprep.subr.bf16.mxu0 %v5958_v39  ;;  %v6044_v39 = vld [vmem:[%s6984_s30 + $0x5a0] ss:$8 sps:$4 sm:$0xff]  }
 0x2b0   : > { %3995 = vmatpush1.bf16.msra.mxu1 %v5953_v40  ;;  %v6049_v40 = vld [vmem:[%s6984_s30 + $0x2b4] ss:$8 sps:$4 sm:$0xff]  }
 0x2b1   : > { %4118 = vmatpush1.bf16.msra.mxu0 %v5956_v41  ;;  %3996 = vmatprep.subr.bf16.mxu1 %v5961_v33  ;;  %v6052_v41 = vld [vmem:[%s6984_s30 + $0x5b4] ss:$8 sps:$4 sm:$0xff]   ;;  %v6047_v33 = vld [vmem:[%s6984_s30 + $0x2b0] ss:$8 sps:$4 sm:$0xff]  }
 0x2b2   : > { %4119 = vmatprep.subr.bf16.mxu0 %v5964_v34  ;;  %v6050_v34 = vld [vmem:[%s6984_s30 + $0x5b0] ss:$8 sps:$4 sm:$0xff]  }
 0x2b4   : > { %3997 = vmatpush1.bf16.msra.mxu1 %v5959_v35  ;;  %v6055_v35 = vld [vmem:[%s6984_s30 + $0x2c4] ss:$8 sps:$4 sm:$0xff]  }
 0x2b5   : > { %4120 = vmatpush1.bf16.msra.mxu0 %v5962_v36  ;;  %3998 = vmatprep.subr.bf16.mxu1 %v5967_v42  ;;  %v6058_v36 = vld [vmem:[%s6984_s30 + $0x5c4] ss:$8 sps:$4 sm:$0xff]   ;;  %v6053_v42 = vld [vmem:[%s6984_s30 + $0x2c0] ss:$8 sps:$4 sm:$0xff]  }
 0x2b6   : > { %4121 = vmatprep.subr.bf16.mxu0 %v5970_v44  ;;  %v6056_v44 = vld [vmem:[%s6984_s30 + $0x5c0] ss:$8 sps:$4 sm:$0xff]  }
 0x2b8   : > { %3999 = vmatpush1.bf16.msra.mxu1 %v5965_v45  ;;  %v6061_v45 = vld [vmem:[%s6984_s30 + $0x2d4] ss:$8 sps:$4 sm:$0xff]  }
 0x2b9   : > { %4122 = vmatpush1.bf16.msra.mxu0 %v5968_v46  ;;  %4000 = vmatprep.subr.bf16.mxu1 %v5973_v47  ;;  %v6064_v46 = vld [vmem:[%s6984_s30 + $0x5d4] ss:$8 sps:$4 sm:$0xff]   ;;  %v6059_v47 = vld [vmem:[%s6984_s30 + $0x2d0] ss:$8 sps:$4 sm:$0xff]  }
 0x2ba   : > { %4123 = vmatprep.subr.bf16.mxu0 %v5976_v48  ;;  %v6062_v48 = vld [vmem:[%s6984_s30 + $0x5d0] ss:$8 sps:$4 sm:$0xff]  }
 0x2bc   : > { %4001 = vmatpush1.bf16.msra.mxu1 %v5971_v49  ;;  %v6067_v49 = vld [vmem:[%s6984_s30 + $0x2e4] ss:$8 sps:$4 sm:$0xff]  }
 0x2bd   : > { %4124 = vmatpush1.bf16.msra.mxu0 %v5974_v50  ;;  %4011 = vmatprep.subr.bf16.mxu1 %v5981_v51  ;;  %v6070_v50 = vld [vmem:[%s6984_s30 + $0x5e4] ss:$8 sps:$4 sm:$0xff]   ;;  %v6065_v51 = vld [vmem:[%s6984_s30 + $0x2e0] ss:$8 sps:$4 sm:$0xff]  }
 0x2be   : > { %4134 = vmatprep.subr.bf16.mxu0 %v5986_v52  ;;  %v6068_v52 = vld [vmem:[%s6984_s30 + $0x5e0] ss:$8 sps:$4 sm:$0xff]  }
 0x2bf   : > { %4003 = vmatmul.mubr.bf16.vlgmr.msra.gmra.mrb[0].mxu1 %v5294_v53  ;;  %v6073_v53 = vld [vmem:[%s6984_s30 + $0x2f4] ss:$8 sps:$4 sm:$0xff]  }
 0x2c0   : > { %4126 = vmatmul.mubr.bf16.vlgmr.msra.gmra.mrb[0].mxu0 %v5300_v55  ;;  %4012 = vmatpush1.bf16.msra.mxu1 %v5979_v54  ;;  %v6076_v54 = vld [vmem:[%s6984_s30 + $0x5f4] ss:$8 sps:$4 sm:$0xff]   ;;  %v6071_v55 = vld [vmem:[%s6984_s30 + $0x2f0] ss:$8 sps:$4 sm:$0xff]  }
 0x2c1   : > { %4135 = vmatpush1.bf16.msra.mxu0 %v5984_v56  ;;  %4013 = vmatprep.subr.bf16.mxu1 %v5989_v57  ;;  %v6074_v56 = vld [vmem:[%s6984_s30 + $0x5f0] ss:$8 sps:$4 sm:$0xff]   ;;  %v6083_v57 = vld [vmem:[%s6984_s30 + $0x604] ss:$8 sps:$4 sm:$0xff]  }
 0x2c2   : > { %4136 = vmatprep.subr.bf16.mxu0 %v5992_v58  ;;  %4043 = vmatprep.mubr.bf16.mxu1 %v5297_v61  ;;  %v7437_v58 = vld [vmem:[#allocation2 + $0x30] sm:$0xff]  ;;  %v6081_v61 = vld [vmem:[%s6984_s30 + $0x600] ss:$8 sps:$4 sm:$0xff]  }
 0x2c3   : > { %4166 = vmatprep.mubr.bf16.mxu0 %v5303_v62  ;;  %v5296_v62 = vcombine.low %v7370_v59, %v7370_v59  ;;  %v6089_v59 = vld [vmem:[%s6984_s30 + $0x624] ss:$8 sps:$4 sm:$0xff]  }
 0x2c4   : > { %4014 = vmatpush1.bf16.msra.mxu1 %v5987_v63  ;;  %v5302_v63 = vcombine.low %v7372_v60, %v7372_v60  ;;  %v6087_v60 = vld [vmem:[%s6984_s30 + $0x620] ss:$8 sps:$4 sm:$0xff]  }
 0x2c5   : > { %4137 = vmatpush1.bf16.msra.mxu0 %v5990_v0  ;;  %4015 = vmatprep.subr.bf16.mxu1 %v5995_v1  ;;  %v6086_v0 = vld [vmem:[%s6984_s30 + $0x614] ss:$8 sps:$4 sm:$0xff]   ;;  %v5305_v1 = vcombine.high %v7437_v58, %v7437_v58 }
 0x2c6   : > { %4138 = vmatprep.subr.bf16.mxu0 %v5998_v2  ;;  %v6084_v2 = vld [vmem:[%s6984_s30 + $0x610] ss:$8 sps:$4 sm:$0xff]  }
 0x2c8   : > { %4016 = vmatpush1.bf16.msra.mxu1 %v5993_v3  ;;  %v6092_v3 = vld [vmem:[%s6984_s30 + $0x634] ss:$8 sps:$4 sm:$0xff]  }
 0x2c9   : > { %4139 = vmatpush1.bf16.msra.mxu0 %v5996_v8  ;;  %4017 = vmatprep.subr.bf16.mxu1 %v6001_v4  ;;  %v6090_v8 = vld [vmem:[%s6984_s30 + $0x630] ss:$8 sps:$4 sm:$0xff]   ;;  %v6095_v4 = vld [vmem:[%s6984_s30 + $0x644] ss:$8 sps:$4 sm:$0xff]  }
 0x2ca   : > { %4140 = vmatprep.subr.bf16.mxu0 %v6004_v5  ;;  %v6093_v5 = vld [vmem:[%s6984_s30 + $0x640] ss:$8 sps:$4 sm:$0xff]  }
 0x2cc   : > { %4018 = vmatpush1.bf16.msra.mxu1 %v5999_v7  ;;  %v6098_v7 = vld [vmem:[%s6984_s30 + $0x654] ss:$8 sps:$4 sm:$0xff]  }
 0x2cd   : > { %4141 = vmatpush1.bf16.msra.mxu0 %v6002_v11  ;;  %4019 = vmatprep.subr.bf16.mxu1 %v6007_v12  ;;  %v6096_v11 = vld [vmem:[%s6984_s30 + $0x650] ss:$8 sps:$4 sm:$0xff]   ;;  %v6101_v12 = vld [vmem:[%s6984_s30 + $0x664] ss:$8 sps:$4 sm:$0xff]  }
 0x2ce   : > { %4142 = vmatprep.subr.bf16.mxu0 %v6010_v13  ;;  %v6099_v13 = vld [vmem:[%s6984_s30 + $0x660] ss:$8 sps:$4 sm:$0xff]  }
 0x2d0   : > { %4020 = vmatpush1.bf16.msra.mxu1 %v6005_v14  ;;  %v6104_v14 = vld [vmem:[%s6984_s30 + $0x674] ss:$8 sps:$4 sm:$0xff]  }
 0x2d1   : > { %4143 = vmatpush1.bf16.msra.mxu0 %v6008_v15  ;;  %4021 = vmatprep.subr.bf16.mxu1 %v6013_v16  ;;  %v6102_v15 = vld [vmem:[%s6984_s30 + $0x670] ss:$8 sps:$4 sm:$0xff]   ;;  %v6107_v16 = vld [vmem:[%s6984_s30 + $0x684] ss:$8 sps:$4 sm:$0xff]  }
 0x2d2   : > { %4144 = vmatprep.subr.bf16.mxu0 %v6016_v17  ;;  %v6105_v17 = vld [vmem:[%s6984_s30 + $0x680] ss:$8 sps:$4 sm:$0xff]  }
 0x2d4   : > { %4022 = vmatpush1.bf16.msra.mxu1 %v6011_v18  ;;  %v6110_v18 = vld [vmem:[%s6984_s30 + $0x694] ss:$8 sps:$4 sm:$0xff]  }
 0x2d5   : > { %4145 = vmatpush1.bf16.msra.mxu0 %v6014_v19  ;;  %4023 = vmatprep.subr.bf16.mxu1 %v6019_v6  ;;  %v6108_v19 = vld [vmem:[%s6984_s30 + $0x690] ss:$8 sps:$4 sm:$0xff]   ;;  %v6113_v6 = vld [vmem:[%s6984_s30 + $0x6a4] ss:$8 sps:$4 sm:$0xff]  }
 0x2d6   : > { %4146 = vmatprep.subr.bf16.mxu0 %v6022_v9  ;;  %v6111_v9 = vld [vmem:[%s6984_s30 + $0x6a0] ss:$8 sps:$4 sm:$0xff]  }
 0x2d8   : > { %4024 = vmatpush1.bf16.msra.mxu1 %v6017_v10  ;;  %v6116_v10 = vld [vmem:[%s6984_s30 + $0x6b4] ss:$8 sps:$4 sm:$0xff]  }
 0x2d9   : > { %4147 = vmatpush1.bf16.msra.mxu0 %v6020_v43  ;;  %4025 = vmatprep.subr.bf16.mxu1 %v6025_v20  ;;  %v6114_v43 = vld [vmem:[%s6984_s30 + $0x6b0] ss:$8 sps:$4 sm:$0xff]   ;;  %v6119_v20 = vld [vmem:[%s6984_s30 + $0x6c4] ss:$8 sps:$4 sm:$0xff]  }
 0x2da   : > { %4148 = vmatprep.subr.bf16.mxu0 %v6028_v21  ;;  %v6117_v21 = vld [vmem:[%s6984_s30 + $0x6c0] ss:$8 sps:$4 sm:$0xff]  }
 0x2dc   : > { %4026 = vmatpush1.bf16.msra.mxu1 %v6023_v22  ;;  %v6122_v22 = vld [vmem:[%s6984_s30 + $0x6d4] ss:$8 sps:$4 sm:$0xff]  }
 0x2dd   : > { %4149 = vmatpush1.bf16.msra.mxu0 %v6026_v23  ;;  %4027 = vmatprep.subr.bf16.mxu1 %v6031_v24  ;;  %v6120_v23 = vld [vmem:[%s6984_s30 + $0x6d0] ss:$8 sps:$4 sm:$0xff]   ;;  %v6125_v24 = vld [vmem:[%s6984_s30 + $0x6e4] ss:$8 sps:$4 sm:$0xff]  }
 0x2de   : > { %4150 = vmatprep.subr.bf16.mxu0 %v6034_v25  ;;  %v6123_v25 = vld [vmem:[%s6984_s30 + $0x6e0] ss:$8 sps:$4 sm:$0xff]  }
 0x2e0   : > { %4028 = vmatpush1.bf16.msra.mxu1 %v6029_v26  ;;  %v6128_v26 = vld [vmem:[%s6984_s30 + $0x6f4] ss:$8 sps:$4 sm:$0xff]  }
 0x2e1   : > { %4151 = vmatpush1.bf16.msra.mxu0 %v6032_v27  ;;  %4029 = vmatprep.subr.bf16.mxu1 %v6037_v28  ;;  %v6126_v27 = vld [vmem:[%s6984_s30 + $0x6f0] ss:$8 sps:$4 sm:$0xff]   ;;  %v6133_v28 = vld [vmem:[%s6984_s30 + $0x704] ss:$8 sps:$4 sm:$0xff]  }
 0x2e2   : > { %4152 = vmatprep.subr.bf16.mxu0 %v6040_v29  ;;  %v7477_v29 = vld [vmem:[#allocation2 + $0x38] sm:$0xff] }
 0x2e4   : > { %4030 = vmatpush1.bf16.msra.mxu1 %v6035_v30  ;;  %v5304_v30 = vcombine.low %v7437_v58, %v7437_v58  ;;  %v6158_v58 = vld [vmem:[%s6984_s30 + $0x790] ss:$8 sps:$4 sm:$0xff]  }
 0x2e5   : > { %4153 = vmatpush1.bf16.msra.mxu0 %v6038_v31  ;;  %4031 = vmatprep.subr.bf16.mxu1 %v6043_v32  ;;  %v6131_v31 = vld [vmem:[%s6984_s30 + $0x700] ss:$8 sps:$4 sm:$0xff]   ;;  %v5307_v32 = vcombine.high %v7477_v29, %v7477_v29 }
 0x2e6   : > { %4154 = vmatprep.subr.bf16.mxu0 %v6046_v37  ;;  %v6136_v37 = vld [vmem:[%s6984_s30 + $0x714] ss:$8 sps:$4 sm:$0xff]  }
 0x2e8   : > { %4032 = vmatpush1.bf16.msra.mxu1 %v6041_v38  ;;  %v6134_v38 = vld [vmem:[%s6984_s30 + $0x710] ss:$8 sps:$4 sm:$0xff]  }
 0x2e9   : > { %4155 = vmatpush1.bf16.msra.mxu0 %v6044_v39  ;;  %4033 = vmatprep.subr.bf16.mxu1 %v6049_v40  ;;  %v6139_v39 = vld [vmem:[%s6984_s30 + $0x724] ss:$8 sps:$4 sm:$0xff]   ;;  %v6137_v40 = vld [vmem:[%s6984_s30 + $0x720] ss:$8 sps:$4 sm:$0xff]  }
 0x2ea   : > { %4156 = vmatprep.subr.bf16.mxu0 %v6052_v41  ;;  %v6142_v41 = vld [vmem:[%s6984_s30 + $0x734] ss:$8 sps:$4 sm:$0xff]  }
 0x2ec   : > { %4034 = vmatpush1.bf16.msra.mxu1 %v6047_v33  ;;  %v6140_v33 = vld [vmem:[%s6984_s30 + $0x730] ss:$8 sps:$4 sm:$0xff]  }
 0x2ed   : > { %4157 = vmatpush1.bf16.msra.mxu0 %v6050_v34  ;;  %4035 = vmatprep.subr.bf16.mxu1 %v6055_v35  ;;  %v6145_v34 = vld [vmem:[%s6984_s30 + $0x744] ss:$8 sps:$4 sm:$0xff]   ;;  %v6143_v35 = vld [vmem:[%s6984_s30 + $0x740] ss:$8 sps:$4 sm:$0xff]  }
 0x2ee   : > { %4158 = vmatprep.subr.bf16.mxu0 %v6058_v36  ;;  %v6148_v36 = vld [vmem:[%s6984_s30 + $0x754] ss:$8 sps:$4 sm:$0xff]  }
 0x2f0   : > { %4036 = vmatpush1.bf16.msra.mxu1 %v6053_v42  ;;  %v6146_v42 = vld [vmem:[%s6984_s30 + $0x750] ss:$8 sps:$4 sm:$0xff]  }
 0x2f1   : > { %4159 = vmatpush1.bf16.msra.mxu0 %v6056_v44  ;;  %4037 = vmatprep.subr.bf16.mxu1 %v6061_v45  ;;  %v6151_v44 = vld [vmem:[%s6984_s30 + $0x764] ss:$8 sps:$4 sm:$0xff]   ;;  %v6149_v45 = vld [vmem:[%s6984_s30 + $0x760] ss:$8 sps:$4 sm:$0xff]  }
 0x2f2   : > { %4160 = vmatprep.subr.bf16.mxu0 %v6064_v46  ;;  %v6154_v46 = vld [vmem:[%s6984_s30 + $0x774] ss:$8 sps:$4 sm:$0xff]  }
 0x2f4   : > { %4038 = vmatpush1.bf16.msra.mxu1 %v6059_v47  ;;  %v6181_v47 = vld [vmem:[%s6982_s18] ss:$16 sps:$4 sm:$0xff]  }
 0x2f5   : > { %4161 = vmatpush1.bf16.msra.mxu0 %v6062_v48  ;;  %4039 = vmatprep.subr.bf16.mxu1 %v6067_v49  ;;  %v6183_v48 = vld [vmem:[%s6982_s18 + $0x4] ss:$16 sps:$4 sm:$0xff]  }
 0x2f6   : > { %4162 = vmatprep.subr.bf16.mxu0 %v6070_v50  ;;  %v6186_v49 = vld [vmem:[%s6982_s18 + $0x24] ss:$16 sps:$4 sm:$0xff]   ;;  %v6152_v50 = vld [vmem:[%s6984_s30 + $0x770] ss:$8 sps:$4 sm:$0xff]  }
 0x2f8   : > { %4040 = vmatpush1.bf16.msra.mxu1 %v6065_v51  ;;  %v6184_v51 = vld [vmem:[%s6982_s18 + $0x20] ss:$16 sps:$4 sm:$0xff]  }
 0x2f9   : > { %4163 = vmatpush1.bf16.msra.mxu0 %v6068_v52  ;;  %4041 = vmatprep.subr.bf16.mxu1 %v6073_v53  ;;  %v6157_v52 = vld [vmem:[%s6984_s30 + $0x784] ss:$8 sps:$4 sm:$0xff]  }
 0x2fa   : > { %4164 = vmatprep.subr.bf16.mxu0 %v6076_v54  ;;  %v6189_v53 = vld [vmem:[%s6982_s18 + $0x44] ss:$16 sps:$4 sm:$0xff]   ;;  %v6155_v54 = vld [vmem:[%s6984_s30 + $0x780] ss:$8 sps:$4 sm:$0xff]  }
 0x2fc   : > { %4042 = vmatpush1.bf16.msra.mxu1 %v6071_v55  ;;  %v6187_v55 = vld [vmem:[%s6982_s18 + $0x40] ss:$16 sps:$4 sm:$0xff]  }
 0x2fd   : > { %4165 = vmatpush1.bf16.msra.mxu0 %v6074_v56  ;;  %4649 = vmatprep.subr.bf16.mxu1 %v6183_v48  ;;  %v6160_v56 = vld [vmem:[%s6984_s30 + $0x794] ss:$8 sps:$4 sm:$0xff]  }
 0x2fe   : > { %4175 = vmatprep.subr.bf16.mxu0 %v6083_v57  ;;  %v6192_v57 = vld [vmem:[%s6982_s18 + $0x64] ss:$16 sps:$4 sm:$0xff]  }
 0x2ff   : > { %4044 = vmatmul.mubr.bf16.vlgmr.msra.gmra.mrb[0].mxu1 %v5296_v62  ;;  %v6163_v62 = vld [vmem:[%s6984_s30 + $0x7a4] ss:$8 sps:$4 sm:$0xff]  }
 0x300   : > { %4167 = vmatmul.mubr.bf16.vlgmr.msra.gmra.mrb[0].mxu0 %v5302_v63  ;;  %4650 = vmatpush1.bf16.msra.mxu1 %v6181_v47  ;;  %v6195_v63 = vld [vmem:[%s6982_s18 + $0x84] ss:$16 sps:$4 sm:$0xff]  }
 0x301   : > { %4176 = vmatpush1.bf16.msra.mxu0 %v6081_v61  ;;  %4207 = vmatprep.mubr.bf16.mxu0 %v5305_v1  ;;  %v6190_v61 = vld [vmem:[%s6982_s18 + $0x60] ss:$16 sps:$4 sm:$0xff]  }
 0x302   : > { %4177 = vmatprep.subr.bf16.mxu0 %v6086_v0  ;;  %4651 = vmatprep.subr.bf16.mxu1 %v6186_v49  ;;  %v6161_v0 = vld [vmem:[%s6984_s30 + $0x7a0] ss:$8 sps:$4 sm:$0xff]  }
 0x303   : > { %v6193_v1 = vld [vmem:[%s6982_s18 + $0x80] ss:$16 sps:$4 sm:$0xff]  }
 0x304   : > { %4652 = vmatpush1.bf16.msra.mxu1 %v6184_v51 }
 0x305   : > { %4178 = vmatpush1.bf16.msra.mxu0 %v6084_v2  ;;  %4653 = vmatprep.subr.bf16.mxu1 %v6189_v53  ;;  %v6166_v2 = vld [vmem:[%s6984_s30 + $0x7b4] ss:$8 sps:$4 sm:$0xff]  }
 0x306   : > { %4179 = vmatprep.subr.bf16.mxu0 %v6089_v59  ;;  %v6198_v59 = vld [vmem:[%s6982_s18 + $0xa4] ss:$16 sps:$4 sm:$0xff]  }
 0x308   : > { %4654 = vmatpush1.bf16.msra.mxu1 %v6187_v55 }
 0x309   : > { %4180 = vmatpush1.bf16.msra.mxu0 %v6087_v60  ;;  %4655 = vmatprep.subr.bf16.mxu1 %v6192_v57  ;;  %v6164_v60 = vld [vmem:[%s6984_s30 + $0x7b0] ss:$8 sps:$4 sm:$0xff]  }
 0x30a   : > { %4181 = vmatprep.subr.bf16.mxu0 %v6092_v3  ;;  %v6196_v3 = vld [vmem:[%s6982_s18 + $0xa0] ss:$16 sps:$4 sm:$0xff]  }
 0x30c   : > { %4656 = vmatpush1.bf16.msra.mxu1 %v6190_v61  ;;  %v6232_v61 = vld [vmem:[%s6982_s18 + $0x28] ss:$16 sps:$4 sm:$0xff]  }
 0x30d   : > { %4182 = vmatpush1.bf16.msra.mxu0 %v6090_v8  ;;  %4657 = vmatprep.subr.bf16.mxu1 %v6195_v63  ;;  %v6169_v8 = vld [vmem:[%s6984_s30 + $0x7c4] ss:$8 sps:$4 sm:$0xff]   ;;  %v6235_v63 = vld [vmem:[%s6982_s18 + $0x48] ss:$16 sps:$4 sm:$0xff]  }
 0x30e   : > { %4183 = vmatprep.subr.bf16.mxu0 %v6095_v4  ;;  %v6201_v4 = vld [vmem:[%s6982_s18 + $0xc4] ss:$16 sps:$4 sm:$0xff]  }
 0x310   : > { %4658 = vmatpush1.bf16.msra.mxu1 %v6193_v1  ;;  %v6238_v1 = vld [vmem:[%s6982_s18 + $0x68] ss:$16 sps:$4 sm:$0xff]  }
 0x311   : > { %4184 = vmatpush1.bf16.msra.mxu0 %v6093_v5  ;;  %4659 = vmatprep.subr.bf16.mxu1 %v6198_v59  ;;  %v6167_v5 = vld [vmem:[%s6984_s30 + $0x7c0] ss:$8 sps:$4 sm:$0xff]  }
 0x312   : > { %4185 = vmatprep.subr.bf16.mxu0 %v6098_v7  ;;  %v6199_v7 = vld [vmem:[%s6982_s18 + $0xc0] ss:$16 sps:$4 sm:$0xff]   ;;  %v6241_v59 = vld [vmem:[%s6982_s18 + $0x88] ss:$16 sps:$4 sm:$0xff]  }
 0x314   : > { %4660 = vmatpush1.bf16.msra.mxu1 %v6196_v3  ;;  %v6244_v3 = vld [vmem:[%s6982_s18 + $0xa8] ss:$16 sps:$4 sm:$0xff]  }
 0x315   : > { %4186 = vmatpush1.bf16.msra.mxu0 %v6096_v11  ;;  %v6172_v11 = vld [vmem:[%s6984_s30 + $0x7d4] ss:$8 sps:$4 sm:$0xff]   ;;  %4661 = vmatprep.subr.bf16.mxu1 %v6201_v4  ;;  %v6247_v4 = vld [vmem:[%s6982_s18 + $0xc8] ss:$16 sps:$4 sm:$0xff]  }
 0x316   : > { %4187 = vmatprep.subr.bf16.mxu0 %v6101_v12  ;;  %v6204_v12 = vld [vmem:[%s6982_s18 + $0xe4] ss:$16 sps:$4 sm:$0xff]  }
 0x318   : > { %4662 = vmatpush1.bf16.msra.mxu1 %v6199_v7  ;;  %v6250_v7 = vld [vmem:[%s6982_s18 + $0xe8] ss:$16 sps:$4 sm:$0xff]  }
 0x319   : > { %4188 = vmatpush1.bf16.msra.mxu0 %v6099_v13  ;;  %v6170_v13 = vld [vmem:[%s6984_s30 + $0x7d0] ss:$8 sps:$4 sm:$0xff]   ;;  %4663 = vmatprep.subr.bf16.mxu1 %v6204_v12 }
 0x31a   : > { %4189 = vmatprep.subr.bf16.mxu0 %v6104_v14  ;;  %v6202_v14 = vld [vmem:[%s6982_s18 + $0xe0] ss:$16 sps:$4 sm:$0xff]   ;;  %v6253_v12 = vld [vmem:[%s6982_s18 + $0x108] ss:$16 sps:$4 sm:$0xff]  }
 0x31c   : > { %4664 = vmatpush1.bf16.msra.mxu1 %v6202_v14  ;;  %v6256_v14 = vld [vmem:[%s6982_s18 + $0x128] ss:$16 sps:$4 sm:$0xff]  }
 0x31d   : > { %4190 = vmatpush1.bf16.msra.mxu0 %v6102_v15  ;;  %v6175_v15 = vld [vmem:[%s6984_s30 + $0x7e4] ss:$8 sps:$4 sm:$0xff]  }
 0x31e   : > { %4191 = vmatprep.subr.bf16.mxu0 %v6107_v16  ;;  %v6207_v16 = vld [vmem:[%s6982_s18 + $0x104] ss:$16 sps:$4 sm:$0xff]  }
 0x31f   : > { %4665 = vmatprep.subr.bf16.mxu1 %v6207_v16  ;;  %v6259_v16 = vld [vmem:[%s6982_s18 + $0x148] ss:$16 sps:$4 sm:$0xff]  }
 0x321   : > { %4192 = vmatpush1.bf16.msra.mxu0 %v6105_v17  ;;  %v6173_v17 = vld [vmem:[%s6984_s30 + $0x7e0] ss:$8 sps:$4 sm:$0xff]  }
 0x322   : > { %4193 = vmatprep.subr.bf16.mxu0 %v6110_v18  ;;  %v6205_v18 = vld [vmem:[%s6982_s18 + $0x100] ss:$16 sps:$4 sm:$0xff]  }
 0x323   : > { %4666 = vmatpush1.bf16.msra.mxu1 %v6205_v18  ;;  %v6262_v18 = vld [vmem:[%s6982_s18 + $0x168] ss:$16 sps:$4 sm:$0xff]  }
 0x325   : > { %4194 = vmatpush1.bf16.msra.mxu0 %v6108_v19  ;;  %v6178_v19 = vld [vmem:[%s6984_s30 + $0x7f4] ss:$8 sps:$4 sm:$0xff]  }
 0x326   : > { %4195 = vmatprep.subr.bf16.mxu0 %v6113_v6  ;;  %v6210_v6 = vld [vmem:[%s6982_s18 + $0x124] ss:$16 sps:$4 sm:$0xff]  }
 0x327   : > { %4667 = vmatprep.subr.bf16.mxu1 %v6210_v6  ;;  %v6265_v6 = vld [vmem:[%s6982_s18 + $0x188] ss:$16 sps:$4 sm:$0xff]  }
 0x329   : > { %4196 = vmatpush1.bf16.msra.mxu0 %v6111_v9  ;;  %v6176_v9 = vld [vmem:[%s6984_s30 + $0x7f0] ss:$8 sps:$4 sm:$0xff]  }
 0x32a   : > { %4197 = vmatprep.subr.bf16.mxu0 %v6116_v10  ;;  %v6208_v10 = vld [vmem:[%s6982_s18 + $0x120] ss:$16 sps:$4 sm:$0xff]  }
 0x32b   : > { %4668 = vmatpush1.bf16.msra.mxu1 %v6208_v10  ;;  %v6268_v10 = vld [vmem:[%s6982_s18 + $0x1a8] ss:$16 sps:$4 sm:$0xff]  }
 0x32d   : > { %4198 = vmatpush1.bf16.msra.mxu0 %v6114_v43  ;;  %v6213_v43 = vld [vmem:[%s6982_s18 + $0x144] ss:$16 sps:$4 sm:$0xff]  }
 0x32e   : > { %4199 = vmatprep.subr.bf16.mxu0 %v6119_v20  ;;  %v5306_v20 = vcombine.low %v7477_v29, %v7477_v29  ;;  %4669 = vmatprep.subr.bf16.mxu1 %v6213_v43  ;;  %v6223_v29 = vld [vmem:[%s6982_s18 + $0x1c0] ss:$16 sps:$4 sm:$0xff]   ;;  %v6273_v43 = vld [vmem:[%s6982_s18 + $0x1cc] ss:$16 sps:$4 sm:$0xff]  }
 0x331   : > { %4200 = vmatpush1.bf16.msra.mxu0 %v6117_v21  ;;  %v6211_v21 = vld [vmem:[%s6982_s18 + $0x140] ss:$16 sps:$4 sm:$0xff]  }
 0x332   : > { %4201 = vmatprep.subr.bf16.mxu0 %v6122_v22  ;;  %v6216_v22 = vld [vmem:[%s6982_s18 + $0x164] ss:$16 sps:$4 sm:$0xff]   ;;  %4670 = vmatpush1.bf16.msra.mxu1 %v6211_v21  ;;  %v6276_v21 = vld [vmem:[%s6982_s18 + $0x1ec] ss:$16 sps:$4 sm:$0xff]  }
 0x333   : > { %4671 = vmatprep.subr.bf16.mxu1 %v6216_v22  ;;  %v6274_v22 = vld [vmem:[%s6982_s18 + $0x1e8] ss:$16 sps:$4 sm:$0xff]  }
 0x335   : > { %4202 = vmatpush1.bf16.msra.mxu0 %v6120_v23  ;;  %v6214_v23 = vld [vmem:[%s6982_s18 + $0x160] ss:$16 sps:$4 sm:$0xff]  }
 0x336   : > { %4203 = vmatprep.subr.bf16.mxu0 %v6125_v24  ;;  %v6219_v24 = vld [vmem:[%s6982_s18 + $0x184] ss:$16 sps:$4 sm:$0xff]   ;;  %4672 = vmatpush1.bf16.msra.mxu1 %v6214_v23 }
 0x337   : > { %4673 = vmatprep.subr.bf16.mxu1 %v6219_v24  ;;  %v4259_v23 = vld [vmem:[#allocation3] sm:$0xff]  ;;  %v4260_v24 = vld [vmem:[#allocation3 + $0x8] sm:$0xff] }
 0x339   : > { %4204 = vmatpush1.bf16.msra.mxu0 %v6123_v25  ;;  %v6217_v25 = vld [vmem:[%s6982_s18 + $0x180] ss:$16 sps:$4 sm:$0xff]  }
 0x33a   : > { %4205 = vmatprep.subr.bf16.mxu0 %v6128_v26  ;;  %v6222_v26 = vld [vmem:[%s6982_s18 + $0x1a4] ss:$16 sps:$4 sm:$0xff]   ;;  %4674 = vmatpush1.bf16.msra.mxu1 %v6217_v25 }
 0x33b   : > { %4675 = vmatprep.subr.bf16.mxu1 %v6222_v26 }
 0x33d   : > { %4206 = vmatpush1.bf16.msra.mxu0 %v6126_v27  ;;  %v6220_v27 = vld [vmem:[%s6982_s18 + $0x1a0] ss:$16 sps:$4 sm:$0xff]  }
 0x33e   : > { %4216 = vmatprep.subr.bf16.mxu0 %v6133_v28  ;;  %4676 = vmatpush1.bf16.msra.mxu1 %v6220_v27  ;;  %v6225_v28 = vld [vmem:[%s6982_s18 + $0x1c4] ss:$16 sps:$4 sm:$0xff]  }
 0x33f   : > { %4677 = vmatprep.subr.bf16.mxu1 %v6225_v28 }
 0x340   : > { %4208 = vmatmul.mubr.bf16.vlgmr.msra.gmra.mrb[0].mxu0 %v5304_v30 }
 0x341   : > { %4217 = vmatpush1.bf16.msra.mxu0 %v6131_v31  ;;  %4248 = vmatprep.mubr.bf16.mxu0 %v5307_v32 }
 0x342   : > { %4218 = vmatprep.subr.bf16.mxu0 %v6136_v37  ;;  %4678 = vmatpush1.bf16.msra.mxu1 %v6223_v29  ;;  %v6228_v37 = vld [vmem:[%s6982_s18 + $0x1e4] ss:$16 sps:$4 sm:$0xff]  }
 0x343   : > { %4679 = vmatprep.subr.bf16.mxu1 %v6228_v37 }
 0x345   : > { %4219 = vmatpush1.bf16.msra.mxu0 %v6134_v38 }
 0x346   : > { %4220 = vmatprep.subr.bf16.mxu0 %v6139_v39  ;;  %v6226_v39 = vld [vmem:[%s6982_s18 + $0x1e0] ss:$16 sps:$4 sm:$0xff]  }
 0x347   : > { %4680 = vmatpush1.bf16.msra.mxu1 %v6226_v39 }
 0x349   : > { %4221 = vmatpush1.bf16.msra.mxu0 %v6137_v40  ;;  %v6231_v40 = vld [vmem:[%s6982_s18 + $0xc] ss:$16 sps:$4 sm:$0xff]  }
 0x34a   : > { %4222 = vmatprep.subr.bf16.mxu0 %v6142_v41  ;;  %4690 = vmatprep.subr.bf16.mxu1 %v6231_v40  ;;  %v2583_v41 = vlaneseq }
 0x34d   : > { %4223 = vmatpush1.bf16.msra.mxu0 %v6140_v33  ;;  %v7549_v33 = vshrl.u32 %v2583_v41, 7 }
 0x34e   : > { %4224 = vmatprep.subr.bf16.mxu0 %v6145_v34 }
 0x34f   : > { %v2585_v34 = vsub.s32 0, %v7549_v33 }
 0x351   : > { %4225 = vmatpush1.bf16.msra.mxu0 %v6143_v35  ;;  %v2581_v35 = vld [vmem:[%s1410_s14] sm:$0x3] }
 0x352   : > { %4226 = vmatprep.subr.bf16.mxu0 %v6148_v36  ;;  %v2589_v36 = vsub.s32 1, %v7549_v33 }
 0x355   : > { %4227 = vmatpush1.bf16.msra.mxu0 %v6146_v42  ;;  %v2586_v42 = vrot.slane %v2581_v35, %v2585_v34 }
 0x356   : > { %4228 = vmatprep.subr.bf16.mxu0 %v6151_v44  ;;  %v2590_v44 = vrot.slane %v2581_v35, %v2589_v36 }
 0x359   : > { %4229 = vmatpush1.bf16.msra.mxu0 %v6149_v45 }
 0x35a   : > { %4230 = vmatprep.subr.bf16.mxu0 %v6154_v46 }
 0x35d   : > { %4231 = vmatpush1.bf16.msra.mxu0 %v6152_v50 }
 0x35e   : > { %4232 = vmatprep.subr.bf16.mxu0 %v6157_v52 }
 0x361   : > { %4233 = vmatpush1.bf16.msra.mxu0 %v6155_v54 }
 0x362   : > { %4234 = vmatprep.subr.bf16.mxu0 %v6160_v56  ;;  %v6229_v56 = vld [vmem:[%s6982_s18 + $0x8] ss:$16 sps:$4 sm:$0xff]  }
 0x365   : > { %4235 = vmatpush1.bf16.msra.mxu0 %v6158_v58  ;;  %v6234_v58 = vld [vmem:[%s6982_s18 + $0x2c] ss:$16 sps:$4 sm:$0xff]  }
 0x366   : > { %4236 = vmatprep.subr.bf16.mxu0 %v6163_v62  ;;  %v6237_v62 = vld [vmem:[%s6982_s18 + $0x4c] ss:$16 sps:$4 sm:$0xff]  }
 0x369   : > { %4237 = vmatpush1.bf16.msra.mxu0 %v6161_v0  ;;  %v6240_v0 = vld [vmem:[%s6982_s18 + $0x6c] ss:$16 sps:$4 sm:$0xff]  }
 0x36a   : > { %4238 = vmatprep.subr.bf16.mxu0 %v6166_v2  ;;  %v6243_v2 = vld [vmem:[%s6982_s18 + $0x8c] ss:$16 sps:$4 sm:$0xff]  }
 0x36d   : > { %4239 = vmatpush1.bf16.msra.mxu0 %v6164_v60  ;;  %v6246_v60 = vld [vmem:[%s6982_s18 + $0xac] ss:$16 sps:$4 sm:$0xff]  }
 0x36e   : > { %4240 = vmatprep.subr.bf16.mxu0 %v6169_v8  ;;  %v6249_v8 = vld [vmem:[%s6982_s18 + $0xcc] ss:$16 sps:$4 sm:$0xff]  }
 0x371   : > { %4241 = vmatpush1.bf16.msra.mxu0 %v6167_v5  ;;  %v6252_v5 = vld [vmem:[%s6982_s18 + $0xec] ss:$16 sps:$4 sm:$0xff]  }
 0x372   : > { %4242 = vmatprep.subr.bf16.mxu0 %v6172_v11  ;;  %v6255_v11 = vld [vmem:[%s6982_s18 + $0x10c] ss:$16 sps:$4 sm:$0xff]  }
 0x375   : > { %4243 = vmatpush1.bf16.msra.mxu0 %v6170_v13  ;;  %v6258_v13 = vld [vmem:[%s6982_s18 + $0x12c] ss:$16 sps:$4 sm:$0xff]  }
 0x376   : > { %4244 = vmatprep.subr.bf16.mxu0 %v6175_v15  ;;  %v6261_v15 = vld [vmem:[%s6982_s18 + $0x14c] ss:$16 sps:$4 sm:$0xff]  }
 0x379   : > { %4245 = vmatpush1.bf16.msra.mxu0 %v6173_v17  ;;  %v6264_v17 = vld [vmem:[%s6982_s18 + $0x16c] ss:$16 sps:$4 sm:$0xff]  }
 0x37a   : > { %4246 = vmatprep.subr.bf16.mxu0 %v6178_v19  ;;  %v6267_v19 = vld [vmem:[%s6982_s18 + $0x18c] ss:$16 sps:$4 sm:$0xff]  }
 0x37d   : > { %4247 = vmatpush1.bf16.msra.mxu0 %v6176_v9  ;;  %v6270_v9 = vld [vmem:[%s6982_s18 + $0x1ac] ss:$16 sps:$4 sm:$0xff]  }
 0x380   : > { %4249 = vmatmul.mubr.bf16.vlgmr.msra.gmra.mrb[0].mxu0 %v5306_v20  ;;  %v6271_v20 = vld [vmem:[%s6982_s18 + $0x1c8] ss:$16 sps:$4 sm:$0xff]  }
 0x3d2   : > { %v4045_v30 = vpop.f32.mrb[0].mxu1 }
 0x3d3   : > { %v4047_v31 = vpop.f32.mrb[1].mxu1  ;;  %v5720_v45 = vadd.f32 %v4045_v30, %v2586_v42  ;;  %v6277_v42 = vld [vmem:[%s7746_s7 + $0x40] sm:$0xff] (!%p5628_p11)  }
 0x3d4   : > { %v4049_v32 = vpop.f32.mrb[2].mxu1  ;;  %v5722_v46 = vadd.f32 %v4047_v31, %v2590_v44  ;;  %v4261_v31 = vld [vmem:[#allocation3 + $0x10] sm:$0xff]  ;;  %v6278_v44 = vld [vmem:[%s7746_s7 + $0xc0] sm:$0xff] (!%p5628_p11)   ;;  %5676 = vmatprep.subr.bf16.mxu0 (!%p5628_p11), %v6277_v42 }
 0x3d5   : > { %v4050_v38 = vpop.f32.mrb[3].mxu1  ;;  %v4262_v32 = vld [vmem:[#allocation3 + $0x18] sm:$0xff] }
 0x453   : > { %v4250_v47 = vpop.f32.mrb[0].mxu0 }
 0x454   : > { %v5721_v48 = vadd.f32 %v5720_v45, %v4250_v47  ;;  %v4252_v49 = vpop.f32.mrb[1].mxu0  ;;  %v6279_v45 = vld [vmem:[%s7746_s7] sm:$0xff] (!%p5628_p11)   ;;  %v6281_v47 = vld [vmem:[%s7746_s7 + $0x48] sm:$0xff] (!%p5628_p11)  }
 0x455   : > { %v5723_v50 = vadd.f32 %v5722_v46, %v4252_v49  ;;  %v4254_v51 = vpop.f32.mrb[2].mxu0  ;;  %v6280_v46 = vld [vmem:[%s7746_s7 + $0x80] sm:$0xff] (!%p5628_p11)   ;;  %5677 = vmatpush3.bf16.msra.mxu0 (!%p5628_p11), %v6279_v45  ;;  %v6283_v49 = vld [vmem:[%s7746_s7 + $0x8] sm:$0xff] (!%p5628_p11)  }
 0x456   : > { %v4257_v52 = vmax.f32 %v5721_v48, 0.0  ;;  %v4255_v53 = vpop.f32.mrb[3].mxu0  ;;  %v6282_v48 = vld [vmem:[%s7746_s7 + $0xc8] sm:$0xff] (!%p5628_p11)   ;;  %5678 = vmatprep.subr.bf16.mxu0 (!%p5628_p11), %v6281_v47  ;;  %v6285_v51 = vld [vmem:[%s7746_s7 + $0x50] sm:$0xff] (!%p5628_p11)  }
 0x457   : > { %v4258_v54 = vmax.f32 %v5723_v50, 0.0  ;;  %v6284_v50 = vld [vmem:[%s7746_s7 + $0x88] sm:$0xff] (!%p5628_p11)   ;;  %v6287_v53 = vld [vmem:[%s7746_s7 + $0x10] sm:$0xff] (!%p5628_p11)  }
 0x458   : > { %v7563_v57 = vpack.c.bf16 %v4257_v52, %v4257_v52  ;;  %v6286_v52 = vld [vmem:[%s7746_s7 + $0xd0] sm:$0xff] (!%p5628_p11)  }
 0x459   : > { %v4264_v55 = vpack.c.bf16 %v4258_v54, %v4258_v54  ;;  %5679 = vmatpush3.bf16.msra.mxu0 (!%p5628_p11), %v6283_v49  ;;  %v6288_v54 = vld [vmem:[%s7746_s7 + $0x90] sm:$0xff] (!%p5628_p11)  }
 0x45a   : > { %5680 = vmatprep.subr.bf16.mxu0 (!%p5628_p11), %v6285_v51 }
 0x45b   : > { %4681 = vmatprep.mubr.bf16.mxu1 %v4264_v55 }
 0x45c   : > { %4682 = vmatmul.mubr.bf16.vlgmr.msra.gmra.mrb[4].mxu1 %v7563_v57 }
 0x45d   : > { %4691 = vmatpush1.bf16.msra.mxu1 %v6229_v56  ;;  %4722 = vmatprep.mubr.bf16.mxu1 %v4264_v55  ;;  %v6289_v55 = vld [vmem:[%s7746_s7 + $0x58] sm:$0xff] (!%p5628_p11)  }
 0x45e   : > { %4692 = vmatprep.subr.bf16.mxu1 %v6234_v58  ;;  %5681 = vmatpush3.bf16.msra.mxu0 (!%p5628_p11), %v6287_v53  ;;  %v6290_v56 = vld [vmem:[%s7746_s7 + $0xd8] sm:$0xff] (!%p5628_p11)  }
 0x45f   : > { %5682 = vmatprep.subr.bf16.mxu0 (!%p5628_p11), %v6289_v55  ;;  %v6292_v58 = vld [vmem:[%s7746_s7 + $0x98] sm:$0xff] (!%p5628_p11)  }
 0x461   : > { %4693 = vmatpush1.bf16.msra.mxu1 %v6232_v61  ;;  %v6293_v61 = vld [vmem:[%s7746_s7 + $0x60] sm:$0xff] (!%p5628_p11)  }
 0x462   : > { %4694 = vmatprep.subr.bf16.mxu1 %v6237_v62  ;;  %v6294_v62 = vld [vmem:[%s7746_s7 + $0xe0] sm:$0xff] (!%p5628_p11)  }
 0x465   : > { %4695 = vmatpush1.bf16.msra.mxu1 %v6235_v63  ;;  %v6295_v63 = vld [vmem:[%s7746_s7 + $0x20] sm:$0xff] (!%p5628_p11)  }
 0x466   : > { %4696 = vmatprep.subr.bf16.mxu1 %v6240_v0  ;;  %v6296_v0 = vld [vmem:[%s7746_s7 + $0xa0] sm:$0xff] (!%p5628_p11)  }
 0x469   : > { %4697 = vmatpush1.bf16.msra.mxu1 %v6238_v1  ;;  %v6297_v1 = vld [vmem:[%s7746_s7 + $0x68] sm:$0xff] (!%p5628_p11)  }
 0x46a   : > { %4698 = vmatprep.subr.bf16.mxu1 %v6243_v2  ;;  %v6298_v2 = vld [vmem:[%s7746_s7 + $0xe8] sm:$0xff] (!%p5628_p11)  }
 0x46d   : > { %4699 = vmatpush1.bf16.msra.mxu1 %v6241_v59  ;;  %v6299_v59 = vld [vmem:[%s7746_s7 + $0x28] sm:$0xff] (!%p5628_p11)  }
 0x46e   : > { %4700 = vmatprep.subr.bf16.mxu1 %v6246_v60  ;;  %v6300_v60 = vld [vmem:[%s7746_s7 + $0xa8] sm:$0xff] (!%p5628_p11)  }
 0x471   : > { %4701 = vmatpush1.bf16.msra.mxu1 %v6244_v3  ;;  %v6301_v3 = vld [vmem:[%s7746_s7 + $0x70] sm:$0xff] (!%p5628_p11)  }
 0x472   : > { %4702 = vmatprep.subr.bf16.mxu1 %v6249_v8  ;;  %v6302_v8 = vld [vmem:[%s7746_s7 + $0xf0] sm:$0xff] (!%p5628_p11)  }
 0x475   : > { %4703 = vmatpush1.bf16.msra.mxu1 %v6247_v4  ;;  %v6303_v4 = vld [vmem:[%s7746_s7 + $0x30] sm:$0xff] (!%p5628_p11)  }
 0x476   : > { %4704 = vmatprep.subr.bf16.mxu1 %v6252_v5  ;;  %v6304_v5 = vld [vmem:[%s7746_s7 + $0xb0] sm:$0xff] (!%p5628_p11)  }
 0x479   : > { %4705 = vmatpush1.bf16.msra.mxu1 %v6250_v7  ;;  %v6305_v7 = vld [vmem:[%s7746_s7 + $0x78] sm:$0xff] (!%p5628_p11)  }
 0x47a   : > { %4706 = vmatprep.subr.bf16.mxu1 %v6255_v11  ;;  %v4763_v11 = vsub.s32 (!%p5628_p11), 3, %v7549_v33 }
 0x47d   : > { %4707 = vmatpush1.bf16.msra.mxu1 %v6253_v12  ;;  %v6306_v12 = vld [vmem:[%s7746_s7 + $0xf8] sm:$0xff] (!%p5628_p11)  }
 0x47e   : > { %4708 = vmatprep.subr.bf16.mxu1 %v6258_v13  ;;  %v4759_v13 = vsub.s32 (!%p5628_p11), 2, %v7549_v33 }
 0x481   : > { %4709 = vmatpush1.bf16.msra.mxu1 %v6256_v14  ;;  %v6307_v14 = vld [vmem:[%s7746_s7 + $0x38] sm:$0xff] (!%p5628_p11)  }
 0x482   : > { %4710 = vmatprep.subr.bf16.mxu1 %v6261_v15  ;;  %v6308_v15 = vld [vmem:[%s7746_s7 + $0xb8] sm:$0xff] (!%p5628_p11)  }
 0x485   : > { %4711 = vmatpush1.bf16.msra.mxu1 %v6259_v16 }
 0x486   : > { %4712 = vmatprep.subr.bf16.mxu1 %v6264_v17  ;;  %v4747_v17 = vld [vmem:[%s7745_s6] sm:$0xf] (!%p5628_p11) }
 0x489   : > { %4713 = vmatpush1.bf16.msra.mxu1 %v6262_v18 }
 0x48a   : > { %4714 = vmatprep.subr.bf16.mxu1 %v6267_v19  ;;  %v4756_v19 = vrot.slane (!%p5628_p11), %v4747_v17, %v2589_v36  ;;  %v5629_v36 = vld [vmem:[%s7747_s8] ss:$0 sm:$0xff] (!%p5628_p11) }
 0x48d   : > { %4715 = vmatpush1.bf16.msra.mxu1 %v6265_v6  ;;  %v4764_v6 = vrot.slane (!%p5628_p11), %v4747_v17, %v4763_v11 }
 0x48e   : > { %4716 = vmatprep.subr.bf16.mxu1 %v6270_v9 }
 0x491   : > { %4717 = vmatpush1.bf16.msra.mxu1 %v6268_v10  ;;  %v4752_v10 = vrot.slane (!%p5628_p11), %v4747_v17, %v2585_v34 }
 0x492   : > { %4718 = vmatprep.subr.bf16.mxu1 %v6273_v43 }
 0x495   : > { %4719 = vmatpush1.bf16.msra.mxu1 %v6271_v20  ;;  %v4760_v20 = vrot.slane (!%p5628_p11), %v4747_v17, %v4759_v13 }
 0x496   : > { %4720 = vmatprep.subr.bf16.mxu1 %v6276_v21 }
 0x499   : > { %4721 = vmatpush1.bf16.msra.mxu1 %v6274_v22 }
 0x49a   : > { %5698 = vmatprep.subr.bf16.mxu1 (!%p5628_p11), %v6278_v44 }
 0x49c   : > { %4723 = vmatmul.mubr.bf16.vlgmr.msra.gmra.mrb[8].mxu1 %v7563_v57  ;;  %v6291_v57 = vld [vmem:[%s7746_s7 + $0x18] sm:$0xff] (!%p5628_p11)  }
 0x49d   : > { %5699 = vmatpush3.bf16.msra.mxu1 (!%p5628_p11), %v6280_v46  ;;  %5683 = vmatpush3.bf16.msra.mxu0 (!%p5628_p11), %v6291_v57 }
 0x49e   : > { %5700 = vmatprep.subr.bf16.mxu1 (!%p5628_p11), %v6282_v48  ;;  %5684 = vmatprep.subr.bf16.mxu0 (!%p5628_p11), %v6293_v61 }
 0x4a1   : > { %5701 = vmatpush3.bf16.msra.mxu1 (!%p5628_p11), %v6284_v50  ;;  %5685 = vmatpush3.bf16.msra.mxu0 (!%p5628_p11), %v6295_v63 }
 0x4a2   : > { %5702 = vmatprep.subr.bf16.mxu1 (!%p5628_p11), %v6286_v52  ;;  %5686 = vmatprep.subr.bf16.mxu0 (!%p5628_p11), %v6297_v1 }
 0x4a5   : > { %5703 = vmatpush3.bf16.msra.mxu1 (!%p5628_p11), %v6288_v54  ;;  %5687 = vmatpush3.bf16.msra.mxu0 (!%p5628_p11), %v6299_v59 }
 0x4a6   : > { %5704 = vmatprep.subr.bf16.mxu1 (!%p5628_p11), %v6290_v56  ;;  %5688 = vmatprep.subr.bf16.mxu0 (!%p5628_p11), %v6301_v3 }
 0x4a9   : > { %5705 = vmatpush3.bf16.msra.mxu1 (!%p5628_p11), %v6292_v58  ;;  %5689 = vmatpush3.bf16.msra.mxu0 (!%p5628_p11), %v6303_v4 }
 0x4aa   : > { %5706 = vmatprep.subr.bf16.mxu1 (!%p5628_p11), %v6294_v62  ;;  %5690 = vmatprep.subr.bf16.mxu0 (!%p5628_p11), %v6305_v7 }
 0x4ad   : > { %5707 = vmatpush3.bf16.msra.mxu1 (!%p5628_p11), %v6296_v0  ;;  %5691 = vmatpush3.bf16.msra.mxu0 (!%p5628_p11), %v6307_v14 }
 0x4ae   : > { %5708 = vmatprep.subr.bf16.mxu1 (!%p5628_p11), %v6298_v2 }
 0x4b1   : > { %5709 = vmatpush3.bf16.msra.mxu1 (!%p5628_p11), %v6300_v60 }
 0x4b2   : > { %5710 = vmatprep.subr.bf16.mxu1 (!%p5628_p11), %v6302_v8 }
 0x4b5   : > { %5711 = vmatpush3.bf16.msra.mxu1 (!%p5628_p11), %v6304_v5 }
 0x4b6   : > { %5712 = vmatprep.subr.bf16.mxu1 (!%p5628_p11), %v6306_v12 }
 0x4b9   : > { %5713 = vmatpush3.bf16.msra.mxu1 (!%p5628_p11), %v6308_v15 }
 0x52f   : > { %v4683_v25 = vpop.f32.mrb[4].mxu1 }
 0x530   : > { %v4731_v26 = vadd.f32 %v4683_v25, %v4259_v23  ;;  %v4685_v27 = vpop.f32.mrb[5].mxu1 }
 0x531   : > { %v4732_v28 = vadd.f32 %v4685_v27, %v4260_v24  ;;  %v4687_v29 = vpop.f32.mrb[6].mxu1 }
 0x532   : > { %4735 = vst [vmem:[#allocation3] sm:$0xff] %v4731_v26  ;;  %v4688_v30 = vpop.f32.mrb[7].mxu1 }
 0x533   : > { %4736 = vst [vmem:[#allocation3 + $0x8] sm:$0xff] %v4732_v28 }
 0x539   : > { %v4743_v9 = vld [vmem:[#allocation3] sm:$0xff] (!%p5628_p11) }
 0x53a   : > { %v4744_v16 = vld [vmem:[#allocation3 + $0x8] sm:$0xff] (!%p5628_p11)  ;;  %v4769_v23 = vadd.f32 (!%p5628_p11), %v4752_v10, %v4743_v9 }
 0x53b   : > { %v4770_v21 = vadd.f32 (!%p5628_p11), %v4756_v19, %v4744_v16 }
 0x53c   : > { %v4773_v27 = vmax.f32 (!%p5628_p11), %v4769_v23, 0.0 }
 0x53d   : > { %v4774_v25 = vmax.f32 (!%p5628_p11), %v4770_v21, 0.0 }
 0x53f   : > { %v4778_v29 = vpack.c.bf16 (!%p5628_p11), %v4774_v25, %v4774_v25 }
 0x541   : > { %5076 = vmatprep.mubr.bf16.mxu0 (!%p5628_p11), %v4778_v29 }
 0x56d   : > { %4742 = sbr.rel (%p5628_p11) target bundleno = 1628 (0x65c), region = 102 }
 0x56f   : > { %v4724_v37 = vpop.f32.mrb[8].mxu1 }
 0x570   : > { %v4733_v38 = vadd.f32 %v4724_v37, %v4261_v31  ;;  %v4726_v39 = vpop.f32.mrb[9].mxu1  ;;  %v4777_v31 = vpack.c.bf16 (!%p5628_p11), %v4773_v27, %v4773_v27 }
 0x571   : > { %v4734_v40 = vadd.f32 %v4726_v39, %v4262_v32  ;;  %v4728_v41 = vpop.f32.mrb[10].mxu1 }
 0x572   : > { %4737 = vst [vmem:[#allocation3 + $0x10] sm:$0xff] %v4733_v38  ;;  %v4729_v35 = vpop.f32.mrb[11].mxu1  ;;  %5077 = vmatmul.mubr.bf16.vlgmr.msra.gmra.mrb[0].mxu0 (!%p5628_p11), %v4777_v31 }
 0x573   : > { %4738 = vst [vmem:[#allocation3 + $0x18] sm:$0xff] %v4734_v40 }
 0x579   : > { %v4745_v43 = vld [vmem:[#allocation3 + $0x10] sm:$0xff] }
 0x57a   : > { %v4746_v18 = vld [vmem:[#allocation3 + $0x18] sm:$0xff]  ;;  %v4771_v24 = vadd.f32 %v4760_v20, %v4745_v43 }
 0x57b   : > { %v4772_v22 = vadd.f32 %v4764_v6, %v4746_v18 }
 0x57c   : > { %v4775_v28 = vmax.f32 %v4771_v24, 0.0 }
 0x57d   : > { %v4776_v26 = vmax.f32 %v4772_v22, 0.0 }
 0x57e   : > { %v4779_v32 = vpack.c.bf16 %v4775_v28, %v4775_v28 }
 0x57f   : > { %v4780_v30 = vpack.c.bf16 %v4776_v26, %v4776_v26 }
 0x581   : > { %5116 = vmatprep.mubr.bf16.mxu1 %v4780_v30 }
 0x582   : > { %5117 = vmatmul.mubr.bf16.vlgmr.msra.gmra.mrb[0].mxu1 %v4779_v32 }
 0x645   : > { %v5692_v33 = vpop.f32.mrb[0].mxu0 }
 0x646   : > { %v5693_v37 = vpop.f32.mrb[1].mxu0 }
 0x647   : > { %v5694_v39 = vadd.f32 %v5693_v37, %v5692_v33  ;;  %v5695_v41 = vpop.f32.mrb[2].mxu0 }
 0x648   : > { %v5696_v42 = vpop.f32.mrb[3].mxu0 }
 0x649   : > { %v5079_v45 = vadd.f32 %v5694_v39, %v5629_v36 }
 0x655   : > { %v5714_v34 = vpop.f32.mrb[0].mxu1 }
 0x656   : > { %v5715_v38 = vpop.f32.mrb[1].mxu1 }
 0x657   : > { %v5716_v40 = vadd.f32 %v5715_v38, %v5714_v34  ;;  %v5717_v35 = vpop.f32.mrb[2].mxu1 }
 0x658   : > { %v5718_v44 = vpop.f32.mrb[3].mxu1 }
 0x659   : > { %v5119_v46 = vadd.f32 %v5716_v40, %v5079_v45 }
 0x65b   : > { %5125 = vst.msk [vmem:[#allocation5] sm:$0xff] %vm5124_vm1, %v5119_v46 }
 0x65c PF: > { %p5752_p12 = scmp.eq.s32.totalorder %s6432_s12, 3  ;;  %s6365_s25 = smov [#allocation5]  }
 0x65d   : > { %s5133_s14 = sshll.u32 %s6365_s25, 4  ;;  %s5134_s14 = int_to_ptr.vmem [resolvable:$true] %s5133_s14 }
 0x65e   : > { %s6309_s18 = scalar_lea.vmem %s5134_s14, 128  ;;  %p6316_p2 = scmp.lt.s32.totalorder %s5134_s14, %s5134_s14 }
 0x65f   : > { %p6310_p13 = scmp.ne.s32.totalorder %s5134_s14, %s6309_s18  ;;  %p6317_p3 = scmp.lt.s32.totalorder %s6309_s18, %s6309_s18 }
 0x661   : > { %p6311_p0 = pnand %p6310_p13, %p5752_p12  ;;  %p6318_p4 = por %p6317_p3, %p6316_p2 }
 0x663   : > { %p6312_p1 = pneg %p6311_p0 }
 0x665   : > { %p6319_p5 = pnand %p6318_p4, %p6312_p1 }
 0x667   : > { %6322 = shalt.err (!%p6319_p5)
}
 0x668   : > { %s6323_s28 = scalar_lea.hbm %s7748_s9, 128 }
 0x669   : > { %p6324_p6 = scmp.ne.s32.totalorder %s7748_s9, %s6323_s28  ;;  %p6329_p9 = scmp.lt.u32.totalorder %s6323_s28, %s7748_s9 }
 0x66b   : > { %p6325_p7 = pnand %p6324_p6, %p5752_p12 }
 0x66d   : > { %p6326_p8 = pneg %p6325_p7 }
 0x66f   : > { %p6331_p10 = pnand %p6329_p9, %p6326_p8 }
 0x671   : > { %6334 = shalt.err (!%p6331_p10)
}
 0x672   : > { %5749 = dma.vmem_to_hbm [thread:$0]  (%p5752_p12), %s5134_s14, 128, %s7748_s9, [#allocation6]  }
 0x673   : > { %6348 = dma.done.wait (%p5752_p12), [#allocation6], 128  }
 0x674   : > { %6350 = vsyncadd (%p5752_p12), [#allocation6], 4294967168 }
 0x675 PF: > { %p17_p11 = scmp.ge.s32.totalorder %s6435_s13, 6   ;;  %s7749_s30 = smov %s6357_s10 }
 0x676   : > { %s7750_s10 = smov %s6444_s16  ;;  %s7751_s11 = smov %s6435_s13 }
 0x677   :  { %19 = sbr.rel (!%p17_p11) target bundleno = 2 (0x2), region = 140 }
 0x67e   :  { %5146 = vsyncpa [#allocation6], 1 }
 0x67f   :  { %5148 = vsyncpa [#allocation6 + $0x1], 1 }

</bundles_post_ra>
